<compile_context>
chip_gen: v7x
topology: tpu7x:2x2x1
jax: 0.10.0
libtpu: 0.0.40
codegen_flags: <defaults>
</compile_context>

<pallas_src>
import jax
import jax.numpy as jnp
from jax import lax
from jax.experimental import pallas as pl
from jax.experimental.pallas import tpu as pltpu

BN_EPS = 1e-5
LEAKY_SLOPE = 0.01
PAD = 2  # spatial zero pad kept around activations; >=2 keeps every in-kernel tap slice in range


# ----------------------------------------------------------------------------
# Fused Pallas kernel:
#   conv1 3x3 (pad=1, over the already-concatenated input) + BN + LeakyReLU  -> VMEM scratch
#   conv2 3x3 (pad=1, reading the scratch)                 + BN + LeakyReLU  -> HBM output
# Activations use a zero-padded, row-major-flattened NHWC layout (P = (H+2*PAD)*(W+2*PAD)).
# ----------------------------------------------------------------------------
def _make_fused_doubleconv_kernel(H, W, cin, cout, row_chunk):
    Wp = W + 2 * PAD
    M = row_chunk * Wp  # matmul M-dim per chunk (padded-width rows, flattened)
    offs = tuple((kh - 1) * Wp + (kw - 1) for kh in range(3) for kw in range(3))

    def kernel(x_ref, w1_ref, s1_ref, b1_ref, w2_ref, s2_ref, b2_ref, o_ref, h1_ref):
        # ---- interior-column mask, computed in-kernel (no (P,1) f32 HBM input) ----
        # col = idx mod Wp via a division-free floor trick; the +0.5 keeps floor exact.
        idx = lax.broadcasted_iota(jnp.int32, (M, 1), 0).astype(jnp.float32)
        row = jnp.floor((idx + 0.5) * (1.0 / Wp))
        col = idx - row * Wp
        mask = jnp.logical_and(col >= PAD, col < PAD + W).astype(jnp.float32)  # (M, 1)

        # ---- zero only the top/bottom PAD row bands of the h1 scratch (conv2's padding);
        #      side columns of interior rows are zeroed by the mask on store. ----
        zband = jnp.zeros((PAD * Wp, cout), h1_ref.dtype)
        h1_ref[pl.ds(0, PAD * Wp), :] = zband
        h1_ref[pl.ds((H + PAD) * Wp, PAD * Wp), :] = zband

        def conv_chunk(load_tap, w_ref):
            # 9 shifted slices of the flat VMEM buffer feed 9 accumulated MXU matmuls.
            # Per-kh partial sums (3 independent chains of 3) instead of one 9-deep chain.
            acc = None
            for kh in range(3):
                part = None
                for kw in range(3):
                    t = kh * 3 + kw
                    d = jnp.dot(load_tap(offs[t]), w_ref[t],
                                preferred_element_type=jnp.float32)
                    part = d if part is None else part + d
                acc = part if acc is None else acc + part
            return acc

        def epilogue(acc, s_ref, b_ref):
            # f32 epilogue (v5e has no bf16 VPU): BN scale + (bias+shift) + LeakyReLU.
            y = acc * s_ref[...] + b_ref[...]
            return jnp.maximum(y, y * LEAKY_SLOPE)

        # ---- phase 1: conv1 + BN + LeakyReLU, result stays in VMEM (padded layout) ----
        for r0 in range(0, H, row_chunk):
            base = (r0 + PAD) * Wp
            acc = conv_chunk(lambda d: x_ref[0, pl.ds(base + d, M), :], w1_ref)
            y = epilogue(acc, s1_ref, b1_ref) * mask          # zero the wrap-around side cols
            h1_ref[pl.ds(base, M), :] = y.astype(h1_ref.dtype)

        # ---- phase 2: conv2 + BN + LeakyReLU, dense (no padded rows) store to HBM ----
        for r0 in range(0, H, row_chunk):
            base = (r0 + PAD) * Wp
            acc = conv_chunk(lambda d: h1_ref[pl.ds(base + d, M), :], w2_ref)
            y = epilogue(acc, s2_ref, b2_ref)                 # side cols discarded in wrapper
            o_ref[0, pl.ds(r0 * Wp, M), :] = y.astype(o_ref.dtype)

    return kernel


def _pick_row_chunk(H, Wp, cout):
    # Keep the f32 accumulator footprint modest (M * ceil(Cout/128) sublanes <= 256) so the
    # per-chunk dot results / accumulator don't blow vreg budget at lane-sparse Cout.
    lane_tiles = max(1, -(-cout // 128))
    best = 1
    for rc in range(1, H + 1):
        if H % rc == 0 and rc * Wp * lane_tiles <= 256:
            best = rc
    return best


def fused_doubleconv(x_flat, w1_taps, s1, b1, w2_taps, s2, b2, *, H, W):
    """x_flat: (N, (H+2*PAD)*(W+2*PAD), Cin) bf16, zero-padded flat NHWC.
       wX_taps: (9, CinX, Cout) bf16 raw conv taps (tap index t = kh*3 + kw).
       sX / bX: (Cout,) f32 BN scale / (conv bias + BN shift) folded.
       Returns (N, H*(W+2*PAD), Cout) f32 (row-dense, width still padded)."""
    N, P, cin = x_flat.shape
    Wp = W + 2 * PAD
    assert P == (H + 2 * PAD) * Wp
    cout = w1_taps.shape[-1]
    row_chunk = _pick_row_chunk(H, Wp, cout)

    kernel = _make_fused_doubleconv_kernel(H, W, cin, cout, row_chunk)

    vec = lambda a: a.reshape(1, cout).astype(jnp.float32)

    return pl.pallas_call(
        kernel,
        out_shape=jax.ShapeDtypeStruct((N, H * Wp, cout), jnp.float32),
        grid=(N,),
        in_specs=[
            pl.BlockSpec((1, P, cin), lambda n: (n, 0, 0)),
            pl.BlockSpec((9, cin, cout), lambda n: (0, 0, 0)),
            pl.BlockSpec((1, cout), lambda n: (0, 0)),
            pl.BlockSpec((1, cout), lambda n: (0, 0)),
            pl.BlockSpec((9, cout, cout), lambda n: (0, 0, 0)),
            pl.BlockSpec((1, cout), lambda n: (0, 0)),
            pl.BlockSpec((1, cout), lambda n: (0, 0)),
        ],
        out_specs=pl.BlockSpec((1, H * Wp, cout), lambda n: (n, 0, 0)),
        scratch_shapes=[pltpu.VMEM((P, cout), jnp.bfloat16)],   # conv1 output kept on-chip
        compiler_params=pltpu.CompilerParams(
            dimension_semantics=("parallel",),          # batch images independent
            vmem_limit_bytes=48 * 1024 * 1024,          # fits v7x's 64 MiB physical; fine on v5e/v6e
        ),
    )(x_flat, w1_taps, vec(s1), vec(b1), w2_taps, vec(s2), vec(b2))


# ----------------------------------------------------------------------------
# The Up module (parameters initialized deterministically in-script; inference-mode BN)
# ----------------------------------------------------------------------------
class UpPallas:
    def __init__(self, in_ch, out_ch, key):
        self.in_ch, self.out_ch = in_ch, out_ch
        c_half = in_ch // 2
        ks = jax.random.split(key, 4)

        def w(key, shape, fan_in):
            return (jax.random.normal(key, shape, jnp.float32) / jnp.sqrt(fan_in)).astype(jnp.float32)

        # up: ConvTranspose2d(in_ch//2, in_ch//2, 2, stride=2); torch weight layout (Cin, Cout, 2, 2)
        self.w_up = w(ks[0], (c_half, c_half, 2, 2), c_half * 4)
        self.b_up = 0.01 * jnp.arange(c_half, dtype=jnp.float32)

        # DoubleConv: conv1 3x3 (in_ch -> out_ch), conv2 3x3 (out_ch -> out_ch)
        self.w1 = w(ks[1], (out_ch, in_ch, 3, 3), in_ch * 9)
        self.b1 = 0.02 * jnp.arange(out_ch, dtype=jnp.float32)
        self.w2 = w(ks[2], (out_ch, out_ch, 3, 3), out_ch * 9)
        self.b2 = -0.015 * jnp.arange(out_ch, dtype=jnp.float32)

        # BatchNorm params (inference mode, non-trivial values)
        ar = jnp.arange(out_ch, dtype=jnp.float32)
        self.g1, self.be1, self.m1, self.v1 = 1.0 + 0.05 * ar, 0.1 - 0.02 * ar, 0.03 * ar, 1.0 + 0.1 * ar
        self.g2, self.be2, self.m2, self.v2 = 1.0 - 0.03 * ar, -0.05 + 0.01 * ar, -0.02 * ar, 0.5 + 0.05 * ar

        # ---- one-time weight prep: bf16 taps (BN scale kept in f32 epilogue), folded bias ----
        self.s1 = self.g1 / jnp.sqrt(self.v1 + BN_EPS)
        self.b1_eff = self.be1 + self.s1 * (self.b1 - self.m1)
        self.s2 = self.g2 / jnp.sqrt(self.v2 + BN_EPS)
        self.b2_eff = self.be2 + self.s2 * (self.b2 - self.m2)
        # (Cout, Cin, 3, 3) -> (9, Cin, Cout), tap t = kh*3 + kw. Channel order matches
        # torch.cat([x2, x1], dim=1) because the wrapper concatenates [x2, x1_up] the same way.
        self.w1_taps = jnp.transpose(self.w1, (2, 3, 1, 0)).reshape(9, in_ch, out_ch).astype(jnp.bfloat16)
        self.w2_taps = jnp.transpose(self.w2, (2, 3, 1, 0)).reshape(9, out_ch, out_ch).astype(jnp.bfloat16)
        # ConvTranspose weight as a single (Cin, kh*kw*Cout) matrix for the bf16 MXU dot.
        self.w_up_mat = jnp.transpose(self.w_up, (0, 2, 3, 1)).reshape(c_half, 4 * c_half).astype(jnp.bfloat16)

        self._forward_jit = jax.jit(self._forward)

    def _forward(self, x1_nchw, x2_nchw):
        x1 = jnp.transpose(x1_nchw, (0, 2, 3, 1)).astype(jnp.float32)  # -> NHWC
        x2 = jnp.transpose(x2_nchw, (0, 2, 3, 1)).astype(jnp.float32)
        N, H1, W1, c_half = x1.shape
        H, W = 2 * H1, 2 * W1
        Wp = W + 2 * PAD

        # ConvTranspose2d(k=2, s=2) as one bf16 2-D matmul + pixel shuffle (left to XLA:
        # K = c_half is far too small to justify a dedicated pallas_call).
        y = jnp.dot(x1.reshape(N * H1 * W1, c_half).astype(jnp.bfloat16), self.w_up_mat,
                    preferred_element_type=jnp.float32)
        y = y.reshape(N, H1, W1, 2, 2, c_half) + self.b_up
        x1_up = jnp.transpose(y, (0, 1, 3, 2, 4, 5)).reshape(N, H, W, c_half)

        # Channel concat done here (fuses with the mandatory pad/cast/flatten copy),
        # then a single zero-padded flat bf16 buffer feeds the fused DoubleConv kernel.
        x_cat = jnp.concatenate([x2, x1_up], axis=-1)                 # (N, H, W, in_ch)
        xp = jnp.pad(x_cat, ((0, 0), (PAD, PAD), (PAD, PAD), (0, 0))).astype(jnp.bfloat16)
        x_flat = xp.reshape(N, (H + 2 * PAD) * Wp, self.in_ch)

        out_flat = fused_doubleconv(x_flat, self.w1_taps, self.s1, self.b1_eff,
                                    self.w2_taps, self.s2, self.b2_eff, H=H, W=W)
        out = out_flat.reshape(N, H, Wp, self.out_ch)[:, :, PAD:PAD + W, :]
        # TODO(synk): use_dropblock branch is a no-op (pass) in the reference module.
        return jnp.transpose(out, (0, 3, 1, 2))  # back to NCHW

    def __call__(self, x1_nchw, x2_nchw):
        return self._forward_jit(x1_nchw, x2_nchw)


# ----------------------------------------------------------------------------
# Pure-JAX reference (lax convs, f32) for a sanity check
# ----------------------------------------------------------------------------
def _ref_forward(m, x1_nchw, x2_nchw):
    x1 = jnp.transpose(x1_nchw, (0, 2, 3, 1))
    x2 = jnp.transpose(x2_nchw, (0, 2, 3, 1))
    N, H, W, C = x1.shape
    up = jnp.einsum('nhwc,cokl->nhkwlo', x1, m.w_up).reshape(N, 2 * H, 2 * W, -1) + m.b_up
    x = jnp.concatenate([x2, up], axis=-1)

    def block(x, w, b, g, be, mu, var):
        wh = jnp.transpose(w, (2, 3, 1, 0))  # HWIO
        y = lax.conv_general_dilated(x, wh, (1, 1), ((1, 1), (1, 1)),
                                     dimension_numbers=('NHWC', 'HWIO', 'NHWC')) + b
        y = g * (y - mu) / jnp.sqrt(var + BN_EPS) + be
        return jnp.where(y >= 0, y, LEAKY_SLOPE * y)

    x = block(x, m.w1, m.b1, m.g1, m.be1, m.m1, m.v1)
    x = block(x, m.w2, m.b2, m.g2, m.be2, m.m2, m.v2)
    return jnp.transpose(x, (0, 3, 1, 2))


if __name__ == "__main__":
    key = jax.random.PRNGKey(0)
    k1, k2, kp = jax.random.split(key, 3)

    in_ch, out_ch = 8, 8
    # x1: low-res feature map (to be up-sampled), x2: skip connection (already 2x size)
    x1 = jax.random.normal(k1, (2, in_ch // 2, 8, 8), jnp.float32)     # NCHW
    x2 = jax.random.normal(k2, (2, in_ch // 2, 16, 16), jnp.float32)   # NCHW

    model = UpPallas(in_ch, out_ch, kp)
    out = jax.block_until_ready(model(x1, x2))

    assert out.shape == (2, out_ch, 16, 16), out.shape
    ref = jax.block_until_ready(_ref_forward(model, x1, x2))
    max_err = float(jnp.max(jnp.abs(out - ref)))
    assert jnp.allclose(out, ref, rtol=5e-2, atol=5e-2), max_err

    print("KERNEL_OK")
</pallas_src>

<mosaic_0001>
module attributes {stable_mosaic.version = 11 : i64} {
  func.func @kernel(%arg0: i32, %arg1: memref<1x400x8xbf16, #tpu.memory_space<vmem>>, %arg2: memref<9x8x8xbf16, #tpu.memory_space<vmem>>, %arg3: memref<1x8xf32, #tpu.memory_space<vmem>>, %arg4: memref<1x8xf32, #tpu.memory_space<vmem>>, %arg5: memref<9x8x8xbf16, #tpu.memory_space<vmem>>, %arg6: memref<1x8xf32, #tpu.memory_space<vmem>>, %arg7: memref<1x8xf32, #tpu.memory_space<vmem>>, %arg8: memref<1x320x8xf32, #tpu.memory_space<vmem>>, %arg9: memref<400x8xbf16, #tpu.memory_space<vmem>>) attributes {dimension_semantics = [#tpu.dimension_semantics<parallel>], iteration_bounds = array<i64: 2>, scalar_prefetch = 0 : i64, scratch_operands = 1 : i64, tpu.core_type = #tpu.core_type<tc>, window_params = [{transform_indices = @transform_0, window_bounds = array<i64: 1, 400, 8>}, {pipeline_mode = #tpu.pipeline_mode<synchronous>, transform_indices = @transform_1, window_bounds = array<i64: 9, 8, 8>}, {pipeline_mode = #tpu.pipeline_mode<synchronous>, transform_indices = @transform_2, window_bounds = array<i64: 1, 8>}, {pipeline_mode = #tpu.pipeline_mode<synchronous>, transform_indices = @transform_3, window_bounds = array<i64: 1, 8>}, {pipeline_mode = #tpu.pipeline_mode<synchronous>, transform_indices = @transform_4, window_bounds = array<i64: 9, 8, 8>}, {pipeline_mode = #tpu.pipeline_mode<synchronous>, transform_indices = @transform_5, window_bounds = array<i64: 1, 8>}, {pipeline_mode = #tpu.pipeline_mode<synchronous>, transform_indices = @transform_6, window_bounds = array<i64: 1, 8>}, {transform_indices = @transform_7, window_bounds = array<i64: 1, 320, 8>}]} {
    %0 = tpu.iota {dimensions = array<i32: 0>} : vector<160x1xi32>
    %1 = arith.sitofp %0 : vector<160x1xi32> to vector<160x1xf32>
    %cst = arith.constant 5.000000e-01 : f32
    %2 = vector.broadcast %cst : f32 to vector<160x1xf32>
    %3 = arith.addf %1, %2 : vector<160x1xf32>
    %cst_0 = arith.constant 5.000000e-02 : f32
    %4 = vector.broadcast %cst_0 : f32 to vector<160x1xf32>
    %5 = arith.mulf %3, %4 : vector<160x1xf32>
    %6 = math.floor %5 : vector<160x1xf32>
    %cst_1 = arith.constant 2.000000e+01 : f32
    %7 = vector.broadcast %cst_1 : f32 to vector<160x1xf32>
    %8 = arith.mulf %6, %7 : vector<160x1xf32>
    %9 = arith.subf %1, %8 : vector<160x1xf32>
    %cst_2 = arith.constant 2.000000e+00 : f32
    %10 = vector.broadcast %cst_2 : f32 to vector<160x1xf32>
    %11 = arith.cmpf oge, %9, %10 : vector<160x1xf32>
    %cst_3 = arith.constant 1.800000e+01 : f32
    %12 = vector.broadcast %cst_3 : f32 to vector<160x1xf32>
    %13 = arith.cmpf olt, %9, %12 : vector<160x1xf32>
    %14 = arith.andi %11, %13 : vector<160x1xi1>
    %15 = arith.extui %14 : vector<160x1xi1> to vector<160x1xi32>
    %16 = arith.sitofp %15 : vector<160x1xi32> to vector<160x1xf32>
    %cst_4 = arith.constant 0.000000e+00 : bf16
    %17 = vector.broadcast %cst_4 : bf16 to vector<40x8xbf16>
    %c0 = arith.constant 0 : index
    %c0_5 = arith.constant 0 : index
    %18 = vector.load %arg9[%c0, %c0_5] : memref<400x8xbf16, #tpu.memory_space<vmem>>, vector<40x8xbf16>
    tpu.vector_store %arg9[%c0, %c0_5], %17 {strides = array<i32>} : memref<400x8xbf16, #tpu.memory_space<vmem>>, vector<40x8xbf16>,
    %c360 = arith.constant 360 : index
    %c0_6 = arith.constant 0 : index
    %19 = vector.load %arg9[%c360, %c0_6] : memref<400x8xbf16, #tpu.memory_space<vmem>>, vector<40x8xbf16>
    tpu.vector_store %arg9[%c360, %c0_6], %17 {strides = array<i32>} : memref<400x8xbf16, #tpu.memory_space<vmem>>, vector<40x8xbf16>,
    %c0_7 = arith.constant 0 : index
    %c19 = arith.constant 19 : index
    %c0_8 = arith.constant 0 : index
    %20 = vector.load %arg1[%c0_7, %c19, %c0_8] : memref<1x400x8xbf16, #tpu.memory_space<vmem>>, vector<1x160x8xbf16>
    %21 = vector.shape_cast %20 : vector<1x160x8xbf16> to vector<160x8xbf16>
    %c0_9 = arith.constant 0 : index
    %c0_10 = arith.constant 0 : index
    %c0_11 = arith.constant 0 : index
    %22 = vector.load %arg2[%c0_9, %c0_10, %c0_11] : memref<9x8x8xbf16, #tpu.memory_space<vmem>>, vector<1x8x8xbf16>
    %23 = vector.shape_cast %22 : vector<1x8x8xbf16> to vector<8x8xbf16>
    %cst_12 = arith.constant dense<0.000000e+00> : vector<160x8xf32>
    %24 = tpu.matmul %21, %23, %cst_12 {dimension_numbers = #tpu.dot_dimension_numbers<[1], [0], [0], [1], [0, 0, 1, 1], [], []>} : vector<160x8xbf16>, vector<8x8xbf16>, vector<160x8xf32> -> vector<160x8xf32>
    %c0_13 = arith.constant 0 : index
    %c20 = arith.constant 20 : index
    %c0_14 = arith.constant 0 : index
    %25 = vector.load %arg1[%c0_13, %c20, %c0_14] : memref<1x400x8xbf16, #tpu.memory_space<vmem>>, vector<1x160x8xbf16>
    %26 = vector.shape_cast %25 : vector<1x160x8xbf16> to vector<160x8xbf16>
    %c1 = arith.constant 1 : index
    %c0_15 = arith.constant 0 : index
    %c0_16 = arith.constant 0 : index
    %27 = vector.load %arg2[%c1, %c0_15, %c0_16] : memref<9x8x8xbf16, #tpu.memory_space<vmem>>, vector<1x8x8xbf16>
    %28 = vector.shape_cast %27 : vector<1x8x8xbf16> to vector<8x8xbf16>
    %cst_17 = arith.constant dense<0.000000e+00> : vector<160x8xf32>
    %29 = tpu.matmul %26, %28, %cst_17 {dimension_numbers = #tpu.dot_dimension_numbers<[1], [0], [0], [1], [0, 0, 1, 1], [], []>} : vector<160x8xbf16>, vector<8x8xbf16>, vector<160x8xf32> -> vector<160x8xf32>
    %30 = arith.addf %24, %29 : vector<160x8xf32>
    %c0_18 = arith.constant 0 : index
    %c21 = arith.constant 21 : index
    %c0_19 = arith.constant 0 : index
    %31 = vector.load %arg1[%c0_18, %c21, %c0_19] : memref<1x400x8xbf16, #tpu.memory_space<vmem>>, vector<1x160x8xbf16>
    %32 = vector.shape_cast %31 : vector<1x160x8xbf16> to vector<160x8xbf16>
    %c2 = arith.constant 2 : index
    %c0_20 = arith.constant 0 : index
    %c0_21 = arith.constant 0 : index
    %33 = vector.load %arg2[%c2, %c0_20, %c0_21] : memref<9x8x8xbf16, #tpu.memory_space<vmem>>, vector<1x8x8xbf16>
    %34 = vector.shape_cast %33 : vector<1x8x8xbf16> to vector<8x8xbf16>
    %cst_22 = arith.constant dense<0.000000e+00> : vector<160x8xf32>
    %35 = tpu.matmul %32, %34, %cst_22 {dimension_numbers = #tpu.dot_dimension_numbers<[1], [0], [0], [1], [0, 0, 1, 1], [], []>} : vector<160x8xbf16>, vector<8x8xbf16>, vector<160x8xf32> -> vector<160x8xf32>
    %36 = arith.addf %30, %35 : vector<160x8xf32>
    %c0_23 = arith.constant 0 : index
    %c39 = arith.constant 39 : index
    %c0_24 = arith.constant 0 : index
    %37 = vector.load %arg1[%c0_23, %c39, %c0_24] : memref<1x400x8xbf16, #tpu.memory_space<vmem>>, vector<1x160x8xbf16>
    %38 = vector.shape_cast %37 : vector<1x160x8xbf16> to vector<160x8xbf16>
    %c3 = arith.constant 3 : index
    %c0_25 = arith.constant 0 : index
    %c0_26 = arith.constant 0 : index
    %39 = vector.load %arg2[%c3, %c0_25, %c0_26] : memref<9x8x8xbf16, #tpu.memory_space<vmem>>, vector<1x8x8xbf16>
    %40 = vector.shape_cast %39 : vector<1x8x8xbf16> to vector<8x8xbf16>
    %cst_27 = arith.constant dense<0.000000e+00> : vector<160x8xf32>
    %41 = tpu.matmul %38, %40, %cst_27 {dimension_numbers = #tpu.dot_dimension_numbers<[1], [0], [0], [1], [0, 0, 1, 1], [], []>} : vector<160x8xbf16>, vector<8x8xbf16>, vector<160x8xf32> -> vector<160x8xf32>
    %c0_28 = arith.constant 0 : index
    %c40 = arith.constant 40 : index
    %c0_29 = arith.constant 0 : index
    %42 = vector.load %arg1[%c0_28, %c40, %c0_29] : memref<1x400x8xbf16, #tpu.memory_space<vmem>>, vector<1x160x8xbf16>
    %43 = vector.shape_cast %42 : vector<1x160x8xbf16> to vector<160x8xbf16>
    %c4 = arith.constant 4 : index
    %c0_30 = arith.constant 0 : index
    %c0_31 = arith.constant 0 : index
    %44 = vector.load %arg2[%c4, %c0_30, %c0_31] : memref<9x8x8xbf16, #tpu.memory_space<vmem>>, vector<1x8x8xbf16>
    %45 = vector.shape_cast %44 : vector<1x8x8xbf16> to vector<8x8xbf16>
    %cst_32 = arith.constant dense<0.000000e+00> : vector<160x8xf32>
    %46 = tpu.matmul %43, %45, %cst_32 {dimension_numbers = #tpu.dot_dimension_numbers<[1], [0], [0], [1], [0, 0, 1, 1], [], []>} : vector<160x8xbf16>, vector<8x8xbf16>, vector<160x8xf32> -> vector<160x8xf32>
    %47 = arith.addf %41, %46 : vector<160x8xf32>
    %c0_33 = arith.constant 0 : index
    %c41 = arith.constant 41 : index
    %c0_34 = arith.constant 0 : index
    %48 = vector.load %arg1[%c0_33, %c41, %c0_34] : memref<1x400x8xbf16, #tpu.memory_space<vmem>>, vector<1x160x8xbf16>
    %49 = vector.shape_cast %48 : vector<1x160x8xbf16> to vector<160x8xbf16>
    %c5 = arith.constant 5 : index
    %c0_35 = arith.constant 0 : index
    %c0_36 = arith.constant 0 : index
    %50 = vector.load %arg2[%c5, %c0_35, %c0_36] : memref<9x8x8xbf16, #tpu.memory_space<vmem>>, vector<1x8x8xbf16>
    %51 = vector.shape_cast %50 : vector<1x8x8xbf16> to vector<8x8xbf16>
    %cst_37 = arith.constant dense<0.000000e+00> : vector<160x8xf32>
    %52 = tpu.matmul %49, %51, %cst_37 {dimension_numbers = #tpu.dot_dimension_numbers<[1], [0], [0], [1], [0, 0, 1, 1], [], []>} : vector<160x8xbf16>, vector<8x8xbf16>, vector<160x8xf32> -> vector<160x8xf32>
    %53 = arith.addf %47, %52 : vector<160x8xf32>
    %54 = arith.addf %36, %53 : vector<160x8xf32>
    %c0_38 = arith.constant 0 : index
    %c59 = arith.constant 59 : index
    %c0_39 = arith.constant 0 : index
    %55 = vector.load %arg1[%c0_38, %c59, %c0_39] : memref<1x400x8xbf16, #tpu.memory_space<vmem>>, vector<1x160x8xbf16>
    %56 = vector.shape_cast %55 : vector<1x160x8xbf16> to vector<160x8xbf16>
    %c6 = arith.constant 6 : index
    %c0_40 = arith.constant 0 : index
    %c0_41 = arith.constant 0 : index
    %57 = vector.load %arg2[%c6, %c0_40, %c0_41] : memref<9x8x8xbf16, #tpu.memory_space<vmem>>, vector<1x8x8xbf16>
    %58 = vector.shape_cast %57 : vector<1x8x8xbf16> to vector<8x8xbf16>
    %cst_42 = arith.constant dense<0.000000e+00> : vector<160x8xf32>
    %59 = tpu.matmul %56, %58, %cst_42 {dimension_numbers = #tpu.dot_dimension_numbers<[1], [0], [0], [1], [0, 0, 1, 1], [], []>} : vector<160x8xbf16>, vector<8x8xbf16>, vector<160x8xf32> -> vector<160x8xf32>
    %c0_43 = arith.constant 0 : index
    %c60 = arith.constant 60 : index
    %c0_44 = arith.constant 0 : index
    %60 = vector.load %arg1[%c0_43, %c60, %c0_44] : memref<1x400x8xbf16, #tpu.memory_space<vmem>>, vector<1x160x8xbf16>
    %61 = vector.shape_cast %60 : vector<1x160x8xbf16> to vector<160x8xbf16>
    %c7 = arith.constant 7 : index
    %c0_45 = arith.constant 0 : index
    %c0_46 = arith.constant 0 : index
    %62 = vector.load %arg2[%c7, %c0_45, %c0_46] : memref<9x8x8xbf16, #tpu.memory_space<vmem>>, vector<1x8x8xbf16>
    %63 = vector.shape_cast %62 : vector<1x8x8xbf16> to vector<8x8xbf16>
    %cst_47 = arith.constant dense<0.000000e+00> : vector<160x8xf32>
    %64 = tpu.matmul %61, %63, %cst_47 {dimension_numbers = #tpu.dot_dimension_numbers<[1], [0], [0], [1], [0, 0, 1, 1], [], []>} : vector<160x8xbf16>, vector<8x8xbf16>, vector<160x8xf32> -> vector<160x8xf32>
    %65 = arith.addf %59, %64 : vector<160x8xf32>
    %c0_48 = arith.constant 0 : index
    %c61 = arith.constant 61 : index
    %c0_49 = arith.constant 0 : index
    %66 = vector.load %arg1[%c0_48, %c61, %c0_49] : memref<1x400x8xbf16, #tpu.memory_space<vmem>>, vector<1x160x8xbf16>
    %67 = vector.shape_cast %66 : vector<1x160x8xbf16> to vector<160x8xbf16>
    %c8 = arith.constant 8 : index
    %c0_50 = arith.constant 0 : index
    %c0_51 = arith.constant 0 : index
    %68 = vector.load %arg2[%c8, %c0_50, %c0_51] : memref<9x8x8xbf16, #tpu.memory_space<vmem>>, vector<1x8x8xbf16>
    %69 = vector.shape_cast %68 : vector<1x8x8xbf16> to vector<8x8xbf16>
    %cst_52 = arith.constant dense<0.000000e+00> : vector<160x8xf32>
    %70 = tpu.matmul %67, %69, %cst_52 {dimension_numbers = #tpu.dot_dimension_numbers<[1], [0], [0], [1], [0, 0, 1, 1], [], []>} : vector<160x8xbf16>, vector<8x8xbf16>, vector<160x8xf32> -> vector<160x8xf32>
    %71 = arith.addf %65, %70 : vector<160x8xf32>
    %72 = arith.addf %54, %71 : vector<160x8xf32>
    %c0_53 = arith.constant 0 : index
    %c0_54 = arith.constant 0 : index
    %73 = vector.load %arg3[%c0_53, %c0_54] : memref<1x8xf32, #tpu.memory_space<vmem>>, vector<1x8xf32>
    %74 = vector.broadcast %73 : vector<1x8xf32> to vector<160x8xf32>
    %75 = arith.mulf %72, %74 : vector<160x8xf32>
    %c0_55 = arith.constant 0 : index
    %c0_56 = arith.constant 0 : index
    %76 = vector.load %arg4[%c0_55, %c0_56] : memref<1x8xf32, #tpu.memory_space<vmem>>, vector<1x8xf32>
    %77 = vector.broadcast %76 : vector<1x8xf32> to vector<160x8xf32>
    %78 = arith.addf %75, %77 : vector<160x8xf32>
    %cst_57 = arith.constant 0.00999999977 : f32
    %79 = vector.broadcast %cst_57 : f32 to vector<160x8xf32>
    %80 = arith.mulf %78, %79 : vector<160x8xf32>
    %81 = arith.maximumf %78, %80 : vector<160x8xf32>
    %82 = vector.broadcast %16 : vector<160x1xf32> to vector<160x8xf32>
    %83 = arith.mulf %81, %82 : vector<160x8xf32>
    %84 = arith.truncf %83 : vector<160x8xf32> to vector<160x8xbf16>
    %c40_58 = arith.constant 40 : index
    %c0_59 = arith.constant 0 : index
    %85 = vector.load %arg9[%c40_58, %c0_59] : memref<400x8xbf16, #tpu.memory_space<vmem>>, vector<160x8xbf16>
    tpu.vector_store %arg9[%c40_58, %c0_59], %84 {strides = array<i32>} : memref<400x8xbf16, #tpu.memory_space<vmem>>, vector<160x8xbf16>,
    %c0_60 = arith.constant 0 : index
    %c179 = arith.constant 179 : index
    %c0_61 = arith.constant 0 : index
    %86 = vector.load %arg1[%c0_60, %c179, %c0_61] : memref<1x400x8xbf16, #tpu.memory_space<vmem>>, vector<1x160x8xbf16>
    %87 = vector.shape_cast %86 : vector<1x160x8xbf16> to vector<160x8xbf16>
    %c0_62 = arith.constant 0 : index
    %c0_63 = arith.constant 0 : index
    %c0_64 = arith.constant 0 : index
    %88 = vector.load %arg2[%c0_62, %c0_63, %c0_64] : memref<9x8x8xbf16, #tpu.memory_space<vmem>>, vector<1x8x8xbf16>
    %89 = vector.shape_cast %88 : vector<1x8x8xbf16> to vector<8x8xbf16>
    %cst_65 = arith.constant dense<0.000000e+00> : vector<160x8xf32>
    %90 = tpu.matmul %87, %89, %cst_65 {dimension_numbers = #tpu.dot_dimension_numbers<[1], [0], [0], [1], [0, 0, 1, 1], [], []>} : vector<160x8xbf16>, vector<8x8xbf16>, vector<160x8xf32> -> vector<160x8xf32>
    %c0_66 = arith.constant 0 : index
    %c180 = arith.constant 180 : index
    %c0_67 = arith.constant 0 : index
    %91 = vector.load %arg1[%c0_66, %c180, %c0_67] : memref<1x400x8xbf16, #tpu.memory_space<vmem>>, vector<1x160x8xbf16>
    %92 = vector.shape_cast %91 : vector<1x160x8xbf16> to vector<160x8xbf16>
    %c1_68 = arith.constant 1 : index
    %c0_69 = arith.constant 0 : index
    %c0_70 = arith.constant 0 : index
    %93 = vector.load %arg2[%c1_68, %c0_69, %c0_70] : memref<9x8x8xbf16, #tpu.memory_space<vmem>>, vector<1x8x8xbf16>
    %94 = vector.shape_cast %93 : vector<1x8x8xbf16> to vector<8x8xbf16>
    %cst_71 = arith.constant dense<0.000000e+00> : vector<160x8xf32>
    %95 = tpu.matmul %92, %94, %cst_71 {dimension_numbers = #tpu.dot_dimension_numbers<[1], [0], [0], [1], [0, 0, 1, 1], [], []>} : vector<160x8xbf16>, vector<8x8xbf16>, vector<160x8xf32> -> vector<160x8xf32>
    %96 = arith.addf %90, %95 : vector<160x8xf32>
    %c0_72 = arith.constant 0 : index
    %c181 = arith.constant 181 : index
    %c0_73 = arith.constant 0 : index
    %97 = vector.load %arg1[%c0_72, %c181, %c0_73] : memref<1x400x8xbf16, #tpu.memory_space<vmem>>, vector<1x160x8xbf16>
    %98 = vector.shape_cast %97 : vector<1x160x8xbf16> to vector<160x8xbf16>
    %c2_74 = arith.constant 2 : index
    %c0_75 = arith.constant 0 : index
    %c0_76 = arith.constant 0 : index
    %99 = vector.load %arg2[%c2_74, %c0_75, %c0_76] : memref<9x8x8xbf16, #tpu.memory_space<vmem>>, vector<1x8x8xbf16>
    %100 = vector.shape_cast %99 : vector<1x8x8xbf16> to vector<8x8xbf16>
    %cst_77 = arith.constant dense<0.000000e+00> : vector<160x8xf32>
    %101 = tpu.matmul %98, %100, %cst_77 {dimension_numbers = #tpu.dot_dimension_numbers<[1], [0], [0], [1], [0, 0, 1, 1], [], []>} : vector<160x8xbf16>, vector<8x8xbf16>, vector<160x8xf32> -> vector<160x8xf32>
    %102 = arith.addf %96, %101 : vector<160x8xf32>
    %c0_78 = arith.constant 0 : index
    %c199 = arith.constant 199 : index
    %c0_79 = arith.constant 0 : index
    %103 = vector.load %arg1[%c0_78, %c199, %c0_79] : memref<1x400x8xbf16, #tpu.memory_space<vmem>>, vector<1x160x8xbf16>
    %104 = vector.shape_cast %103 : vector<1x160x8xbf16> to vector<160x8xbf16>
    %c3_80 = arith.constant 3 : index
    %c0_81 = arith.constant 0 : index
    %c0_82 = arith.constant 0 : index
    %105 = vector.load %arg2[%c3_80, %c0_81, %c0_82] : memref<9x8x8xbf16, #tpu.memory_space<vmem>>, vector<1x8x8xbf16>
    %106 = vector.shape_cast %105 : vector<1x8x8xbf16> to vector<8x8xbf16>
    %cst_83 = arith.constant dense<0.000000e+00> : vector<160x8xf32>
    %107 = tpu.matmul %104, %106, %cst_83 {dimension_numbers = #tpu.dot_dimension_numbers<[1], [0], [0], [1], [0, 0, 1, 1], [], []>} : vector<160x8xbf16>, vector<8x8xbf16>, vector<160x8xf32> -> vector<160x8xf32>
    %c0_84 = arith.constant 0 : index
    %c200 = arith.constant 200 : index
    %c0_85 = arith.constant 0 : index
    %108 = vector.load %arg1[%c0_84, %c200, %c0_85] : memref<1x400x8xbf16, #tpu.memory_space<vmem>>, vector<1x160x8xbf16>
    %109 = vector.shape_cast %108 : vector<1x160x8xbf16> to vector<160x8xbf16>
    %c4_86 = arith.constant 4 : index
    %c0_87 = arith.constant 0 : index
    %c0_88 = arith.constant 0 : index
    %110 = vector.load %arg2[%c4_86, %c0_87, %c0_88] : memref<9x8x8xbf16, #tpu.memory_space<vmem>>, vector<1x8x8xbf16>
    %111 = vector.shape_cast %110 : vector<1x8x8xbf16> to vector<8x8xbf16>
    %cst_89 = arith.constant dense<0.000000e+00> : vector<160x8xf32>
    %112 = tpu.matmul %109, %111, %cst_89 {dimension_numbers = #tpu.dot_dimension_numbers<[1], [0], [0], [1], [0, 0, 1, 1], [], []>} : vector<160x8xbf16>, vector<8x8xbf16>, vector<160x8xf32> -> vector<160x8xf32>
    %113 = arith.addf %107, %112 : vector<160x8xf32>
    %c0_90 = arith.constant 0 : index
    %c201 = arith.constant 201 : index
    %c0_91 = arith.constant 0 : index
    %114 = vector.load %arg1[%c0_90, %c201, %c0_91] : memref<1x400x8xbf16, #tpu.memory_space<vmem>>, vector<1x160x8xbf16>
    %115 = vector.shape_cast %114 : vector<1x160x8xbf16> to vector<160x8xbf16>
    %c5_92 = arith.constant 5 : index
    %c0_93 = arith.constant 0 : index
    %c0_94 = arith.constant 0 : index
    %116 = vector.load %arg2[%c5_92, %c0_93, %c0_94] : memref<9x8x8xbf16, #tpu.memory_space<vmem>>, vector<1x8x8xbf16>
    %117 = vector.shape_cast %116 : vector<1x8x8xbf16> to vector<8x8xbf16>
    %cst_95 = arith.constant dense<0.000000e+00> : vector<160x8xf32>
    %118 = tpu.matmul %115, %117, %cst_95 {dimension_numbers = #tpu.dot_dimension_numbers<[1], [0], [0], [1], [0, 0, 1, 1], [], []>} : vector<160x8xbf16>, vector<8x8xbf16>, vector<160x8xf32> -> vector<160x8xf32>
    %119 = arith.addf %113, %118 : vector<160x8xf32>
    %120 = arith.addf %102, %119 : vector<160x8xf32>
    %c0_96 = arith.constant 0 : index
    %c219 = arith.constant 219 : index
    %c0_97 = arith.constant 0 : index
    %121 = vector.load %arg1[%c0_96, %c219, %c0_97] : memref<1x400x8xbf16, #tpu.memory_space<vmem>>, vector<1x160x8xbf16>
    %122 = vector.shape_cast %121 : vector<1x160x8xbf16> to vector<160x8xbf16>
    %c6_98 = arith.constant 6 : index
    %c0_99 = arith.constant 0 : index
    %c0_100 = arith.constant 0 : index
    %123 = vector.load %arg2[%c6_98, %c0_99, %c0_100] : memref<9x8x8xbf16, #tpu.memory_space<vmem>>, vector<1x8x8xbf16>
    %124 = vector.shape_cast %123 : vector<1x8x8xbf16> to vector<8x8xbf16>
    %cst_101 = arith.constant dense<0.000000e+00> : vector<160x8xf32>
    %125 = tpu.matmul %122, %124, %cst_101 {dimension_numbers = #tpu.dot_dimension_numbers<[1], [0], [0], [1], [0, 0, 1, 1], [], []>} : vector<160x8xbf16>, vector<8x8xbf16>, vector<160x8xf32> -> vector<160x8xf32>
    %c0_102 = arith.constant 0 : index
    %c220 = arith.constant 220 : index
    %c0_103 = arith.constant 0 : index
    %126 = vector.load %arg1[%c0_102, %c220, %c0_103] : memref<1x400x8xbf16, #tpu.memory_space<vmem>>, vector<1x160x8xbf16>
    %127 = vector.shape_cast %126 : vector<1x160x8xbf16> to vector<160x8xbf16>
    %c7_104 = arith.constant 7 : index
    %c0_105 = arith.constant 0 : index
    %c0_106 = arith.constant 0 : index
    %128 = vector.load %arg2[%c7_104, %c0_105, %c0_106] : memref<9x8x8xbf16, #tpu.memory_space<vmem>>, vector<1x8x8xbf16>
    %129 = vector.shape_cast %128 : vector<1x8x8xbf16> to vector<8x8xbf16>
    %cst_107 = arith.constant dense<0.000000e+00> : vector<160x8xf32>
    %130 = tpu.matmul %127, %129, %cst_107 {dimension_numbers = #tpu.dot_dimension_numbers<[1], [0], [0], [1], [0, 0, 1, 1], [], []>} : vector<160x8xbf16>, vector<8x8xbf16>, vector<160x8xf32> -> vector<160x8xf32>
    %131 = arith.addf %125, %130 : vector<160x8xf32>
    %c0_108 = arith.constant 0 : index
    %c221 = arith.constant 221 : index
    %c0_109 = arith.constant 0 : index
    %132 = vector.load %arg1[%c0_108, %c221, %c0_109] : memref<1x400x8xbf16, #tpu.memory_space<vmem>>, vector<1x160x8xbf16>
    %133 = vector.shape_cast %132 : vector<1x160x8xbf16> to vector<160x8xbf16>
    %c8_110 = arith.constant 8 : index
    %c0_111 = arith.constant 0 : index
    %c0_112 = arith.constant 0 : index
    %134 = vector.load %arg2[%c8_110, %c0_111, %c0_112] : memref<9x8x8xbf16, #tpu.memory_space<vmem>>, vector<1x8x8xbf16>
    %135 = vector.shape_cast %134 : vector<1x8x8xbf16> to vector<8x8xbf16>
    %cst_113 = arith.constant dense<0.000000e+00> : vector<160x8xf32>
    %136 = tpu.matmul %133, %135, %cst_113 {dimension_numbers = #tpu.dot_dimension_numbers<[1], [0], [0], [1], [0, 0, 1, 1], [], []>} : vector<160x8xbf16>, vector<8x8xbf16>, vector<160x8xf32> -> vector<160x8xf32>
    %137 = arith.addf %131, %136 : vector<160x8xf32>
    %138 = arith.addf %120, %137 : vector<160x8xf32>
    %c0_114 = arith.constant 0 : index
    %c0_115 = arith.constant 0 : index
    %139 = vector.load %arg3[%c0_114, %c0_115] : memref<1x8xf32, #tpu.memory_space<vmem>>, vector<1x8xf32>
    %140 = vector.broadcast %139 : vector<1x8xf32> to vector<160x8xf32>
    %141 = arith.mulf %138, %140 : vector<160x8xf32>
    %c0_116 = arith.constant 0 : index
    %c0_117 = arith.constant 0 : index
    %142 = vector.load %arg4[%c0_116, %c0_117] : memref<1x8xf32, #tpu.memory_space<vmem>>, vector<1x8xf32>
    %143 = vector.broadcast %142 : vector<1x8xf32> to vector<160x8xf32>
    %144 = arith.addf %141, %143 : vector<160x8xf32>
    %cst_118 = arith.constant 0.00999999977 : f32
    %145 = vector.broadcast %cst_118 : f32 to vector<160x8xf32>
    %146 = arith.mulf %144, %145 : vector<160x8xf32>
    %147 = arith.maximumf %144, %146 : vector<160x8xf32>
    %148 = vector.broadcast %16 : vector<160x1xf32> to vector<160x8xf32>
    %149 = arith.mulf %147, %148 : vector<160x8xf32>
    %150 = arith.truncf %149 : vector<160x8xf32> to vector<160x8xbf16>
    %c200_119 = arith.constant 200 : index
    %c0_120 = arith.constant 0 : index
    %151 = vector.load %arg9[%c200_119, %c0_120] : memref<400x8xbf16, #tpu.memory_space<vmem>>, vector<160x8xbf16>
    tpu.vector_store %arg9[%c200_119, %c0_120], %150 {strides = array<i32>} : memref<400x8xbf16, #tpu.memory_space<vmem>>, vector<160x8xbf16>,
    %c19_121 = arith.constant 19 : index
    %c0_122 = arith.constant 0 : index
    %152 = vector.load %arg9[%c19_121, %c0_122] : memref<400x8xbf16, #tpu.memory_space<vmem>>, vector<160x8xbf16>
    %c0_123 = arith.constant 0 : index
    %c0_124 = arith.constant 0 : index
    %c0_125 = arith.constant 0 : index
    %153 = vector.load %arg5[%c0_123, %c0_124, %c0_125] : memref<9x8x8xbf16, #tpu.memory_space<vmem>>, vector<1x8x8xbf16>
    %154 = vector.shape_cast %153 : vector<1x8x8xbf16> to vector<8x8xbf16>
    %cst_126 = arith.constant dense<0.000000e+00> : vector<160x8xf32>
    %155 = tpu.matmul %152, %154, %cst_126 {dimension_numbers = #tpu.dot_dimension_numbers<[1], [0], [0], [1], [0, 0, 1, 1], [], []>} : vector<160x8xbf16>, vector<8x8xbf16>, vector<160x8xf32> -> vector<160x8xf32>
    %c20_127 = arith.constant 20 : index
    %c0_128 = arith.constant 0 : index
    %156 = vector.load %arg9[%c20_127, %c0_128] : memref<400x8xbf16, #tpu.memory_space<vmem>>, vector<160x8xbf16>
    %c1_129 = arith.constant 1 : index
    %c0_130 = arith.constant 0 : index
    %c0_131 = arith.constant 0 : index
    %157 = vector.load %arg5[%c1_129, %c0_130, %c0_131] : memref<9x8x8xbf16, #tpu.memory_space<vmem>>, vector<1x8x8xbf16>
    %158 = vector.shape_cast %157 : vector<1x8x8xbf16> to vector<8x8xbf16>
    %cst_132 = arith.constant dense<0.000000e+00> : vector<160x8xf32>
    %159 = tpu.matmul %156, %158, %cst_132 {dimension_numbers = #tpu.dot_dimension_numbers<[1], [0], [0], [1], [0, 0, 1, 1], [], []>} : vector<160x8xbf16>, vector<8x8xbf16>, vector<160x8xf32> -> vector<160x8xf32>
    %160 = arith.addf %155, %159 : vector<160x8xf32>
    %c21_133 = arith.constant 21 : index
    %c0_134 = arith.constant 0 : index
    %161 = vector.load %arg9[%c21_133, %c0_134] : memref<400x8xbf16, #tpu.memory_space<vmem>>, vector<160x8xbf16>
    %c2_135 = arith.constant 2 : index
    %c0_136 = arith.constant 0 : index
    %c0_137 = arith.constant 0 : index
    %162 = vector.load %arg5[%c2_135, %c0_136, %c0_137] : memref<9x8x8xbf16, #tpu.memory_space<vmem>>, vector<1x8x8xbf16>
    %163 = vector.shape_cast %162 : vector<1x8x8xbf16> to vector<8x8xbf16>
    %cst_138 = arith.constant dense<0.000000e+00> : vector<160x8xf32>
    %164 = tpu.matmul %161, %163, %cst_138 {dimension_numbers = #tpu.dot_dimension_numbers<[1], [0], [0], [1], [0, 0, 1, 1], [], []>} : vector<160x8xbf16>, vector<8x8xbf16>, vector<160x8xf32> -> vector<160x8xf32>
    %165 = arith.addf %160, %164 : vector<160x8xf32>
    %c39_139 = arith.constant 39 : index
    %c0_140 = arith.constant 0 : index
    %166 = vector.load %arg9[%c39_139, %c0_140] : memref<400x8xbf16, #tpu.memory_space<vmem>>, vector<160x8xbf16>
    %c3_141 = arith.constant 3 : index
    %c0_142 = arith.constant 0 : index
    %c0_143 = arith.constant 0 : index
    %167 = vector.load %arg5[%c3_141, %c0_142, %c0_143] : memref<9x8x8xbf16, #tpu.memory_space<vmem>>, vector<1x8x8xbf16>
    %168 = vector.shape_cast %167 : vector<1x8x8xbf16> to vector<8x8xbf16>
    %cst_144 = arith.constant dense<0.000000e+00> : vector<160x8xf32>
    %169 = tpu.matmul %166, %168, %cst_144 {dimension_numbers = #tpu.dot_dimension_numbers<[1], [0], [0], [1], [0, 0, 1, 1], [], []>} : vector<160x8xbf16>, vector<8x8xbf16>, vector<160x8xf32> -> vector<160x8xf32>
    %c40_145 = arith.constant 40 : index
    %c0_146 = arith.constant 0 : index
    %170 = vector.load %arg9[%c40_145, %c0_146] : memref<400x8xbf16, #tpu.memory_space<vmem>>, vector<160x8xbf16>
    %c4_147 = arith.constant 4 : index
    %c0_148 = arith.constant 0 : index
    %c0_149 = arith.constant 0 : index
    %171 = vector.load %arg5[%c4_147, %c0_148, %c0_149] : memref<9x8x8xbf16, #tpu.memory_space<vmem>>, vector<1x8x8xbf16>
    %172 = vector.shape_cast %171 : vector<1x8x8xbf16> to vector<8x8xbf16>
    %cst_150 = arith.constant dense<0.000000e+00> : vector<160x8xf32>
    %173 = tpu.matmul %170, %172, %cst_150 {dimension_numbers = #tpu.dot_dimension_numbers<[1], [0], [0], [1], [0, 0, 1, 1], [], []>} : vector<160x8xbf16>, vector<8x8xbf16>, vector<160x8xf32> -> vector<160x8xf32>
    %174 = arith.addf %169, %173 : vector<160x8xf32>
    %c41_151 = arith.constant 41 : index
    %c0_152 = arith.constant 0 : index
    %175 = vector.load %arg9[%c41_151, %c0_152] : memref<400x8xbf16, #tpu.memory_space<vmem>>, vector<160x8xbf16>
    %c5_153 = arith.constant 5 : index
    %c0_154 = arith.constant 0 : index
    %c0_155 = arith.constant 0 : index
    %176 = vector.load %arg5[%c5_153, %c0_154, %c0_155] : memref<9x8x8xbf16, #tpu.memory_space<vmem>>, vector<1x8x8xbf16>
    %177 = vector.shape_cast %176 : vector<1x8x8xbf16> to vector<8x8xbf16>
    %cst_156 = arith.constant dense<0.000000e+00> : vector<160x8xf32>
    %178 = tpu.matmul %175, %177, %cst_156 {dimension_numbers = #tpu.dot_dimension_numbers<[1], [0], [0], [1], [0, 0, 1, 1], [], []>} : vector<160x8xbf16>, vector<8x8xbf16>, vector<160x8xf32> -> vector<160x8xf32>
    %179 = arith.addf %174, %178 : vector<160x8xf32>
    %180 = arith.addf %165, %179 : vector<160x8xf32>
    %c59_157 = arith.constant 59 : index
    %c0_158 = arith.constant 0 : index
    %181 = vector.load %arg9[%c59_157, %c0_158] : memref<400x8xbf16, #tpu.memory_space<vmem>>, vector<160x8xbf16>
    %c6_159 = arith.constant 6 : index
    %c0_160 = arith.constant 0 : index
    %c0_161 = arith.constant 0 : index
    %182 = vector.load %arg5[%c6_159, %c0_160, %c0_161] : memref<9x8x8xbf16, #tpu.memory_space<vmem>>, vector<1x8x8xbf16>
    %183 = vector.shape_cast %182 : vector<1x8x8xbf16> to vector<8x8xbf16>
    %cst_162 = arith.constant dense<0.000000e+00> : vector<160x8xf32>
    %184 = tpu.matmul %181, %183, %cst_162 {dimension_numbers = #tpu.dot_dimension_numbers<[1], [0], [0], [1], [0, 0, 1, 1], [], []>} : vector<160x8xbf16>, vector<8x8xbf16>, vector<160x8xf32> -> vector<160x8xf32>
    %c60_163 = arith.constant 60 : index
    %c0_164 = arith.constant 0 : index
    %185 = vector.load %arg9[%c60_163, %c0_164] : memref<400x8xbf16, #tpu.memory_space<vmem>>, vector<160x8xbf16>
    %c7_165 = arith.constant 7 : index
    %c0_166 = arith.constant 0 : index
    %c0_167 = arith.constant 0 : index
    %186 = vector.load %arg5[%c7_165, %c0_166, %c0_167] : memref<9x8x8xbf16, #tpu.memory_space<vmem>>, vector<1x8x8xbf16>
    %187 = vector.shape_cast %186 : vector<1x8x8xbf16> to vector<8x8xbf16>
    %cst_168 = arith.constant dense<0.000000e+00> : vector<160x8xf32>
    %188 = tpu.matmul %185, %187, %cst_168 {dimension_numbers = #tpu.dot_dimension_numbers<[1], [0], [0], [1], [0, 0, 1, 1], [], []>} : vector<160x8xbf16>, vector<8x8xbf16>, vector<160x8xf32> -> vector<160x8xf32>
    %189 = arith.addf %184, %188 : vector<160x8xf32>
    %c61_169 = arith.constant 61 : index
    %c0_170 = arith.constant 0 : index
    %190 = vector.load %arg9[%c61_169, %c0_170] : memref<400x8xbf16, #tpu.memory_space<vmem>>, vector<160x8xbf16>
    %c8_171 = arith.constant 8 : index
    %c0_172 = arith.constant 0 : index
    %c0_173 = arith.constant 0 : index
    %191 = vector.load %arg5[%c8_171, %c0_172, %c0_173] : memref<9x8x8xbf16, #tpu.memory_space<vmem>>, vector<1x8x8xbf16>
    %192 = vector.shape_cast %191 : vector<1x8x8xbf16> to vector<8x8xbf16>
    %cst_174 = arith.constant dense<0.000000e+00> : vector<160x8xf32>
    %193 = tpu.matmul %190, %192, %cst_174 {dimension_numbers = #tpu.dot_dimension_numbers<[1], [0], [0], [1], [0, 0, 1, 1], [], []>} : vector<160x8xbf16>, vector<8x8xbf16>, vector<160x8xf32> -> vector<160x8xf32>
    %194 = arith.addf %189, %193 : vector<160x8xf32>
    %195 = arith.addf %180, %194 : vector<160x8xf32>
    %c0_175 = arith.constant 0 : index
    %c0_176 = arith.constant 0 : index
    %196 = vector.load %arg6[%c0_175, %c0_176] : memref<1x8xf32, #tpu.memory_space<vmem>>, vector<1x8xf32>
    %197 = vector.broadcast %196 : vector<1x8xf32> to vector<160x8xf32>
    %198 = arith.mulf %195, %197 : vector<160x8xf32>
    %c0_177 = arith.constant 0 : index
    %c0_178 = arith.constant 0 : index
    %199 = vector.load %arg7[%c0_177, %c0_178] : memref<1x8xf32, #tpu.memory_space<vmem>>, vector<1x8xf32>
    %200 = vector.broadcast %199 : vector<1x8xf32> to vector<160x8xf32>
    %201 = arith.addf %198, %200 : vector<160x8xf32>
    %cst_179 = arith.constant 0.00999999977 : f32
    %202 = vector.broadcast %cst_179 : f32 to vector<160x8xf32>
    %203 = arith.mulf %201, %202 : vector<160x8xf32>
    %204 = arith.maximumf %201, %203 : vector<160x8xf32>
    %c0_180 = arith.constant 0 : index
    %c0_181 = arith.constant 0 : index
    %c0_182 = arith.constant 0 : index
    %205 = vector.load %arg8[%c0_180, %c0_181, %c0_182] : memref<1x320x8xf32, #tpu.memory_space<vmem>>, vector<1x160x8xf32>
    %206 = vector.shape_cast %205 : vector<1x160x8xf32> to vector<160x8xf32>
    %207 = vector.shape_cast %204 : vector<160x8xf32> to vector<1x160x8xf32>
    tpu.vector_store %arg8[%c0_180, %c0_181, %c0_182], %207 {strides = array<i32>} : memref<1x320x8xf32, #tpu.memory_space<vmem>>, vector<1x160x8xf32>,
    %c179_183 = arith.constant 179 : index
    %c0_184 = arith.constant 0 : index
    %208 = vector.load %arg9[%c179_183, %c0_184] : memref<400x8xbf16, #tpu.memory_space<vmem>>, vector<160x8xbf16>
    %c0_185 = arith.constant 0 : index
    %c0_186 = arith.constant 0 : index
    %c0_187 = arith.constant 0 : index
    %209 = vector.load %arg5[%c0_185, %c0_186, %c0_187] : memref<9x8x8xbf16, #tpu.memory_space<vmem>>, vector<1x8x8xbf16>
    %210 = vector.shape_cast %209 : vector<1x8x8xbf16> to vector<8x8xbf16>
    %cst_188 = arith.constant dense<0.000000e+00> : vector<160x8xf32>
    %211 = tpu.matmul %208, %210, %cst_188 {dimension_numbers = #tpu.dot_dimension_numbers<[1], [0], [0], [1], [0, 0, 1, 1], [], []>} : vector<160x8xbf16>, vector<8x8xbf16>, vector<160x8xf32> -> vector<160x8xf32>
    %c180_189 = arith.constant 180 : index
    %c0_190 = arith.constant 0 : index
    %212 = vector.load %arg9[%c180_189, %c0_190] : memref<400x8xbf16, #tpu.memory_space<vmem>>, vector<160x8xbf16>
    %c1_191 = arith.constant 1 : index
    %c0_192 = arith.constant 0 : index
    %c0_193 = arith.constant 0 : index
    %213 = vector.load %arg5[%c1_191, %c0_192, %c0_193] : memref<9x8x8xbf16, #tpu.memory_space<vmem>>, vector<1x8x8xbf16>
    %214 = vector.shape_cast %213 : vector<1x8x8xbf16> to vector<8x8xbf16>
    %cst_194 = arith.constant dense<0.000000e+00> : vector<160x8xf32>
    %215 = tpu.matmul %212, %214, %cst_194 {dimension_numbers = #tpu.dot_dimension_numbers<[1], [0], [0], [1], [0, 0, 1, 1], [], []>} : vector<160x8xbf16>, vector<8x8xbf16>, vector<160x8xf32> -> vector<160x8xf32>
    %216 = arith.addf %211, %215 : vector<160x8xf32>
    %c181_195 = arith.constant 181 : index
    %c0_196 = arith.constant 0 : index
    %217 = vector.load %arg9[%c181_195, %c0_196] : memref<400x8xbf16, #tpu.memory_space<vmem>>, vector<160x8xbf16>
    %c2_197 = arith.constant 2 : index
    %c0_198 = arith.constant 0 : index
    %c0_199 = arith.constant 0 : index
    %218 = vector.load %arg5[%c2_197, %c0_198, %c0_199] : memref<9x8x8xbf16, #tpu.memory_space<vmem>>, vector<1x8x8xbf16>
    %219 = vector.shape_cast %218 : vector<1x8x8xbf16> to vector<8x8xbf16>
    %cst_200 = arith.constant dense<0.000000e+00> : vector<160x8xf32>
    %220 = tpu.matmul %217, %219, %cst_200 {dimension_numbers = #tpu.dot_dimension_numbers<[1], [0], [0], [1], [0, 0, 1, 1], [], []>} : vector<160x8xbf16>, vector<8x8xbf16>, vector<160x8xf32> -> vector<160x8xf32>
    %221 = arith.addf %216, %220 : vector<160x8xf32>
    %c199_201 = arith.constant 199 : index
    %c0_202 = arith.constant 0 : index
    %222 = vector.load %arg9[%c199_201, %c0_202] : memref<400x8xbf16, #tpu.memory_space<vmem>>, vector<160x8xbf16>
    %c3_203 = arith.constant 3 : index
    %c0_204 = arith.constant 0 : index
    %c0_205 = arith.constant 0 : index
    %223 = vector.load %arg5[%c3_203, %c0_204, %c0_205] : memref<9x8x8xbf16, #tpu.memory_space<vmem>>, vector<1x8x8xbf16>
    %224 = vector.shape_cast %223 : vector<1x8x8xbf16> to vector<8x8xbf16>
    %cst_206 = arith.constant dense<0.000000e+00> : vector<160x8xf32>
    %225 = tpu.matmul %222, %224, %cst_206 {dimension_numbers = #tpu.dot_dimension_numbers<[1], [0], [0], [1], [0, 0, 1, 1], [], []>} : vector<160x8xbf16>, vector<8x8xbf16>, vector<160x8xf32> -> vector<160x8xf32>
    %c200_207 = arith.constant 200 : index
    %c0_208 = arith.constant 0 : index
    %226 = vector.load %arg9[%c200_207, %c0_208] : memref<400x8xbf16, #tpu.memory_space<vmem>>, vector<160x8xbf16>
    %c4_209 = arith.constant 4 : index
    %c0_210 = arith.constant 0 : index
    %c0_211 = arith.constant 0 : index
    %227 = vector.load %arg5[%c4_209, %c0_210, %c0_211] : memref<9x8x8xbf16, #tpu.memory_space<vmem>>, vector<1x8x8xbf16>
    %228 = vector.shape_cast %227 : vector<1x8x8xbf16> to vector<8x8xbf16>
    %cst_212 = arith.constant dense<0.000000e+00> : vector<160x8xf32>
    %229 = tpu.matmul %226, %228, %cst_212 {dimension_numbers = #tpu.dot_dimension_numbers<[1], [0], [0], [1], [0, 0, 1, 1], [], []>} : vector<160x8xbf16>, vector<8x8xbf16>, vector<160x8xf32> -> vector<160x8xf32>
    %230 = arith.addf %225, %229 : vector<160x8xf32>
    %c201_213 = arith.constant 201 : index
    %c0_214 = arith.constant 0 : index
    %231 = vector.load %arg9[%c201_213, %c0_214] : memref<400x8xbf16, #tpu.memory_space<vmem>>, vector<160x8xbf16>
    %c5_215 = arith.constant 5 : index
    %c0_216 = arith.constant 0 : index
    %c0_217 = arith.constant 0 : index
    %232 = vector.load %arg5[%c5_215, %c0_216, %c0_217] : memref<9x8x8xbf16, #tpu.memory_space<vmem>>, vector<1x8x8xbf16>
    %233 = vector.shape_cast %232 : vector<1x8x8xbf16> to vector<8x8xbf16>
    %cst_218 = arith.constant dense<0.000000e+00> : vector<160x8xf32>
    %234 = tpu.matmul %231, %233, %cst_218 {dimension_numbers = #tpu.dot_dimension_numbers<[1], [0], [0], [1], [0, 0, 1, 1], [], []>} : vector<160x8xbf16>, vector<8x8xbf16>, vector<160x8xf32> -> vector<160x8xf32>
    %235 = arith.addf %230, %234 : vector<160x8xf32>
    %236 = arith.addf %221, %235 : vector<160x8xf32>
    %c219_219 = arith.constant 219 : index
    %c0_220 = arith.constant 0 : index
    %237 = vector.load %arg9[%c219_219, %c0_220] : memref<400x8xbf16, #tpu.memory_space<vmem>>, vector<160x8xbf16>
    %c6_221 = arith.constant 6 : index
    %c0_222 = arith.constant 0 : index
    %c0_223 = arith.constant 0 : index
    %238 = vector.load %arg5[%c6_221, %c0_222, %c0_223] : memref<9x8x8xbf16, #tpu.memory_space<vmem>>, vector<1x8x8xbf16>
    %239 = vector.shape_cast %238 : vector<1x8x8xbf16> to vector<8x8xbf16>
    %cst_224 = arith.constant dense<0.000000e+00> : vector<160x8xf32>
    %240 = tpu.matmul %237, %239, %cst_224 {dimension_numbers = #tpu.dot_dimension_numbers<[1], [0], [0], [1], [0, 0, 1, 1], [], []>} : vector<160x8xbf16>, vector<8x8xbf16>, vector<160x8xf32> -> vector<160x8xf32>
    %c220_225 = arith.constant 220 : index
    %c0_226 = arith.constant 0 : index
    %241 = vector.load %arg9[%c220_225, %c0_226] : memref<400x8xbf16, #tpu.memory_space<vmem>>, vector<160x8xbf16>
    %c7_227 = arith.constant 7 : index
    %c0_228 = arith.constant 0 : index
    %c0_229 = arith.constant 0 : index
    %242 = vector.load %arg5[%c7_227, %c0_228, %c0_229] : memref<9x8x8xbf16, #tpu.memory_space<vmem>>, vector<1x8x8xbf16>
    %243 = vector.shape_cast %242 : vector<1x8x8xbf16> to vector<8x8xbf16>
    %cst_230 = arith.constant dense<0.000000e+00> : vector<160x8xf32>
    %244 = tpu.matmul %241, %243, %cst_230 {dimension_numbers = #tpu.dot_dimension_numbers<[1], [0], [0], [1], [0, 0, 1, 1], [], []>} : vector<160x8xbf16>, vector<8x8xbf16>, vector<160x8xf32> -> vector<160x8xf32>
    %245 = arith.addf %240, %244 : vector<160x8xf32>
    %c221_231 = arith.constant 221 : index
    %c0_232 = arith.constant 0 : index
    %246 = vector.load %arg9[%c221_231, %c0_232] : memref<400x8xbf16, #tpu.memory_space<vmem>>, vector<160x8xbf16>
    %c8_233 = arith.constant 8 : index
    %c0_234 = arith.constant 0 : index
    %c0_235 = arith.constant 0 : index
    %247 = vector.load %arg5[%c8_233, %c0_234, %c0_235] : memref<9x8x8xbf16, #tpu.memory_space<vmem>>, vector<1x8x8xbf16>
    %248 = vector.shape_cast %247 : vector<1x8x8xbf16> to vector<8x8xbf16>
    %cst_236 = arith.constant dense<0.000000e+00> : vector<160x8xf32>
    %249 = tpu.matmul %246, %248, %cst_236 {dimension_numbers = #tpu.dot_dimension_numbers<[1], [0], [0], [1], [0, 0, 1, 1], [], []>} : vector<160x8xbf16>, vector<8x8xbf16>, vector<160x8xf32> -> vector<160x8xf32>
    %250 = arith.addf %245, %249 : vector<160x8xf32>
    %251 = arith.addf %236, %250 : vector<160x8xf32>
    %c0_237 = arith.constant 0 : index
    %c0_238 = arith.constant 0 : index
    %252 = vector.load %arg6[%c0_237, %c0_238] : memref<1x8xf32, #tpu.memory_space<vmem>>, vector<1x8xf32>
    %253 = vector.broadcast %252 : vector<1x8xf32> to vector<160x8xf32>
    %254 = arith.mulf %251, %253 : vector<160x8xf32>
    %c0_239 = arith.constant 0 : index
    %c0_240 = arith.constant 0 : index
    %255 = vector.load %arg7[%c0_239, %c0_240] : memref<1x8xf32, #tpu.memory_space<vmem>>, vector<1x8xf32>
    %256 = vector.broadcast %255 : vector<1x8xf32> to vector<160x8xf32>
    %257 = arith.addf %254, %256 : vector<160x8xf32>
    %cst_241 = arith.constant 0.00999999977 : f32
    %258 = vector.broadcast %cst_241 : f32 to vector<160x8xf32>
    %259 = arith.mulf %257, %258 : vector<160x8xf32>
    %260 = arith.maximumf %257, %259 : vector<160x8xf32>
    %c0_242 = arith.constant 0 : index
    %c160 = arith.constant 160 : index
    %c0_243 = arith.constant 0 : index
    %261 = vector.load %arg8[%c0_242, %c160, %c0_243] : memref<1x320x8xf32, #tpu.memory_space<vmem>>, vector<1x160x8xf32>
    %262 = vector.shape_cast %261 : vector<1x160x8xf32> to vector<160x8xf32>
    %263 = vector.shape_cast %260 : vector<160x8xf32> to vector<1x160x8xf32>
    tpu.vector_store %arg8[%c0_242, %c160, %c0_243], %263 {strides = array<i32>} : memref<1x320x8xf32, #tpu.memory_space<vmem>>, vector<1x160x8xf32>,
    return
  }
  func.func @transform_0(%arg0: i32) -> (i32, i32, i32) {
    %c0_i32 = arith.constant 0 : i32
    %c0_i32_0 = arith.constant 0 : i32
    %c0_i32_1 = arith.constant 0 : i32
    return %arg0, %c0_i32, %c0_i32_0 : i32, i32, i32
  }
  func.func @transform_1(%arg0: i32) -> (i32, i32, i32) {
    %c0_i32 = arith.constant 0 : i32
    %c0_i32_0 = arith.constant 0 : i32
    %c0_i32_1 = arith.constant 0 : i32
    %c0_i32_2 = arith.constant 0 : i32
    return %c0_i32, %c0_i32_0, %c0_i32_1 : i32, i32, i32
  }
  func.func @transform_2(%arg0: i32) -> (i32, i32) {
    %c0_i32 = arith.constant 0 : i32
    %c0_i32_0 = arith.constant 0 : i32
    %c0_i32_1 = arith.constant 0 : i32
    return %c0_i32, %c0_i32_0 : i32, i32
  }
  func.func @transform_3(%arg0: i32) -> (i32, i32) {
    %c0_i32 = arith.constant 0 : i32
    %c0_i32_0 = arith.constant 0 : i32
    %c0_i32_1 = arith.constant 0 : i32
    return %c0_i32, %c0_i32_0 : i32, i32
  }
  func.func @transform_4(%arg0: i32) -> (i32, i32, i32) {
    %c0_i32 = arith.constant 0 : i32
    %c0_i32_0 = arith.constant 0 : i32
    %c0_i32_1 = arith.constant 0 : i32
    %c0_i32_2 = arith.constant 0 : i32
    return %c0_i32, %c0_i32_0, %c0_i32_1 : i32, i32, i32
  }
  func.func @transform_5(%arg0: i32) -> (i32, i32) {
    %c0_i32 = arith.constant 0 : i32
    %c0_i32_0 = arith.constant 0 : i32
    %c0_i32_1 = arith.constant 0 : i32
    return %c0_i32, %c0_i32_0 : i32, i32
  }
  func.func @transform_6(%arg0: i32) -> (i32, i32) {
    %c0_i32 = arith.constant 0 : i32
    %c0_i32_0 = arith.constant 0 : i32
    %c0_i32_1 = arith.constant 0 : i32
    return %c0_i32, %c0_i32_0 : i32, i32
  }
  func.func @transform_7(%arg0: i32) -> (i32, i32, i32) {
    %c0_i32 = arith.constant 0 : i32
    %c0_i32_0 = arith.constant 0 : i32
    %c0_i32_1 = arith.constant 0 : i32
    return %arg0, %c0_i32, %c0_i32_0 : i32, i32, i32
  }
}

</mosaic_0001>

<bundles_post_ra>
// kernel: _forward.1
= control target key start
LH: loop header
LB: loop body
LE: loop exit
PB: predicated region body
PF: predicated region fallthrough
CT: control target
= control target key end

     0   :  { %s12343_s24 = smov 0   ;;  %s15676_s0 = inlined_call_operand.vmem [shape: bf16[2,400,8], index: 0, kind: input, shape index: {}]   ;;  %s15677_s1 = inlined_call_operand.vmem [shape: bf16[9,8,8], index: 1, kind: input, shape index: {}]   ;;  %s15678_s2 = inlined_call_operand.vmem [shape: f32[1,8], index: 2, kind: input, shape index: {}]   ;;  %s15679_s3 = inlined_call_operand.vmem [shape: f32[1,8], index: 3, kind: input, shape index: {}]   ;;  %s15680_s4 = inlined_call_operand.vmem [shape: bf16[9,8,8], index: 4, kind: input, shape index: {}]   ;;  %s15681_s5 = inlined_call_operand.vmem [shape: f32[1,8], index: 5, kind: input, shape index: {}]   ;;  %s15682_s6 = inlined_call_operand.vmem [shape: f32[1,8], index: 6, kind: input, shape index: {}]   ;;  %s15683_s7 = inlined_call_operand.vmem [shape: f32[2,320,8], index: 7, kind: output, shape index: {}]  }
   0x1 LB: > { %s9754_s25 = sadd.s32 4294967295, %s12299_s24   ;;  %p9758_p0 = scmp.ge.s32.totalorder %s12299_s24, 1  ;;  %s12299_s24 = sphi %s12343_s24, %s17_s24  }
   0x2   : > { %p237_p1 = scmp.lt.s32.totalorder %s12299_s24, 3 }
   0x4   : > { %p238_p2 = pnand %p9758_p0, %p237_p1 }
   0x6   : > { %241 = sbr.rel (%p238_p2) target bundleno = 1221 (0x4c5), region = 48 }
   0xd   : > { %v9781_v0 = vld [vmem:[%s15677_s1 + $0x4] sm:$0xf]  ;;  %vm15730_vm0 = vcmask 1043456   ;;  %p269_p3 = scmp.lt.s32.totalorder %s9754_s25, 1  ;;  %v551_v4 = vld [vmem:[%s15677_s1] sm:$0xf] }
   0xe   : > { %v9939_v1 = vld [vmem:[%s15677_s1 + $0x4] sm:$0xf]  ;;  %12127 = vmatprep.subr.msk.bf16.mxu0 %vm15730_vm0, %v9781_v0  ;;  %v662_v2 = vsel %vm15730_vm0, %v9781_v0, 0  ;;  %v3012_v5 = vld [vmem:[%s15677_s1] sm:$0xf]  ;;  %vm15728_vm1 = vcmask 64512  }
   0xf   : > { %12136 = vmatprep.subr.msk.bf16.mxu1 %vm15730_vm0, %v9939_v1  ;;  %v3120_v3 = vsel %vm15730_vm0, %v9939_v1, 0  ;;  %10696 = vmatpush3.bf16.msra.mxu0 %v662_v2  ;;  %s16260_s25 = smov (!%p269_p3, %s9754_s25), 1  ;;  %vm15727_vm2 = vcmask 1045504   ;;  %v910_v11 = vsel %vm15730_vm0, %v551_v4, 0  ;;  %v12413_v23 = vld [vmem:[%s15677_s1 + $0x8] sm:$0xf] }
  0x10   : > { %10894 = vmatpush3.bf16.msra.mxu1 %v3120_v3  ;;  %12128 = vmatprep.subr.msk.bf16.mxu0 %vm15730_vm0, %v551_v4  ;;  %s12163_s11 = smul.u32 200, %s16260_s25  ;;  %v12423_v26 = vld [vmem:[%s15677_s1 + $0x8] sm:$0xf]  ;;  %v3367_v30 = vsel %vm15730_vm0, %v3012_v5, 0  ;;  %vm15725_vm3 = vsmask.f32 6400 }
  0x11   : > { %12137 = vmatprep.subr.msk.bf16.mxu1 %vm15730_vm0, %v3012_v5  ;;  %vm15724_vm4 = vsmask.f32 5376  ;;  %vm15723_vm5 = vsmask.f32 4352  ;;  %vm1806_vm6 = vsmask.f32 7424 }
  0x12   : > { %s12375_s14 = scalar_lea.vmem %s15676_s0, %s12163_s11  ;;  %vm15726_vm7 = vcmask 60416   ;;  %vm15729_vm8 = vcmask 64516   ;;  %s12164_s28 = smul.u32 320, %s16260_s25 }
  0x13   : > { %v12378_v6 = vld [vmem:[%s12375_s14 + $0xc] sm:$0xf]  ;;  %v552_v7 = vld [vmem:[%s12375_s14 + $0x8] sm:$0xc]  ;;  %v12382_v8 = vld [vmem:[%s12375_s14 + $0x10] sm:$0xff]  }
  0x14   : > { %v12385_v9 = vcombine.low %v552_v7, %v12378_v6  ;;  %v12388_v10 = vld [vmem:[%s12375_s14 + $0x5c] sm:$0xf]  ;;  %v610_v12 = vrot.slane %v12382_v8, 2  ;;  %v3013_v13 = vld [vmem:[%s12375_s14 + $0x58] sm:$0xc]  ;;  %v12394_v14 = vld [vmem:[%s12375_s14 + $0x60] sm:$0xff]   ;;  %s15518_s8 = scalar_lea.vmem %s15683_s7, %s12164_s28 }
  0x15   : > { %v12398_v16 = vcombine.low %v3013_v13, %v12388_v10  ;;  %v12401_v17 = vld [vmem:[%s12375_s14 + $0x18] sm:$0xff]   ;;  %v3069_v18 = vrot.slane %v12394_v14, 2  ;;  %v12405_v19 = vld [vmem:[%s12375_s14 + $0x68] sm:$0xff]   ;;  %v12418_v25 = vld [vmem:[%s12375_s14 + $0x20] sm:$0xff]  }
  0x16   : > { %v609_v15 = vrot.slane %v12385_v9, 2  ;;  %v612_v22 = vrot.slane %v12401_v17, 2  ;;  %v3071_v24 = vrot.slane %v12405_v19, 2  ;;  %v12428_v29 = vld [vmem:[%s12375_s14 + $0x70] sm:$0xff]   ;;  %v614_v32 = vrot.slane %v12418_v25, 2  ;;  %v12436_v33 = vld [vmem:[%s12375_s14 + $0x28] sm:$0xff]  }
  0x17   : > { %v3068_v21 = vrot.slane %v12398_v16, 2  ;;  %v3073_v34 = vrot.slane %v12428_v29, 2  ;;  %v12441_v35 = vld [vmem:[%s12375_s14 + $0x78] sm:$0xff]   ;;  %v616_v37 = vrot.slane %v12436_v33, 2  ;;  %v12446_v38 = vld [vmem:[%s12375_s14 + $0x30] sm:$0xff]   ;;  %v12454_v41 = vld [vmem:[%s12375_s14 + $0x80] sm:$0xff]  }
  0x18   : > { %v611_v20 = vsel %vm15727_vm2, %v609_v15, %v610_v12  ;;  %v613_v28 = vsel %vm15727_vm2, %v610_v12, %v612_v22  ;;  %v3072_v31 = vsel %vm15727_vm2, %v3069_v18, %v3071_v24  ;;  %v615_v36 = vsel %vm15727_vm2, %v612_v22, %v614_v32  ;;  %v12461_v43 = vld [vmem:[%s12375_s14 + $0x38] sm:$0xff]   ;;  %v12466_v46 = vld [vmem:[%s12375_s14 + $0x88] sm:$0xff]   ;;  %v12471_v49 = vld [vmem:[%s12375_s14 + $0x40] sm:$0xff]  }
  0x19   : > { %10697 = vmatprep.mubr.msk.bf16.mxu0 %vm15728_vm1, %v611_v20  ;;  %v3070_v27 = vsel %vm15727_vm2, %v3068_v21, %v3069_v18  ;;  %v3074_v39 = vsel %vm15727_vm2, %v3071_v24, %v3073_v34  ;;  %v3075_v40 = vrot.slane %v12441_v35, 2  ;;  %v618_v42 = vrot.slane %v12446_v38, 2  ;;  %v12475_v51 = vld [vmem:[%s12375_s14 + $0x90] sm:$0xff]   ;;  %v530_v52 = vld [vmem:[%s12375_s14 + $0x8] sm:$0xe]  ;;  %v12492_v60 = vld [vmem:[%s12375_s14 + $0x98] sm:$0xff]  }
  0x1a   : > { %10895 = vmatprep.mubr.msk.bf16.mxu1 %vm15728_vm1, %v3070_v27  ;;  %10698 = vmatmul.mubr.msk.bf16.vlgmr.msra.gmra.mrb[0].mxu0 %vm15728_vm1, %v613_v28  ;;  %v617_v44 = vsel %vm15727_vm2, %v614_v32, %v616_v37  ;;  %v3077_v45 = vrot.slane %v12454_v41, 2  ;;  %v2991_v53 = vld [vmem:[%s12375_s14 + $0x58] sm:$0xe]  ;;  %v620_v54 = vrot.slane %v12461_v43, 2  ;;  %v3079_v55 = vrot.slane %v12466_v46, 2  ;;  %v12489_v59 = vld [vmem:[%s12375_s14 + $0x48] sm:$0xff]  }
  0x1b   : > { %10718 = vmatpush3.bf16.msra.mxu0 %v910_v11  ;;  %10896 = vmatmul.mubr.msk.bf16.vlgmr.msra.gmra.mrb[0].mxu1 %vm15728_vm1, %v3072_v31  ;;  %v3076_v47 = vsel %vm15727_vm2, %v3073_v34, %v3075_v40  ;;  %v619_v48 = vsel %vm15727_vm2, %v616_v37, %v618_v42  ;;  %v622_v56 = vrot.slane %v12471_v49, 2  ;;  %v3081_v57 = vrot.slane %v12475_v51, 2  ;;  %v12496_v62 = vld [vmem:[%s12375_s14 + $0x50] sm:$0xff]   ;;  %v12503_v3 = vld [vmem:[%s12375_s14 + $0xa0] sm:$0xff]  }
  0x1c   : > { %10916 = vmatpush3.bf16.msra.mxu1 %v3367_v30  ;;  %12129 = vmatprep.subr.msk.bf16.mxu0 %vm15730_vm0, %v12413_v23  ;;  %v3078_v50 = vsel %vm15727_vm2, %v3075_v40, %v3077_v45  ;;  %v9803_v58 = vcombine.low %v530_v52, %v12378_v6  ;;  %v621_v61 = vsel %vm15727_vm2, %v618_v42, %v620_v54  ;;  %v624_v4 = vrot.slane %v12489_v59, 2  ;;  %v12520_v27 = vld [vmem:[%s12375_s14 + $0x58] ss:$0 sps:$4 sm:$0x33]  }
  0x1d   : > { %10701 = vmatprep.mubr.msk.bf16.mxu0 %vm15728_vm1, %v615_v36  ;;  %12138 = vmatprep.subr.msk.bf16.mxu1 %vm15730_vm0, %v12423_v26  ;;  %v9961_v63 = vcombine.low %v2991_v53, %v12388_v10  ;;  %v3080_v0 = vsel %vm15727_vm2, %v3077_v45, %v3079_v55  ;;  %v623_v1 = vsel %vm15727_vm2, %v620_v54, %v622_v56  ;;  %v3083_v5 = vrot.slane %v12492_v60, 2  ;;  %v12524_v31 = vld [vmem:[%s12375_s14 + $0xa8] ss:$0 sps:$4 sm:$0x33]  }
  0x1e   : > { %10899 = vmatprep.mubr.msk.bf16.mxu1 %vm15728_vm1, %v3074_v39  ;;  %v3082_v2 = vsel %vm15727_vm2, %v3079_v55, %v3081_v57  ;;  %v782_v6 = vshrl.u32 %v9803_v58, 16  ;;  %v626_v7 = vrot.slane %v12496_v62, 2  ;;  %v785_v10 = vshll.u32 %v9803_v58, 16 }
  0x1f   : > { %v790_v11 = vshrl.u32 %v12382_v8, 16  ;;  %v793_v12 = vshll.u32 %v12382_v8, 16  ;;  %v3239_v13 = vshrl.u32 %v9961_v63, 16  ;;  %v3242_v15 = vshll.u32 %v9961_v63, 16 }
  0x20   : > { %v3247_v18 = vshrl.u32 %v12394_v14, 16  ;;  %v3250_v20 = vshll.u32 %v12394_v14, 16  ;;  %v3085_v21 = vrot.slane %v12503_v3, 2  ;;  %v625_v22 = vsel %vm15727_vm2, %v622_v56, %v624_v4 }
  0x21   : > { %v3084_v24 = vsel %vm15727_vm2, %v3081_v57, %v3083_v5  ;;  %v784_v28 = vrot.slane %v782_v6, 1  ;;  %v627_v30 = vsel %vm15727_vm2, %v624_v4, %v626_v7  ;;  %v787_v32 = vrot.slane %v785_v10, 2 }
  0x22   : > { %10702 = vmatmul.mubr.msk.bf16.gmra.mrb[4].mxu0 %vm15728_vm1, %v617_v44  ;;  %v792_v34 = vrot.slane %v790_v11, 1  ;;  %v795_v36 = vrot.slane %v793_v12, 2  ;;  %v3241_v37 = vrot.slane %v3239_v13, 1  ;;  %v3244_v39 = vrot.slane %v3242_v15, 2 }
  0x23   : > { %10900 = vmatmul.mubr.msk.bf16.gmra.mrb[4].mxu1 %vm15728_vm1, %v3076_v47  ;;  %10705 = vmatprep.mubr.msk.bf16.mxu0 %vm15728_vm1, %v619_v48  ;;  %v3249_v40 = vrot.slane %v3247_v18, 1  ;;  %v3252_v42 = vrot.slane %v3250_v20, 2  ;;  %v3086_v44 = vsel %vm15727_vm2, %v3083_v5, %v3085_v21  ;;  %v799_v45 = vshrl.u32 %v12401_v17, 16 }
  0x24   : > { %10903 = vmatprep.mubr.msk.bf16.mxu1 %vm15728_vm1, %v3078_v50  ;;  %v802_v47 = vshll.u32 %v12401_v17, 16  ;;  %v628_v48 = vrot.slane %v12520_v27, 2  ;;  %v3087_v50 = vrot.slane %v12524_v31, 2  ;;  %v788_v52 = vor.u32 %v787_v32, %v784_v28 }
  0x25   : > { %v796_v53 = vor.u32 %v795_v36, %v792_v34  ;;  %v3245_v54 = vor.u32 %v3244_v39, %v3241_v37  ;;  %v3253_v55 = vor.u32 %v3252_v42, %v3249_v40  ;;  %v3256_v56 = vshrl.u32 %v12405_v19, 16 }
  0x26   : > { %v3259_v57 = vshll.u32 %v12405_v19, 16  ;;  %v808_v58 = vshrl.u32 %v12418_v25, 16  ;;  %v3265_v63 = vshrl.u32 %v12428_v29, 16  ;;  %v629_v4 = vsel %vm15727_vm2, %v626_v7, %v628_v48 }
  0x27   : > { %v3088_v5 = vsel %vm15727_vm2, %v3085_v21, %v3087_v50  ;;  %v797_v6 = vsel %vm15725_vm3, %v788_v52, %v796_v53  ;;  %v3254_v10 = vsel %vm15725_vm3, %v3245_v54, %v3253_v55  ;;  %v3258_v13 = vrot.slane %v3256_v56, 1 }
  0x28   : > { %v3261_v15 = vrot.slane %v3259_v57, 2  ;;  %v3267_v7 = vrot.slane %v3265_v63, 1  ;;  %v820_v32 = vshll.u32 %v12436_v33, 16  ;;  %v15697_v34 = vshrl.u32 %v12441_v35, 16 }
  0x29   : > { %v15696_v36 = vshll.u32 %v12441_v35, 16  ;;  %v15695_v37 = vshrl.u32 %v12446_v38, 16  ;;  %v15691_v39 = vshll.u32 %v12446_v38, 16  ;;  %v15685_v48 = vshrl.u32 %v12454_v41, 16 }
  0x2a   : > { %10706 = vmatmul.mubr.msk.bf16.gmra.mrb[8].mxu0 %vm15728_vm1, %v621_v61  ;;  %v811_v61 = vshll.u32 %v12418_v25, 16  ;;  %v3262_v40 = vor.u32 %v3261_v15, %v3258_v13  ;;  %v15684_v50 = vshll.u32 %v12454_v41, 16  ;;  %v1045_v14 = vrot.slane %v802_v47, 3 }
  0x2b   : > { %10904 = vmatmul.mubr.msk.bf16.gmra.mrb[8].mxu1 %vm15728_vm1, %v3080_v0  ;;  %10709 = vmatprep.mubr.msk.bf16.mxu0 %vm15728_vm1, %v623_v1  ;;  %v3268_v0 = vshll.u32 %v12428_v29, 16  ;;  %v801_v1 = vrot.slane %v799_v45, 1  ;;  %v3503_v17 = vrot.slane %v3265_v63, 2  ;;  %v15765_v63 = vshrl.u32 %v12441_v35, 16 }
  0x2c   : > { %10907 = vmatprep.mubr.msk.bf16.mxu1 %vm15728_vm1, %v3082_v2  ;;  %v804_v2 = vrot.slane %v802_v47, 2 }
  0x2d   : > { %v3270_v21 = vrot.slane %v3268_v0, 2 }
  0x2e   : > { %v805_v28 = vor.u32 %v804_v2, %v801_v1  ;;  %v822_v1 = vrot.slane %v820_v32, 2  ;;  %v3276_v2 = vrot.slane %v15697_v34, 1 }
  0x30   : > { %v806_v52 = vsel %vm15725_vm3, %v796_v53, %v805_v28  ;;  %v1116_v53 = vsel %vm15730_vm0, %v12413_v23, 0  ;;  %v3571_v23 = vsel %vm15730_vm0, %v12423_v26, 0  ;;  %v15689_v26 = vshll.u32 %v12466_v46, 16 }
  0x32   : > { %10710 = vmatmul.mubr.msk.bf16.gmra.mrb[12].mxu0 %vm15728_vm1, %v625_v22  ;;  %v810_v22 = vrot.slane %v808_v58, 1 }
  0x33   : > { %10908 = vmatmul.mubr.msk.bf16.gmra.mrb[12].mxu1 %vm15728_vm1, %v3084_v24  ;;  %10713 = vmatprep.mubr.msk.bf16.mxu0 %vm15728_vm1, %v627_v30  ;;  %v813_v24 = vrot.slane %v811_v61, 2  ;;  %v817_v30 = vshrl.u32 %v12436_v33, 16  ;;  %v15770_v33 = vshll.u32 %v12454_v41, 16 }
  0x34   : > { %10911 = vmatprep.mubr.msk.bf16.mxu1 %vm15728_vm1, %v3086_v44  ;;  %v3271_v44 = vor.u32 %v3270_v21, %v3267_v7  ;;  %v15687_v7 = vshrl.u32 %v12461_v43, 16  ;;  %v15686_v21 = vshll.u32 %v12461_v43, 16 }
  0x35   : > { %v814_v42 = vor.u32 %v813_v24, %v810_v22  ;;  %v819_v54 = vrot.slane %v817_v30, 1  ;;  %v3285_v22 = vrot.slane %v15685_v48, 1  ;;  %v3288_v24 = vrot.slane %v15684_v50, 2  ;;  %v12618_v48 = vld [vmem:[%s15677_s1 + $0x10] sm:$0xf] }
  0x36   : > { %v3272_v15 = vsel %vm15725_vm3, %v3262_v40, %v3271_v44  ;;  %v1052_v29 = vrot.slane %v817_v30, 2 }
  0x37   : > { %v815_v13 = vsel %vm15725_vm3, %v805_v28, %v814_v42  ;;  %v823_v28 = vor.u32 %v822_v1, %v819_v54  ;;  %v3289_v54 = vor.u32 %v3288_v24, %v3285_v22  ;;  %v15692_v1 = vshrl.u32 %v12475_v51, 16 }
  0x38   : > { %v3297_v24 = vrot.slane %v15689_v26, 2 }
  0x3a   : > { %10714 = vmatmul.mubr.msk.bf16.gmra.mrb[16].mxu0 %vm15728_vm1, %v629_v4  ;;  %v3279_v4 = vrot.slane %v15696_v36, 2 }
  0x3b   : > { %10912 = vmatmul.mubr.msk.bf16.gmra.mrb[16].mxu1 %vm15728_vm1, %v3088_v5  ;;  %10719 = vmatprep.mubr.msk.bf16.mxu0 %vm15728_vm1, %v797_v6  ;;  %v828_v5 = vrot.slane %v15695_v37, 1  ;;  %v831_v6 = vrot.slane %v15691_v39, 2  ;;  %v15698_v39 = vshll.u32 %v12492_v60, 16 }
  0x3c   : > { %10917 = vmatprep.mubr.msk.bf16.mxu1 %vm15728_vm1, %v3254_v10  ;;  %v3263_v10 = vsel %vm15725_vm3, %v3253_v55, %v3262_v40  ;;  %v12611_v55 = vld [vmem:[%s15677_s1 + $0x10] sm:$0xf]  ;;  %v3280_v40 = vor.u32 %v3279_v4, %v3276_v2  ;;  %v15694_v2 = vshll.u32 %v12475_v51, 16  ;;  %v837_v4 = vrot.slane %v15687_v7, 1 }
  0x3d   : > { %v832_v50 = vor.u32 %v831_v6, %v828_v5  ;;  %v840_v5 = vrot.slane %v15686_v21, 2  ;;  %v824_v6 = vsel %vm15725_vm3, %v814_v42, %v823_v28  ;;  %v15705_v7 = vshrl.u32 %v12489_v59, 16 }
  0x3e   : > { %v3290_v42 = vsel %vm15725_vm3, %v3280_v40, %v3289_v54  ;;  %v3315_v34 = vrot.slane %v15698_v39, 2 }
  0x3f   : > { %v841_v26 = vor.u32 %v840_v5, %v837_v4  ;;  %v15703_v4 = vshll.u32 %v12503_v3, 16 }
  0x42   : > { %10720 = vmatmul.mubr.msk.bf16.vlgmr.msra.gmra.mrb[0].mxu0 %vm15728_vm1, %v806_v52  ;;  %v15688_v52 = vshrl.u32 %v12466_v46, 16 }
  0x43   : > { %10740 = vmatpush3.bf16.msra.mxu0 %v1116_v53  ;;  %10918 = vmatmul.mubr.msk.bf16.vlgmr.msra.gmra.mrb[0].mxu1 %vm15728_vm1, %v3263_v10  ;;  %v15690_v53 = vshrl.u32 %v12471_v49, 16  ;;  %v15693_v10 = vshll.u32 %v12471_v49, 16 }
  0x44   : > { %10723 = vmatprep.mubr.msk.bf16.mxu0 %vm15728_vm1, %v815_v13  ;;  %10921 = vmatprep.mubr.msk.bf16.mxu1 %vm15728_vm1, %v3272_v15  ;;  %v3281_v13 = vsel %vm15725_vm3, %v3271_v44, %v3280_v40  ;;  %v833_v15 = vsel %vm15725_vm3, %v823_v28, %v832_v50  ;;  %v3294_v22 = vrot.slane %v15688_v52, 1  ;;  %v3303_v44 = vrot.slane %v15692_v1, 1 }
  0x45   : > { %10938 = vmatpush3.bf16.msra.mxu1 %v3571_v23  ;;  %12130 = vmatprep.subr.msk.bf16.mxu0 %vm15730_vm0, %v12611_v55  ;;  %v846_v23 = vrot.slane %v15690_v53, 1  ;;  %v849_v21 = vrot.slane %v15693_v10, 2  ;;  %v3306_v28 = vrot.slane %v15694_v2, 2  ;;  %v15704_v52 = vshll.u32 %v12489_v59, 16 }
  0x46   : > { %12139 = vmatprep.subr.msk.bf16.mxu1 %vm15730_vm0, %v12618_v48  ;;  %v15702_v53 = vshrl.u32 %v12492_v60, 16  ;;  %v15700_v40 = vshrl.u32 %v12496_v62, 16  ;;  %v15699_v1 = vshll.u32 %v12496_v62, 16  ;;  %v15701_v10 = vshrl.u32 %v12503_v3, 16 }
  0x47   : > { %v3298_v2 = vor.u32 %v3297_v24, %v3294_v22  ;;  %v850_v37 = vor.u32 %v849_v21, %v846_v23  ;;  %v3307_v5 = vor.u32 %v3306_v28, %v3303_v44  ;;  %v871_v23 = vshrl.u32 %v12520_v27, 16 }
  0x48   : > { %v3312_v36 = vrot.slane %v15702_v53, 1  ;;  %v864_v21 = vrot.slane %v15700_v40, 1  ;;  %v867_v22 = vrot.slane %v15699_v1, 2  ;;  %v3321_v24 = vrot.slane %v15701_v10, 1 }
  0x49   : > { %v3324_v44 = vrot.slane %v15703_v4, 2  ;;  %v874_v28 = vshll.u32 %v12520_v27, 16  ;;  %v3308_v39 = vsel %vm15725_vm3, %v3298_v2, %v3307_v5  ;;  %v3328_v1 = vshrl.u32 %v12524_v31, 16 }
  0x4a   : > { %10724 = vmatmul.mubr.msk.bf16.gmra.mrb[4].mxu0 %vm15728_vm1, %v824_v6  ;;  %v855_v6 = vrot.slane %v15705_v7, 1  ;;  %v3331_v40 = vshll.u32 %v12524_v31, 16  ;;  %v3316_v10 = vor.u32 %v3315_v34, %v3312_v36  ;;  %v873_v53 = vrot.slane %v871_v23, 1 }
  0x4b   : > { %10922 = vmatmul.mubr.msk.bf16.gmra.mrb[4].mxu1 %vm15728_vm1, %v3281_v13  ;;  %10727 = vmatprep.mubr.msk.bf16.mxu0 %vm15728_vm1, %v833_v15  ;;  %v858_v13 = vrot.slane %v15704_v52, 2  ;;  %v842_v15 = vsel %vm15725_vm3, %v832_v50, %v841_v26  ;;  %v851_v50 = vsel %vm15725_vm3, %v841_v26, %v850_v37  ;;  %v868_v26 = vor.u32 %v867_v22, %v864_v21 }
  0x4c   : > { %10925 = vmatprep.mubr.msk.bf16.mxu1 %vm15728_vm1, %v3290_v42  ;;  %v3299_v42 = vsel %vm15725_vm3, %v3289_v54, %v3298_v2  ;;  %v3325_v4 = vor.u32 %v3324_v44, %v3321_v24  ;;  %v876_v27 = vrot.slane %v874_v28, 2  ;;  %v1033_v2 = vshrl.u32 %v12385_v9, 16 }
  0x4d   : > { %v859_v54 = vor.u32 %v858_v13, %v855_v6  ;;  %v3488_v52 = vshrl.u32 %v12398_v16, 16  ;;  %v3491_v31 = vshll.u32 %v12398_v16, 16  ;;  %v3330_v7 = vrot.slane %v3328_v1, 1 }
  0x4e   : > { %v3317_v34 = vsel %vm15725_vm3, %v3307_v5, %v3316_v10  ;;  %v1040_v36 = vrot.slane %v790_v11, 2  ;;  %v1035_v13 = vrot.slane %v1033_v2, 2  ;;  %v3495_v1 = vrot.slane %v3247_v18, 2 }
  0x4f   : > { %v869_v6 = vsel %vm15725_vm3, %v859_v54, %v868_v26  ;;  %v3490_v22 = vrot.slane %v3488_v52, 2  ;;  %v3493_v16 = vrot.slane %v3491_v31, 3  ;;  %v877_v8 = vor.u32 %v876_v27, %v873_v53 }
  0x50   : > { %v3500_v53 = vrot.slane %v3259_v57, 3  ;;  %v1049_v5 = vrot.slane %v811_v61, 3  ;;  %v1357_v57 = vsel %vm15730_vm0, %v12611_v55, 0  ;;  %v1053_v61 = vrot.slane %v820_v32, 3 }
  0x51   : > { %v3494_v18 = vor.u32 %v3493_v16, %v3490_v22  ;;  %v878_v24 = vsel %vm15725_vm3, %v868_v26, %v877_v8  ;;  %v15768_v26 = vshll.u32 %v12446_v38, 16  ;;  %v15769_v2 = vshrl.u32 %v12454_v41, 16  ;;  %v12769_v41 = vld [vmem:[%s15677_s1 + $0xc] sm:$0xf] }
  0x52   : > { %10728 = vmatmul.mubr.msk.bf16.gmra.mrb[8].mxu0 %vm15728_vm1, %v842_v15  ;;  %v1036_v15 = vshll.u32 %v12385_v9, 16  ;;  %v3326_v9 = vsel %vm15725_vm3, %v3316_v10, %v3325_v4  ;;  %v1044_v10 = vrot.slane %v799_v45, 2  ;;  %v3504_v45 = vrot.slane %v3268_v0, 3 }
  0x53   : > { %10926 = vmatmul.mubr.msk.bf16.gmra.mrb[8].mxu1 %vm15728_vm1, %v3299_v42  ;;  %10731 = vmatprep.mubr.msk.bf16.mxu0 %vm15728_vm1, %v851_v50  ;;  %v3333_v42 = vrot.slane %v3331_v40, 2  ;;  %v860_v50 = vsel %vm15725_vm3, %v850_v37, %v859_v54  ;;  %v3496_v37 = vrot.slane %v3250_v20, 3  ;;  %v3499_v40 = vrot.slane %v3256_v56, 2 }
  0x54   : > { %10929 = vmatprep.mubr.msk.bf16.mxu1 %vm15728_vm1, %v3308_v39  ;;  %v1041_v39 = vrot.slane %v793_v12, 3  ;;  %v1038_v21 = vrot.slane %v1036_v15, 3  ;;  %v1046_v25 = vor.u32 %v1045_v14, %v1044_v10  ;;  %v3507_v0 = vrot.slane %v15765_v63, 2 }
  0x55   : > { %v3334_v11 = vor.u32 %v3333_v42, %v3330_v7  ;;  %v3497_v20 = vor.u32 %v3496_v37, %v3495_v1  ;;  %v1048_v7 = vrot.slane %v808_v58, 2  ;;  %v3501_v58 = vor.u32 %v3500_v53, %v3499_v40 }
  0x56   : > { %v1039_v12 = vor.u32 %v1038_v21, %v1035_v13  ;;  %v1042_v52 = vor.u32 %v1041_v39, %v1040_v36  ;;  %v3505_v28 = vor.u32 %v3504_v45, %v3503_v17  ;;  %v15767_v54 = vshrl.u32 %v12446_v38, 16  ;;  %v12199_v17 = vld [vmem:[%s12375_s14 + $0x58] ss:$0 sps:$4 sm:$0x77]  }
  0x57   : > { %v3335_v47 = vsel %vm15725_vm3, %v3325_v4, %v3334_v11  ;;  %v3498_v19 = vsel %vm15724_vm4, %v3494_v18, %v3497_v20  ;;  %v15766_v4 = vshll.u32 %v12441_v35, 16  ;;  %v1050_v44 = vor.u32 %v1049_v5, %v1048_v7 }
  0x58   : > { %v1043_v56 = vsel %vm15724_vm4, %v1039_v12, %v1042_v52  ;;  %v1056_v55 = vrot.slane %v15767_v54, 2  ;;  %v1057_v27 = vrot.slane %v15768_v26, 3  ;;  %v3511_v30 = vrot.slane %v15769_v2, 2 }
  0x59   : > { %v3508_v23 = vrot.slane %v15766_v4, 3  ;;  %v3512_v32 = vrot.slane %v15770_v33, 3  ;;  %v1047_v15 = vsel %vm15724_vm4, %v1042_v52, %v1046_v25  ;;  %v3502_v31 = vsel %vm15724_vm4, %v3497_v20, %v3501_v58 }
  0x5a   : > { %10732 = vmatmul.mubr.msk.bf16.gmra.mrb[12].mxu0 %vm15728_vm1, %v860_v50  ;;  %v1051_v35 = vsel %vm15724_vm4, %v1046_v25, %v1050_v44  ;;  %v3506_v42 = vsel %vm15724_vm4, %v3501_v58, %v3505_v28  ;;  %v1054_v50 = vor.u32 %v1053_v61, %v1052_v29  ;;  %v3810_v38 = vsel %vm15730_vm0, %v12618_v48, 0 }
  0x5b   : > { %10930 = vmatmul.mubr.msk.bf16.gmra.mrb[12].mxu1 %vm15728_vm1, %v3317_v34  ;;  %10735 = vmatprep.mubr.msk.bf16.mxu0 %vm15728_vm1, %v869_v6  ;;  %v12763_v34 = vld [vmem:[%s15677_s1 + $0xc] sm:$0xf]  ;;  %v3509_v36 = vor.u32 %v3508_v23, %v3507_v0  ;;  %v1058_v39 = vor.u32 %v1057_v27, %v1056_v55  ;;  %v3513_v48 = vor.u32 %v3512_v32, %v3511_v30  ;;  %v15772_v21 = vshll.u32 %v12461_v43, 16 }
  0x5c   : > { %10933 = vmatprep.mubr.msk.bf16.mxu1 %vm15728_vm1, %v3326_v9  ;;  %v1055_v6 = vsel %vm15724_vm4, %v1050_v44, %v1054_v50  ;;  %v15771_v9 = vshrl.u32 %v12461_v43, 16  ;;  %v15773_v16 = vshrl.u32 %v12466_v46, 16  ;;  %v15774_v37 = vshll.u32 %v12466_v46, 16 }
  0x5d   : > { %v1061_v22 = vrot.slane %v15772_v21, 3  ;;  %v3510_v11 = vsel %vm15724_vm4, %v3505_v28, %v3509_v36  ;;  %v1059_v12 = vsel %vm15724_vm4, %v1054_v50, %v1058_v39  ;;  %v15775_v52 = vshrl.u32 %v12471_v49, 16  ;;  %v12839_v21 = vld [vmem:[%s12375_s14 + $0x18] sm:$0xf] }
  0x5e   : > { %v1060_v13 = vrot.slane %v15771_v9, 2  ;;  %v3515_v1 = vrot.slane %v15773_v16, 2  ;;  %v3516_v8 = vrot.slane %v15774_v37, 3  ;;  %v15776_v14 = vshll.u32 %v12471_v49, 16  ;;  %v12845_v16 = vld [vmem:[%s12375_s14 + $0x68] sm:$0xf] }
  0x5f   : > { %v1064_v10 = vrot.slane %v15775_v52, 2  ;;  %v3514_v43 = vsel %vm15724_vm4, %v3509_v36, %v3513_v48  ;;  %v15777_v20 = vshrl.u32 %v12475_v51, 16  ;;  %v15778_v46 = vshll.u32 %v12475_v51, 16  ;;  %v12857_v52 = vld [vmem:[%s12375_s14 + $0x20] sm:$0xf] }
  0x60   : > { %v1065_v18 = vrot.slane %v15776_v14, 3  ;;  %v1062_v7 = vor.u32 %v1061_v22, %v1060_v13  ;;  %v3517_v5 = vor.u32 %v3516_v8, %v3515_v1  ;;  %v15779_v45 = vshrl.u32 %v12489_v59, 16  ;;  %v12836_v13 = vld [vmem:[%s12375_s14 + $0x14] sm:$0xf]  ;;  %v12842_v22 = vld [vmem:[%s12375_s14 + $0x64] sm:$0xf] }
  0x61   : > { %v3519_v40 = vrot.slane %v15777_v20, 2  ;;  %v3520_v53 = vrot.slane %v15778_v46, 3  ;;  %v15780_v25 = vshll.u32 %v12489_v59, 16  ;;  %v15781_v58 = vshrl.u32 %v12492_v60, 16  ;;  %v12862_v14 = vld [vmem:[%s12375_s14 + $0x70] sm:$0xf] }
  0x62   : > { %10736 = vmatmul.mubr.msk.bf16.gmra.mrb[16].mxu0 %vm15728_vm1, %v878_v24  ;;  %v1066_v49 = vor.u32 %v1065_v18, %v1064_v10  ;;  %v1063_v51 = vsel %vm15724_vm4, %v1058_v39, %v1062_v7  ;;  %v15782_v63 = vshll.u32 %v12492_v60, 16  ;;  %v15783_v4 = vshrl.u32 %v12496_v62, 16  ;;  %v3709_v10 = vld [vmem:[%s12375_s14 + $0x6c] sm:$0xf]  ;;  %v12866_v18 = vld [vmem:[%s12375_s14 + $0x24] sm:$0xf] }
  0x63   : > { %10934 = vmatmul.mubr.msk.bf16.gmra.mrb[16].mxu1 %vm15728_vm1, %v3335_v47  ;;  %10741 = vmatprep.mubr.msk.bf16.mxu0 %vm15728_vm1, %v1043_v56  ;;  %v3521_v24 = vor.u32 %v3520_v53, %v3519_v40  ;;  %v1068_v47 = vrot.slane %v15779_v45, 2  ;;  %v12200_v56 = vld [vmem:[%s12375_s14 + $0xa8] ss:$0 sps:$4 sm:$0x77]   ;;  %v3523_v29 = vrot.slane %v15781_v58, 2  ;;  %v15784_v44 = vshll.u32 %v12496_v62, 16 }
  0x64   : > { %10939 = vmatprep.mubr.msk.bf16.mxu1 %vm15728_vm1, %v3498_v19  ;;  %v3518_v19 = vsel %vm15724_vm4, %v3513_v48, %v3517_v5  ;;  %v1067_v61 = vsel %vm15724_vm4, %v1062_v7, %v1066_v49  ;;  %v3524_v0 = vrot.slane %v15782_v63, 3  ;;  %v1072_v23 = vrot.slane %v15783_v4, 2  ;;  %v12872_v20 = vld [vmem:[%s12375_s14 + $0x74] sm:$0xf]  ;;  %v12875_v40 = vld [vmem:[%s12375_s14 + $0x78] sm:$0xf] }
  0x65   : > { %v1073_v28 = vrot.slane %v15784_v44, 3  ;;  %v3522_v54 = vsel %vm15724_vm4, %v3517_v5, %v3521_v24  ;;  %v15785_v55 = vshrl.u32 %v12503_v3, 16  ;;  %v15786_v26 = vshll.u32 %v12503_v3, 16  ;;  %v12898_v45 = vld [vmem:[%s12375_s14 + $0x30] sm:$0xf] }
  0x66   : > { %v1077_v2 = vshrl.u32 %v12199_v17, 16  ;;  %v1080_v30 = vshll.u32 %v12199_v17, 16  ;;  %v3525_v62 = vor.u32 %v3524_v0, %v3523_v29  ;;  %v3532_v32 = vshrl.u32 %v12200_v56, 16  ;;  %v1251_v0 = vld [vmem:[%s12375_s14 + $0x10] sm:$0x8] }
  0x67   : > { %v3527_v59 = vrot.slane %v15785_v55, 2  ;;  %v3528_v27 = vrot.slane %v15786_v26, 3  ;;  %v1074_v33 = vor.u32 %v1073_v28, %v1072_v23  ;;  %v9828_v37 = vcombine.low %v12836_v13, %v12839_v21  ;;  %v12942_v4 = vld [vmem:[%s12375_s14 + $0x3c] sm:$0xf]  ;;  %v12945_v23 = vld [vmem:[%s12375_s14 + $0x40] sm:$0xf] }
  0x68   : > { %v3526_v50 = vsel %vm15724_vm4, %v3521_v24, %v3525_v62  ;;  %v3534_v36 = vrot.slane %v3532_v32, 2  ;;  %v9987_v53 = vcombine.low %v3709_v10, %v12862_v14  ;;  %v1615_v7 = vsel %vm15730_vm0, %v12763_v34, 0  ;;  %v12887_v24 = vld [vmem:[%s12375_s14 + $0x2c] sm:$0xf]  ;;  %v12952_v28 = vld [vmem:[%s12375_s14 + $0x90] sm:$0xf] }
  0x69   : > { %v4067_v17 = vsel %vm15730_vm0, %v12769_v41, 0  ;;  %v9831_v58 = vcombine.low %v12887_v24, %v12898_v45  ;;  %v12948_v44 = vld [vmem:[%s12375_s14 + $0x8c] sm:$0xf]  ;;  %v12958_v55 = vld [vmem:[%s12375_s14 + $0x48] sm:$0xf] }
  0x6a   : > { %10742 = vmatmul.mubr.msk.bf16.vlgmr.msra.gmra.mrb[0].mxu0 %vm15728_vm1, %v1047_v15  ;;  %v3535_v15 = vshll.u32 %v12200_v56, 16  ;;  %v12906_v56 = vld [vmem:[%s15677_s1 + $0x14] sm:$0xf] }
  0x6b   : > { %10762 = vmatpush3.bf16.msra.mxu0 %v1357_v57  ;;  %10940 = vmatmul.mubr.msk.bf16.vlgmr.msra.gmra.mrb[0].mxu1 %vm15728_vm1, %v3502_v31  ;;  %v1069_v57 = vrot.slane %v15780_v25, 3  ;;  %v3529_v31 = vor.u32 %v3528_v27, %v3527_v59  ;;  %v12920_v25 = vld [vmem:[%s12375_s14 + $0x84] sm:$0xf]  ;;  %v3706_v59 = vld [vmem:[%s12375_s14 + $0x60] sm:$0x8] }
  0x6c   : > { %10745 = vmatprep.mubr.msk.bf16.mxu0 %vm15728_vm1, %v1051_v35  ;;  %10943 = vmatprep.mubr.msk.bf16.mxu1 %vm15728_vm1, %v3506_v42  ;;  %v1079_v35 = vrot.slane %v1077_v2, 2  ;;  %v1082_v42 = vrot.slane %v1080_v30, 3  ;;  %v3537_v39 = vrot.slane %v3535_v15, 3  ;;  %v12962_v26 = vld [vmem:[%s12375_s14 + $0x94] sm:$0xf]  ;;  %v9848_v2 = vcombine.low %v1251_v0, %v12836_v13 }
  0x6d   : > { %10960 = vmatpush3.bf16.msra.mxu1 %v3810_v38  ;;  %12131 = vmatprep.subr.msk.bf16.mxu0 %vm15730_vm0, %v12763_v34  ;;  %v1070_v60 = vor.u32 %v1069_v57, %v1068_v47  ;;  %v3530_v48 = vsel %vm15724_vm4, %v3525_v62, %v3529_v31  ;;  %v12894_v34 = vld [vmem:[%s15677_s1 + $0x14] sm:$0xf]  ;;  %v12901_v47 = vld [vmem:[%s12375_s14 + $0x7c] sm:$0xf]  ;;  %v12923_v57 = vld [vmem:[%s12375_s14 + $0x88] sm:$0xf]  ;;  %v9991_v30 = vcombine.low %v12948_v44, %v12952_v28 }
  0x6e   : > { %12140 = vmatprep.subr.msk.bf16.mxu1 %vm15730_vm0, %v12769_v41  ;;  %v3538_v9 = vor.u32 %v3537_v39, %v3534_v36  ;;  %v12911_v41 = vld [vmem:[%s12375_s14 + $0x80] sm:$0xf]  ;;  %v9990_v63 = vcombine.low %v12920_v25, %v12923_v57  ;;  %v12965_v27 = vld [vmem:[%s12375_s14 + $0x98] sm:$0xf]  ;;  %v10006_v32 = vcombine.low %v3706_v59, %v12842_v22  ;;  %v13001_v39 = vld [vmem:[%s12375_s14 + $0xa4] sm:$0xf] }
  0x6f   : > { %v1071_v3 = vsel %vm15724_vm4, %v1066_v49, %v1070_v60  ;;  %v1075_v38 = vsel %vm15724_vm4, %v1070_v60, %v1074_v33  ;;  %v9988_v49 = vcombine.low %v12872_v20, %v12875_v40  ;;  %v9989_v29 = vcombine.low %v12901_v47, %v12911_v41  ;;  %v12998_v36 = vld [vmem:[%s12375_s14 + $0x58] sm:$0xf]  ;;  %v13030_v59 = vld [vmem:[%s12375_s14 + $0x60] sm:$0xf] }
  0x70   : > { %v3539_v8 = vsel %vm15724_vm4, %v3529_v31, %v3538_v9  ;;  %v9833_v60 = vcombine.low %v12942_v4, %v12945_v23  ;;  %v9992_v15 = vcombine.low %v12962_v26, %v12965_v27  ;;  %v10007_v31 = vcombine.low %v12845_v16, %v3709_v10  ;;  %v13005_v9 = vld [vmem:[%s12375_s14 + $0xa8] sm:$0xf] }
  0x72   : > { %10746 = vmatmul.mubr.msk.bf16.gmra.mrb[4].mxu0 %vm15728_vm1, %v1055_v6  ;;  %v1083_v6 = vor.u32 %v1082_v42, %v1079_v35  ;;  %v12983_v35 = vld [vmem:[%s12375_s14 + $0x50] sm:$0xf]  ;;  %v12987_v42 = vld [vmem:[%s12375_s14 + $0x9c] sm:$0xf] }
  0x73   : > { %10944 = vmatmul.mubr.msk.bf16.gmra.mrb[4].mxu1 %vm15728_vm1, %v3510_v11  ;;  %10749 = vmatprep.mubr.msk.bf16.mxu0 %vm15728_vm1, %v1059_v12  ;;  %v9986_v11 = vcombine.low %v12842_v22, %v12845_v16  ;;  %v1254_v12 = vld [vmem:[%s12375_s14 + $0x1c] sm:$0xf]  ;;  %v3939_v22 = vshrl.u32 %v10006_v32, 16  ;;  %v3942_v16 = vshll.u32 %v10006_v32, 16 }
  0x74   : > { %10947 = vmatprep.mubr.msk.bf16.mxu1 %vm15728_vm1, %v3514_v43  ;;  %v1084_v1 = vsel %vm15724_vm4, %v1074_v33, %v1083_v6  ;;  %v12869_v43 = vld [vmem:[%s12375_s14 + $0x28] sm:$0xf]  ;;  %v9829_v46 = vcombine.low %v1254_v12, %v12857_v52  ;;  %v9849_v33 = vcombine.low %v12839_v21, %v1254_v12  ;;  %v1490_v6 = vshll.u32 %v9848_v2, 16 }
  0x75   : > { %v9830_v5 = vcombine.low %v12866_v18, %v12869_v43  ;;  %v9851_v12 = vcombine.low %v12869_v43, %v12887_v24  ;;  %v3944_v43 = vrot.slane %v3942_v16, 4  ;;  %v10010_v16 = vcombine.low %v12911_v41, %v12920_v25 }
  0x76   : > { %v1495_v13 = vshrl.u32 %v9849_v33, 16  ;;  %v1498_v21 = vshll.u32 %v9849_v33, 16 }
  0x77   : > { %v1516_v32 = vshll.u32 %v9851_v12, 16 }
  0x7a   : > { %10750 = vmatmul.mubr.msk.bf16.gmra.mrb[8].mxu0 %vm15728_vm1, %v1063_v51  ;;  %v12914_v51 = vld [vmem:[%s12375_s14 + $0x34] sm:$0xf] }
  0x7b   : > { %10948 = vmatmul.mubr.msk.bf16.gmra.mrb[8].mxu1 %vm15728_vm1, %v3518_v19  ;;  %10753 = vmatprep.mubr.msk.bf16.mxu0 %vm15728_vm1, %v1067_v61  ;;  %v12917_v19 = vld [vmem:[%s12375_s14 + $0x38] sm:$0xf] }
  0x7c   : > { %10951 = vmatprep.mubr.msk.bf16.mxu1 %vm15728_vm1, %v3522_v54  ;;  %v9832_v61 = vcombine.low %v12914_v51, %v12917_v19  ;;  %v12955_v54 = vld [vmem:[%s12375_s14 + $0x44] sm:$0xf] }
  0x7d   : > { %v9834_v62 = vcombine.low %v12955_v54, %v12958_v55 }
  0x82   : > { %10754 = vmatmul.mubr.msk.bf16.gmra.mrb[12].mxu0 %vm15728_vm1, %v1071_v3  ;;  %v12980_v3 = vld [vmem:[%s12375_s14 + $0x4c] sm:$0xf] }
  0x83   : > { %10952 = vmatmul.mubr.msk.bf16.gmra.mrb[12].mxu1 %vm15728_vm1, %v3526_v50  ;;  %10757 = vmatprep.mubr.msk.bf16.mxu0 %vm15728_vm1, %v1075_v38  ;;  %v12990_v50 = vld [vmem:[%s12375_s14 + $0xa0] sm:$0xf]  ;;  %v12993_v38 = vld [vmem:[%s12375_s14 + $0x54] sm:$0xf]  ;;  %v9835_v10 = vcombine.low %v12980_v3, %v12983_v35 }
  0x84   : > { %10955 = vmatprep.mubr.msk.bf16.mxu1 %vm15728_vm1, %v3530_v48  ;;  %v1487_v48 = vshrl.u32 %v9848_v2, 16 }
  0x8a   : > { %10758 = vmatmul.mubr.msk.bf16.gmra.mrb[16].mxu0 %vm15728_vm1, %v1084_v1  ;;  %v9850_v1 = vcombine.low %v12857_v52, %v12866_v18  ;;  %v9994_v52 = vcombine.low %v13001_v39, %v13005_v9  ;;  %v1489_v18 = vrot.slane %v1487_v48, 3 }
  0x8b   : > { %10956 = vmatmul.mubr.msk.bf16.gmra.mrb[16].mxu1 %vm15728_vm1, %v3539_v8  ;;  %10763 = vmatprep.mubr.msk.bf16.mxu0 %vm15728_vm1, %v9828_v37  ;;  %v3947_v37 = vshrl.u32 %v10007_v31, 16  ;;  %v3950_v8 = vshll.u32 %v10007_v31, 16 }
  0x8c   : > { %10961 = vmatprep.mubr.msk.bf16.mxu1 %vm15728_vm1, %v9986_v11  ;;  %v10008_v11 = vcombine.low %v12862_v14, %v12872_v20  ;;  %v1497_v14 = vrot.slane %v1495_v13, 3  ;;  %v1500_v20 = vrot.slane %v1498_v21, 4  ;;  %v9852_v13 = vcombine.low %v12898_v45, %v12914_v51 }
  0x8d   : > { %v3949_v24 = vrot.slane %v3947_v37, 3 }
  0x8e   : > { %v3959_v0 = vshll.u32 %v10008_v11, 16  ;;  %v1501_v2 = vor.u32 %v1500_v20, %v1497_v14  ;;  %v1522_v25 = vshrl.u32 %v9852_v13, 16 }
  0x92   : > { %10764 = vmatmul.mubr.msk.bf16.vlgmr.msra.gmra.mrb[0].mxu0 %vm15728_vm1, %v9829_v46  ;;  %v9993_v46 = vcombine.low %v12987_v42, %v12990_v50 }
  0x93   : > { %10784 = vmatpush3.bf16.msra.mxu0 %v1615_v7  ;;  %10962 = vmatmul.mubr.msk.bf16.vlgmr.msra.gmra.mrb[0].mxu1 %vm15728_vm1, %v9987_v53  ;;  %v9836_v53 = vcombine.low %v12993_v38, %v12998_v36  ;;  %v1492_v7 = vrot.slane %v1490_v6, 4 }
  0x94   : > { %10767 = vmatprep.mubr.msk.bf16.mxu0 %vm15728_vm1, %v9830_v5  ;;  %10965 = vmatprep.mubr.msk.bf16.mxu1 %vm15728_vm1, %v9988_v49  ;;  %v3941_v5 = vrot.slane %v3939_v22, 3  ;;  %v10009_v49 = vcombine.low %v12875_v40, %v12901_v47  ;;  %v13034_v40 = vld [vmem:[%s12375_s14 + $0xac] sm:$0xf]  ;;  %v13037_v47 = vld [vmem:[%s12375_s14 + $0xb0] sm:$0xf] }
  0x95   : > { %10982 = vmatpush3.bf16.msra.mxu1 %v4067_v17  ;;  %12132 = vmatprep.subr.msk.bf16.mxu0 %vm15730_vm0, %v12894_v34  ;;  %v3952_v17 = vrot.slane %v3950_v8, 4  ;;  %v9995_v37 = vcombine.low %v13034_v40, %v13037_v47  ;;  %v3961_v8 = vrot.slane %v3959_v0, 4 }
  0x96   : > { %12141 = vmatprep.subr.msk.bf16.mxu1 %vm15730_vm0, %v12906_v56  ;;  %v3968_v31 = vshll.u32 %v10009_v49, 16 }
  0x97   : > { %v3953_v33 = vor.u32 %v3952_v17, %v3949_v24  ;;  %v1524_v17 = vrot.slane %v1522_v25, 3 }
  0x9a   : > { %10768 = vmatmul.mubr.msk.bf16.gmra.mrb[4].mxu0 %vm15728_vm1, %v9831_v58  ;;  %v1504_v58 = vshrl.u32 %v9850_v1, 16 }
  0x9b   : > { %10966 = vmatmul.mubr.msk.bf16.gmra.mrb[4].mxu1 %vm15728_vm1, %v9989_v29  ;;  %10771 = vmatprep.mubr.msk.bf16.mxu0 %vm15728_vm1, %v9832_v61  ;;  %v1507_v29 = vshll.u32 %v9850_v1, 16  ;;  %v13025_v61 = vld [vmem:[%s12375_s14 + $0x5c] sm:$0xf]  ;;  %v9853_v1 = vcombine.low %v12917_v19, %v12942_v4  ;;  %v1525_v19 = vshll.u32 %v9852_v13, 16  ;;  %v3974_v4 = vshrl.u32 %v10010_v16, 16 }
  0x9c   : > { %10969 = vmatprep.mubr.msk.bf16.mxu1 %vm15728_vm1, %v9990_v63  ;;  %v3956_v63 = vshrl.u32 %v10008_v11, 16  ;;  %v1506_v48 = vrot.slane %v1504_v58, 3  ;;  %v9837_v21 = vcombine.low %v13025_v61, %v13030_v59  ;;  %v10011_v11 = vcombine.low %v12923_v57, %v12948_v44 }
  0x9d   : > { %v1509_v6 = vrot.slane %v1507_v29, 4  ;;  %v1531_v57 = vshrl.u32 %v9853_v1, 16  ;;  %v1534_v44 = vshll.u32 %v9853_v1, 16  ;;  %v1527_v58 = vrot.slane %v1525_v19, 4 }
  0x9e   : > { %v3958_v22 = vrot.slane %v3956_v63, 3  ;;  %v3976_v29 = vrot.slane %v3974_v4, 3  ;;  %v9856_v1 = vcombine.low %v12983_v35, %v12993_v38 }
  0x9f   : > { %v1510_v41 = vor.u32 %v1509_v6, %v1506_v48  ;;  %v1533_v0 = vrot.slane %v1531_v57, 3 }
  0xa0   : > { %v1561_v25 = vshll.u32 %v9856_v1, 16 }
  0xa1   : > { %v1511_v24 = vsel %vm15723_vm5, %v1501_v2, %v1510_v41 }
  0xa2   : > { %10772 = vmatmul.mubr.msk.bf16.gmra.mrb[8].mxu0 %vm15728_vm1, %v9833_v60  ;;  %v1493_v60 = vor.u32 %v1492_v7, %v1489_v18  ;;  %v9854_v18 = vcombine.low %v12945_v23, %v12955_v54  ;;  %v3962_v7 = vor.u32 %v3961_v8, %v3958_v22  ;;  %v9855_v23 = vcombine.low %v12958_v55, %v12980_v3 }
  0xa3   : > { %10970 = vmatmul.mubr.msk.bf16.gmra.mrb[8].mxu1 %vm15728_vm1, %v9991_v30  ;;  %10775 = vmatprep.mubr.msk.bf16.mxu0 %vm15728_vm1, %v9834_v62  ;;  %v3945_v30 = vor.u32 %v3944_v43, %v3941_v5  ;;  %v1513_v62 = vshrl.u32 %v9851_v12, 16  ;;  %v3983_v5 = vshrl.u32 %v10011_v11, 16  ;;  %v3986_v43 = vshll.u32 %v10011_v11, 16 }
  0xa4   : > { %10973 = vmatprep.mubr.msk.bf16.mxu1 %vm15728_vm1, %v9992_v15  ;;  %v3965_v15 = vshrl.u32 %v10009_v49, 16  ;;  %v1502_v12 = vsel %vm15723_vm5, %v1493_v60, %v1501_v2  ;;  %v10012_v49 = vcombine.low %v12952_v28, %v12962_v26  ;;  %v1536_v60 = vrot.slane %v1534_v44, 4 }
  0xa5   : > { %v1515_v45 = vrot.slane %v1513_v62, 3  ;;  %v3954_v51 = vsel %vm15723_vm5, %v3945_v30, %v3953_v33  ;;  %v10013_v54 = vcombine.low %v12965_v27, %v12987_v42  ;;  %v1922_v30 = vsel %vm15730_vm0, %v12894_v34, 0  ;;  %v13077_v27 = vld [vmem:[%s15677_s1 + $0x1c] sm:$0xf] }
  0xa6   : > { %v3963_v62 = vsel %vm15723_vm5, %v3953_v33, %v3962_v7  ;;  %v3985_v2 = vrot.slane %v3983_v5, 3  ;;  %v4372_v55 = vsel %vm15730_vm0, %v12906_v56, 0  ;;  %v1537_v3 = vor.u32 %v1536_v60, %v1533_v0 }
  0xa7   : > { %v1540_v42 = vshrl.u32 %v9854_v18, 16  ;;  %v1543_v33 = vshll.u32 %v9854_v18, 16  ;;  %v3992_v56 = vshrl.u32 %v10012_v49, 16  ;;  %v3995_v48 = vshll.u32 %v10012_v49, 16 }
  0xa8   : > { %v1549_v6 = vshrl.u32 %v9855_v23, 16  ;;  %v1552_v13 = vshll.u32 %v9855_v23, 16  ;;  %v4001_v22 = vshrl.u32 %v10013_v54, 16  ;;  %v9857_v8 = vcombine.low %v12998_v36, %v13025_v61 }
  0xa9   : > { %v9858_v18 = vcombine.low %v13030_v59, %v13030_v59  ;;  %v12243_v59 = vld [vmem:[%s12375_s14 + $0x14] sm:$0xff]  }
  0xaa   : > { %10776 = vmatmul.mubr.msk.bf16.gmra.mrb[12].mxu0 %vm15728_vm1, %v9835_v10  ;;  %v1518_v10 = vrot.slane %v1516_v32, 4  ;;  %v3988_v32 = vrot.slane %v3986_v43, 4  ;;  %v1551_v35 = vrot.slane %v1549_v6, 3  ;;  %v1554_v38 = vrot.slane %v1552_v13, 4 }
  0xab   : > { %10974 = vmatmul.mubr.msk.bf16.gmra.mrb[12].mxu1 %vm15728_vm1, %v9993_v46  ;;  %10779 = vmatprep.mubr.msk.bf16.mxu0 %vm15728_vm1, %v9836_v53  ;;  %v3967_v46 = vrot.slane %v3965_v15, 3  ;;  %v3970_v53 = vrot.slane %v3968_v31, 4  ;;  %v1528_v15 = vor.u32 %v1527_v58, %v1524_v17  ;;  %v13083_v31 = vld [vmem:[%s15677_s1 + $0x1c] sm:$0xf]  ;;  %v1567_v57 = vshrl.u32 %v9857_v8, 16 }
  0xac   : > { %10977 = vmatprep.mubr.msk.bf16.mxu1 %vm15728_vm1, %v9994_v52  ;;  %v3977_v52 = vshll.u32 %v10010_v16, 16  ;;  %v1519_v14 = vor.u32 %v1518_v10, %v1515_v45  ;;  %v4004_v16 = vshll.u32 %v10013_v54, 16  ;;  %v1545_v10 = vrot.slane %v1543_v33, 4  ;;  %v12246_v33 = vld [vmem:[%s12375_s14 + $0x6c] sm:$0xff]  }
  0xad   : > { %v3971_v20 = vor.u32 %v3970_v53, %v3967_v46  ;;  %v1538_v45 = vsel %vm15723_vm5, %v1528_v15, %v1537_v3  ;;  %v3994_v46 = vrot.slane %v3992_v56, 3  ;;  %v3997_v53 = vrot.slane %v3995_v48, 4 }
  0xae   : > { %v3979_v63 = vrot.slane %v3977_v52, 4  ;;  %v1520_v28 = vsel %vm15723_vm5, %v1510_v41, %v1519_v14  ;;  %v1529_v11 = vsel %vm15723_vm5, %v1519_v14, %v1528_v15  ;;  %v4006_v61 = vrot.slane %v4004_v16, 4 }
  0xaf   : > { %v3972_v26 = vsel %vm15723_vm5, %v3962_v7, %v3971_v20  ;;  %v1558_v41 = vshrl.u32 %v9856_v1, 16  ;;  %v1570_v44 = vshll.u32 %v9857_v8, 16  ;;  %v1563_v43 = vrot.slane %v1561_v25, 4  ;;  %v12250_v25 = vld [vmem:[%s12375_s14 + $0x7c] sm:$0xff]  }
  0xb0   : > { %v3980_v34 = vor.u32 %v3979_v63, %v3976_v29  ;;  %v10016_v17 = vcombine.low %v13037_v47, %v13037_v47  ;;  %v1569_v29 = vrot.slane %v1567_v57, 3 }
  0xb1   : > { %v1560_v5 = vrot.slane %v1558_v41, 3  ;;  %v1572_v63 = vrot.slane %v1570_v44, 4  ;;  %v12249_v41 = vld [vmem:[%s12375_s14 + $0x2c] sm:$0xff]  }
  0xb2   : > { %10780 = vmatmul.mubr.msk.bf16.gmra.mrb[16].mxu0 %vm15728_vm1, %v9837_v21  ;;  %v3989_v21 = vor.u32 %v3988_v32, %v3985_v2  ;;  %v1576_v2 = vshrl.u32 %v9858_v18, 16  ;;  %v1579_v32 = vshll.u32 %v9858_v18, 16  ;;  %v4028_v15 = vshrl.u32 %v10016_v17, 16 }
  0xb3   : > { %10978 = vmatmul.mubr.msk.bf16.gmra.mrb[16].mxu1 %vm15728_vm1, %v9995_v37  ;;  %10785 = vmatprep.mubr.msk.bf16.mxu0 %vm15728_vm1, %v1502_v12  ;;  %v10014_v37 = vcombine.low %v12990_v50, %v13001_v39  ;;  %v3981_v12 = vsel %vm15723_vm5, %v3971_v20, %v3980_v34  ;;  %v10015_v50 = vcombine.low %v13005_v9, %v13034_v40  ;;  %v4003_v39 = vrot.slane %v4001_v22, 3 }
  0xb4   : > { %10983 = vmatprep.mubr.msk.bf16.mxu1 %vm15728_vm1, %v3954_v51  ;;  %v1542_v51 = vrot.slane %v1540_v42, 3  ;;  %v3990_v36 = vsel %vm15723_vm5, %v3980_v34, %v3989_v21  ;;  %v3998_v9 = vor.u32 %v3997_v53, %v3994_v46  ;;  %v1555_v40 = vor.u32 %v1554_v38, %v1551_v35  ;;  %v12244_v34 = vld [vmem:[%s12375_s14 + $0x1c] sm:$0xff]   ;;  %v12247_v53 = vld [vmem:[%s12375_s14 + $0x24] sm:$0xff]   ;;  %v12248_v35 = vld [vmem:[%s12375_s14 + $0x74] sm:$0xff]  }
  0xb5   : > { %v4010_v19 = vshrl.u32 %v10014_v37, 16  ;;  %v4013_v4 = vshll.u32 %v10014_v37, 16  ;;  %v4007_v7 = vor.u32 %v4006_v61, %v4003_v39  ;;  %v4019_v14 = vshrl.u32 %v10015_v50, 16 }
  0xb6   : > { %v1546_v52 = vor.u32 %v1545_v10, %v1542_v51  ;;  %v4022_v20 = vshll.u32 %v10015_v50, 16  ;;  %v3999_v0 = vsel %vm15723_vm5, %v3989_v21, %v3998_v9  ;;  %v1578_v21 = vrot.slane %v1576_v2, 3 }
  0xb7   : > { %v4012_v49 = vrot.slane %v4010_v19, 3  ;;  %v4008_v23 = vsel %vm15723_vm5, %v3998_v9, %v4007_v7  ;;  %v4021_v54 = vrot.slane %v4019_v14, 3  ;;  %v1581_v22 = vrot.slane %v1579_v32, 4 }
  0xb8   : > { %v1547_v58 = vsel %vm15723_vm5, %v1537_v3, %v1546_v52  ;;  %v1556_v60 = vsel %vm15723_vm5, %v1546_v52, %v1555_v40  ;;  %v1810_v3 = vshll.u32 %v12243_v59, 16  ;;  %v4030_v16 = vrot.slane %v4028_v15, 3 }
  0xb9   : > { %v1808_v37 = vshrl.u32 %v12243_v59, 16  ;;  %v4265_v10 = vshll.u32 %v12246_v33, 16  ;;  %v1582_v46 = vor.u32 %v1581_v22, %v1578_v21  ;;  %v1823_v52 = vshll.u32 %v12247_v53, 16 }
  0xba   : > { %10786 = vmatmul.mubr.msk.bf16.vlgmr.msra.gmra.mrb[0].mxu0 %vm15728_vm1, %v1511_v24  ;;  %v4015_v24 = vrot.slane %v4013_v4, 4  ;;  %v1812_v8 = vrot.slane %v1810_v3, 1  ;;  %v1819_v4 = vshrl.u32 %v12244_v34, 16  ;;  %v4273_v57 = vshll.u32 %v12248_v35, 16 }
  0xbb   : > { %10806 = vmatpush3.bf16.msra.mxu0 %v1922_v30  ;;  %10984 = vmatmul.mubr.msk.bf16.vlgmr.msra.gmra.mrb[0].mxu1 %vm15728_vm1, %v3963_v62  ;;  %v4024_v30 = vrot.slane %v4022_v20, 4  ;;  %v12245_v62 = vld [vmem:[%s12375_s14 + $0x64] sm:$0xff]   ;;  %v4267_v61 = vrot.slane %v4265_v10, 1  ;;  %v1827_v18 = vshrl.u32 %v12247_v53, 16  ;;  %v1831_v14 = vshll.u32 %v12249_v41, 16 }
  0xbc   : > { %10789 = vmatprep.mubr.msk.bf16.mxu0 %vm15728_vm1, %v1520_v28  ;;  %10987 = vmatprep.mubr.msk.bf16.mxu1 %vm15728_vm1, %v3972_v26  ;;  %v1564_v28 = vor.u32 %v1563_v43, %v1560_v5  ;;  %v4016_v47 = vor.u32 %v4015_v24, %v4012_v49  ;;  %v1573_v26 = vor.u32 %v1572_v63, %v1569_v29  ;;  %v4260_v56 = vshll.u32 %v12245_v62, 16  ;;  %v12251_v43 = vld [vmem:[%s12375_s14 + $0x34] sm:$0xff]   ;;  %v12253_v63 = vld [vmem:[%s12375_s14 + $0x3c] sm:$0xff]  }
  0xbd   : > { %11004 = vmatpush3.bf16.msra.mxu1 %v4372_v55  ;;  %12133 = vmatprep.subr.msk.bf16.mxu0 %vm15730_vm0, %v13077_v27  ;;  %v4031_v55 = vshll.u32 %v10016_v17, 16  ;;  %v4025_v42 = vor.u32 %v4024_v30, %v4021_v54  ;;  %v1813_v50 = vor.u32 %v1812_v8, %v1808_v37  ;;  %v4277_v20 = vshrl.u32 %v12248_v35, 16  ;;  %v12254_v54 = vld [vmem:[%s12375_s14 + $0x8c] sm:$0xff]  }
  0xbe   : > { %12142 = vmatprep.subr.msk.bf16.mxu1 %vm15730_vm0, %v13083_v31  ;;  %v1565_v48 = vsel %vm15723_vm5, %v1555_v40, %v1564_v28  ;;  %v4017_v6 = vsel %vm15723_vm5, %v4007_v7, %v4016_v47  ;;  %v1574_v13 = vsel %vm15723_vm5, %v1564_v28, %v1573_v26  ;;  %v4262_v51 = vrot.slane %v4260_v56, 1  ;;  %v12257_v8 = vld [vmem:[%s12375_s14 + $0x4c] sm:$0xff]  }
  0xbf   : > { %v4033_v1 = vrot.slane %v4031_v55, 4  ;;  %v1583_v19 = vsel %vm15723_vm5, %v1573_v26, %v1582_v46  ;;  %v4269_v40 = vshrl.u32 %v12246_v33, 16  ;;  %v4281_v5 = vshll.u32 %v12250_v25, 16 }
  0xc0   : > { %v1825_v24 = vrot.slane %v1823_v52, 1  ;;  %v4275_v17 = vrot.slane %v4273_v57, 1  ;;  %v1839_v30 = vshll.u32 %v12251_v43, 16  ;;  %v1835_v28 = vshrl.u32 %v12249_v41, 16 }
  0xc1   : > { %v4034_v38 = vor.u32 %v4033_v1, %v4030_v16  ;;  %v4271_v29 = vor.u32 %v4269_v40, %v4267_v61  ;;  %v2208_v2 = vsel %vm15730_vm0, %v13077_v27, 0  ;;  %v1843_v15 = vshrl.u32 %v12251_v43, 16  ;;  %v13160_v27 = vld [vmem:[%s15677_s1 + $0x18] sm:$0xf] }
  0xc2   : > { %10790 = vmatmul.mubr.msk.bf16.gmra.mrb[4].mxu0 %vm15728_vm1, %v1529_v11  ;;  %v1815_v11 = vshll.u32 %v12244_v34, 16  ;;  %v4279_v59 = vor.u32 %v4277_v20, %v4275_v17  ;;  %v1847_v55 = vshll.u32 %v12253_v63, 16  ;;  %v4297_v33 = vshll.u32 %v12254_v54, 16  ;;  %v12256_v16 = vld [vmem:[%s12375_s14 + $0x94] sm:$0xff]  }
  0xc3   : > { %10988 = vmatmul.mubr.msk.bf16.gmra.mrb[4].mxu1 %vm15728_vm1, %v3981_v12  ;;  %10793 = vmatprep.mubr.msk.bf16.mxu0 %vm15728_vm1, %v1538_v45  ;;  %v4026_v12 = vsel %vm15723_vm5, %v4016_v47, %v4025_v42  ;;  %v4258_v45 = vshrl.u32 %v12245_v62, 16  ;;  %v4035_v44 = vsel %vm15723_vm5, %v4025_v42, %v4034_v38  ;;  %v4285_v47 = vshrl.u32 %v12250_v25, 16  ;;  %v13167_v1 = vld [vmem:[%s15677_s1 + $0x18] sm:$0xf] }
  0xc4   : > { %10991 = vmatprep.mubr.msk.bf16.mxu1 %vm15728_vm1, %v3990_v36  ;;  %v1817_v36 = vrot.slane %v1815_v11, 1  ;;  %v4276_v32 = vsel %vm1806_vm6, %v4271_v29, %v4275_v17  ;;  %v1841_v56 = vrot.slane %v1839_v30, 1  ;;  %v1849_v37 = vrot.slane %v1847_v55, 1 }
  0xc5   : > { %v4263_v39 = vor.u32 %v4262_v51, %v4258_v45  ;;  %v12258_v45 = vld [vmem:[%s12375_s14 + $0x9c] sm:$0xff]   ;;  %v1851_v53 = vshrl.u32 %v12253_v63, 16  ;;  %v4305_v35 = vshll.u32 %v12256_v16, 16  ;;  %v4309_v41 = vshrl.u32 %v12256_v16, 16 }
  0xc6   : > { %v1818_v9 = vsel %vm1806_vm6, %v1813_v50, %v1817_v36  ;;  %v1821_v49 = vor.u32 %v1819_v4, %v1817_v36  ;;  %v4301_v50 = vshrl.u32 %v12254_v54, 16  ;;  %v4313_v25 = vshll.u32 %v12258_v45, 16  ;;  %v12259_v4 = vld [vmem:[%s12375_s14 + $0x54] sm:$0xff]  }
  0xc7   : > { %v4268_v7 = vsel %vm1806_vm6, %v4263_v39, %v4267_v61  ;;  %v1863_v39 = vshll.u32 %v12257_v8, 16  ;;  %v1853_v52 = vor.u32 %v1851_v53, %v1849_v37  ;;  %v4307_v57 = vrot.slane %v4305_v35, 1 }
  0xc8   : > { %v1826_v62 = vsel %vm1806_vm6, %v1821_v49, %v1825_v24  ;;  %v4315_v20 = vrot.slane %v4313_v25, 1  ;;  %v1871_v43 = vshll.u32 %v12259_v4, 16  ;;  %v4317_v17 = vshrl.u32 %v12258_v45, 16  ;;  %v13221_v45 = vld [vmem:[%s12375_s14 + $0x74] sm:$0xff]  }
  0xca   : > { %10794 = vmatmul.mubr.msk.bf16.gmra.mrb[8].mxu0 %vm15728_vm1, %v1547_v58  ;;  %v12252_v58 = vld [vmem:[%s12375_s14 + $0x84] sm:$0xff]   ;;  %v1873_v30 = vrot.slane %v1871_v43, 1  ;;  %v13263_v43 = vld [vmem:[%s12375_s14 + $0x8c] sm:$0xff]  }
  0xcb   : > { %10992 = vmatmul.mubr.msk.bf16.gmra.mrb[8].mxu1 %vm15728_vm1, %v3999_v0  ;;  %10797 = vmatprep.mubr.msk.bf16.mxu0 %vm15728_vm1, %v1556_v60  ;;  %v1829_v0 = vor.u32 %v1827_v18, %v1825_v24  ;;  %v1833_v60 = vrot.slane %v1831_v14, 1  ;;  %v4289_v26 = vshll.u32 %v12252_v58, 16  ;;  %v4293_v42 = vshrl.u32 %v12252_v58, 16 }
  0xcc   : > { %10995 = vmatprep.mubr.msk.bf16.mxu1 %vm15728_vm1, %v4008_v23  ;;  %v4283_v23 = vrot.slane %v4281_v5, 1  ;;  %v1865_v18 = vrot.slane %v1863_v39, 1  ;;  %v4311_v14 = vor.u32 %v4309_v41, %v4307_v57  ;;  %v12262_v5 = vld [vmem:[%s12375_s14 + $0xac] sm:$0xff]   ;;  %v1867_v24 = vshrl.u32 %v12257_v8, 16  ;;  %v13214_v8 = vld [vmem:[%s12375_s14 + $0x24] sm:$0xff]  }
  0xcd   : > { %v1834_v34 = vsel %vm1806_vm6, %v1829_v0, %v1833_v60  ;;  %v4291_v22 = vrot.slane %v4289_v26, 1  ;;  %v1875_v0 = vshrl.u32 %v12259_v4, 16  ;;  %v4329_v54 = vshll.u32 %v12262_v5, 16  ;;  %v12263_v26 = vld [vmem:[%s12375_s14 + $0x64] ss:$0 sps:$4 sm:$0x11]  }
  0xce   : > { %v4284_v3 = vsel %vm1806_vm6, %v4279_v59, %v4283_v23  ;;  %v4287_v21 = vor.u32 %v4285_v47, %v4283_v23  ;;  %v4316_v59 = vsel %vm1806_vm6, %v4311_v14, %v4315_v20  ;;  %v4333_v16 = vshrl.u32 %v12262_v5, 16  ;;  %v13257_v14 = vld [vmem:[%s12375_s14 + $0x3c] sm:$0xff]  }
  0xcf   : > { %v4295_v11 = vor.u32 %v4293_v42, %v4291_v22  ;;  %v2100_v42 = vld [vmem:[%s12375_s14 + $0x1c] sm:$0xc] }
  0xd0   : > { %v4292_v46 = vsel %vm1806_vm6, %v4287_v21, %v4291_v22  ;;  %v1887_v21 = vshll.u32 %v12263_v26, 16 }
  0xd2   : > { %10798 = vmatmul.mubr.msk.bf16.gmra.mrb[12].mxu0 %vm15728_vm1, %v1565_v48  ;;  %v12255_v48 = vld [vmem:[%s12375_s14 + $0x44] sm:$0xff]  }
  0xd3   : > { %10996 = vmatmul.mubr.msk.bf16.gmra.mrb[12].mxu1 %vm15728_vm1, %v4017_v6  ;;  %10801 = vmatprep.mubr.msk.bf16.mxu0 %vm15728_vm1, %v1574_v13  ;;  %v4656_v6 = vsel %vm15730_vm0, %v13083_v31, 0  ;;  %v1837_v13 = vor.u32 %v1835_v28, %v1833_v60  ;;  %v1845_v31 = vor.u32 %v1843_v15, %v1841_v56  ;;  %v1855_v51 = vshll.u32 %v12255_v48, 16  ;;  %v12264_v15 = vld [vmem:[%s12375_s14 + $0xb4] ss:$0 sps:$4 sm:$0x11]  }
  0xd4   : > { %10999 = vmatprep.mubr.msk.bf16.mxu1 %vm15728_vm1, %v4026_v12  ;;  %v4299_v12 = vrot.slane %v4297_v33, 1  ;;  %v1859_v36 = vshrl.u32 %v12255_v48, 16  ;;  %v4319_v28 = vor.u32 %v4317_v17, %v4315_v20  ;;  %v13204_v33 = vld [vmem:[%s12375_s14 + $0x70] sm:$0xf]  ;;  %v2455_v20 = vsel %vm15730_vm0, %v13160_v27, 0 }
  0xd5   : > { %v1842_v10 = vsel %vm1806_vm6, %v1837_v13, %v1841_v56  ;;  %v1850_v38 = vsel %vm1806_vm6, %v1845_v31, %v1849_v37  ;;  %v4549_v56 = vld [vmem:[%s12375_s14 + $0x6c] sm:$0xc]  ;;  %v4337_v31 = vshll.u32 %v12264_v15, 16 }
  0xd6   : > { %v4300_v61 = vsel %vm1806_vm6, %v4295_v11, %v4299_v12 }
  0xd7   : > { %v4339_v53 = vrot.slane %v4337_v31, 1  ;;  %v13334_v31 = vld [vmem:[%s12375_s14 + $0x64] sm:$0xff]  }
  0xda   : > { %10802 = vmatmul.mubr.msk.bf16.gmra.mrb[16].mxu0 %vm15728_vm1, %v1583_v19  ;;  %v1857_v19 = vrot.slane %v1855_v51, 1 }
  0xdb   : > { %11000 = vmatmul.mubr.msk.bf16.gmra.mrb[16].mxu1 %vm15728_vm1, %v4035_v44  ;;  %10807 = vmatprep.mubr.msk.bf16.mxu0 %vm15728_vm1, %v1818_v9  ;;  %v12260_v44 = vld [vmem:[%s12375_s14 + $0xa4] sm:$0xff]   ;;  %v4303_v9 = vor.u32 %v4301_v50, %v4299_v12  ;;  %v13218_v12 = vcombine.low %v4549_v56, %v13204_v33  ;;  %v13323_v56 = vld [vmem:[%s12375_s14 + $0x5c] sm:$0xff]  }
  0xdc   : > { %11005 = vmatprep.mubr.msk.bf16.mxu1 %vm15728_vm1, %v4268_v7  ;;  %v1861_v40 = vor.u32 %v1859_v36, %v1857_v19  ;;  %v12261_v7 = vld [vmem:[%s12375_s14 + $0x5c] sm:$0xff]   ;;  %v1858_v49 = vsel %vm1806_vm6, %v1853_v52, %v1857_v19  ;;  %v4321_v58 = vshll.u32 %v12260_v44, 16  ;;  %v4325_v23 = vshrl.u32 %v12260_v44, 16  ;;  %v13242_v52 = vld [vmem:[%s12375_s14 + $0x34] sm:$0xff]  }
  0xdd   : > { %v4308_v29 = vsel %vm1806_vm6, %v4303_v9, %v4307_v57  ;;  %v1879_v60 = vshll.u32 %v12261_v7, 16  ;;  %v1883_v13 = vshrl.u32 %v12261_v7, 16  ;;  %v4604_v50 = vrot.slane %v13218_v12, 2  ;;  %v13238_v19 = vld [vmem:[%s12375_s14 + $0x7c] sm:$0xff]   ;;  %v13245_v57 = vld [vmem:[%s12375_s14 + $0x84] sm:$0xff]  }
  0xde   : > { %v1866_v63 = vsel %vm1806_vm6, %v1861_v40, %v1865_v18  ;;  %v4323_v47 = vrot.slane %v4321_v58, 1  ;;  %v4605_v36 = vrot.slane %v13221_v45, 2  ;;  %v4607_v9 = vrot.slane %v13238_v19, 2  ;;  %v13271_v58 = vld [vmem:[%s12375_s14 + $0x94] sm:$0xff]  }
  0xdf   : > { %v2161_v40 = vrot.slane %v13242_v52, 2 }
  0xe0   : > { %v4327_v55 = vor.u32 %v4325_v23, %v4323_v47  ;;  %v4606_v4 = vsel %vm15727_vm2, %v4604_v50, %v4605_v36  ;;  %v4608_v5 = vsel %vm15727_vm2, %v4605_v36, %v4607_v9  ;;  %v2173_v50 = vrot.slane %v13334_v31, 2 }
  0xe2   : > { %10808 = vmatmul.mubr.msk.bf16.vlgmr.msra.gmra.mrb[0].mxu0 %vm15728_vm1, %v1826_v62  ;;  %v1869_v62 = vor.u32 %v1867_v24, %v1865_v18  ;;  %v4609_v18 = vrot.slane %v13245_v57, 2 }
  0xe3   : > { %10828 = vmatpush3.bf16.msra.mxu0 %v2208_v2  ;;  %11006 = vmatmul.mubr.msk.bf16.vlgmr.msra.gmra.mrb[0].mxu1 %vm15728_vm1, %v4276_v32  ;;  %v1877_v2 = vor.u32 %v1875_v0, %v1873_v30  ;;  %v1881_v32 = vrot.slane %v1879_v60, 1  ;;  %v13286_v0 = vld [vmem:[%s15677_s1 + $0x20] sm:$0xf] }
  0xe4   : > { %10811 = vmatprep.mubr.msk.bf16.mxu0 %vm15728_vm1, %v1834_v34  ;;  %11009 = vmatprep.mubr.msk.bf16.mxu1 %vm15728_vm1, %v4284_v3  ;;  %v4331_v34 = vrot.slane %v4329_v54, 1  ;;  %v13200_v3 = vld [vmem:[%s12375_s14 + $0x20] sm:$0xf]  ;;  %v1874_v48 = vsel %vm1806_vm6, %v1869_v62, %v1873_v30  ;;  %v4610_v17 = vsel %vm15727_vm2, %v4607_v9, %v4609_v18  ;;  %v13299_v54 = vld [vmem:[%s12375_s14 + $0x4c] sm:$0xff]  }
  0xe5   : > { %11026 = vmatpush3.bf16.msra.mxu1 %v4656_v6  ;;  %12134 = vmatprep.subr.msk.bf16.mxu0 %vm15730_vm0, %v13160_v27  ;;  %v4324_v6 = vsel %vm1806_vm6, %v4319_v28, %v4323_v47  ;;  %v1882_v22 = vsel %vm1806_vm6, %v1877_v2, %v1881_v32  ;;  %v13211_v37 = vcombine.low %v2100_v42, %v13200_v3  ;;  %v13279_v27 = vld [vmem:[%s15677_s1 + $0x20] sm:$0xf]  ;;  %v13307_v47 = vld [vmem:[%s12375_s14 + $0x54] sm:$0xff]   ;;  %v13311_v2 = vld [vmem:[%s12375_s14 + $0xa4] sm:$0xff]  }
  0xe6   : > { %12143 = vmatprep.subr.msk.bf16.mxu1 %vm15730_vm0, %v13167_v1  ;;  %v4332_v11 = vsel %vm1806_vm6, %v4327_v55, %v4331_v34  ;;  %v1885_v51 = vor.u32 %v1883_v13, %v1881_v32  ;;  %v13304_v28 = vld [vmem:[%s12375_s14 + $0x9c] sm:$0xff]   ;;  %v2167_v32 = vrot.slane %v13299_v54, 2  ;;  %v2169_v55 = vrot.slane %v13307_v47, 2  ;;  %v13355_v9 = vld [vmem:[%s12375_s14 + $0x6c] ss:$0 sps:$4 sm:$0x33]  }
  0xe7   : > { %v2156_v35 = vrot.slane %v13211_v37, 2  ;;  %v4615_v15 = vrot.slane %v13304_v28, 2  ;;  %v4617_v42 = vrot.slane %v13311_v2, 2 }
  0xea   : > { %10812 = vmatmul.mubr.msk.bf16.gmra.mrb[4].mxu0 %vm15728_vm1, %v1842_v10  ;;  %v1889_v10 = vrot.slane %v1887_v21, 1 }
  0xeb   : > { %11010 = vmatmul.mubr.msk.bf16.gmra.mrb[4].mxu1 %vm15728_vm1, %v4292_v46  ;;  %10815 = vmatprep.mubr.msk.bf16.mxu0 %vm15728_vm1, %v1850_v38  ;;  %v4335_v46 = vor.u32 %v4333_v16, %v4331_v34  ;;  %v2157_v38 = vrot.slane %v13214_v8, 2  ;;  %v2077_v34 = vld [vmem:[%s12375_s14 + $0x1c] sm:$0xe]  ;;  %v13331_v16 = vld [vmem:[%s12375_s14 + $0xac] sm:$0xff]  }
  0xec   : > { %11013 = vmatprep.mubr.msk.bf16.mxu1 %vm15728_vm1, %v4300_v61  ;;  %v1890_v39 = vsel %vm1806_vm6, %v1885_v51, %v1889_v10  ;;  %v13233_v61 = vld [vmem:[%s12375_s14 + $0x2c] sm:$0xff]   ;;  %v9914_v13 = vcombine.low %v2077_v34, %v13200_v3  ;;  %v4618_v51 = vsel %vm15727_vm2, %v4615_v15, %v4617_v42  ;;  %v4795_v34 = vshll.u32 %v13238_v19, 16 }
  0xed   : > { %v4340_v41 = vsel %vm1806_vm6, %v4335_v46, %v4339_v53  ;;  %v2158_v25 = vsel %vm15727_vm2, %v2156_v35, %v2157_v38  ;;  %v2159_v44 = vrot.slane %v13233_v61, 2  ;;  %v2171_v46 = vrot.slane %v13323_v56, 2 }
  0xee   : > { %v2327_v3 = vshrl.u32 %v9914_v13, 16  ;;  %v2330_v53 = vshll.u32 %v9914_v13, 16  ;;  %v2335_v35 = vshrl.u32 %v13214_v8, 16 }
  0xef   : > { %v2160_v7 = vsel %vm15727_vm2, %v2157_v38, %v2159_v44  ;;  %v2162_v24 = vsel %vm15727_vm2, %v2159_v44, %v2161_v40  ;;  %v2338_v38 = vshll.u32 %v13214_v8, 16  ;;  %v2172_v44 = vsel %vm15727_vm2, %v2169_v55, %v2171_v46 }
  0xf2   : > { %10816 = vmatmul.mubr.msk.bf16.gmra.mrb[8].mxu0 %vm15728_vm1, %v1858_v49  ;;  %v13266_v49 = vld [vmem:[%s12375_s14 + $0x44] sm:$0xff]  }
  0xf3   : > { %11014 = vmatmul.mubr.msk.bf16.gmra.mrb[8].mxu1 %vm15728_vm1, %v4308_v29  ;;  %10819 = vmatprep.mubr.msk.bf16.mxu0 %vm15728_vm1, %v1866_v63  ;;  %v4903_v29 = vsel %vm15730_vm0, %v13167_v1, 0  ;;  %v2163_v63 = vrot.slane %v13257_v14, 2  ;;  %v4611_v1 = vrot.slane %v13263_v43, 2  ;;  %v2165_v60 = vrot.slane %v13266_v49, 2 }
  0xf4   : > { %11017 = vmatprep.mubr.msk.bf16.mxu1 %vm15728_vm1, %v4316_v59  ;;  %v4613_v59 = vrot.slane %v13271_v58, 2 }
  0xf5   : > { %v2164_v23 = vsel %vm15727_vm2, %v2161_v40, %v2163_v63  ;;  %v4612_v30 = vsel %vm15727_vm2, %v4609_v18, %v4611_v1  ;;  %v2166_v62 = vsel %vm15727_vm2, %v2163_v63, %v2165_v60  ;;  %v13358_v40 = vld [vmem:[%s12375_s14 + $0xbc] ss:$0 sps:$4 sm:$0x33]   ;;  %v2329_v18 = vrot.slane %v2327_v3, 1 }
  0xf6   : > { %v4614_v26 = vsel %vm15727_vm2, %v4611_v1, %v4613_v59  ;;  %v4616_v21 = vsel %vm15727_vm2, %v4613_v59, %v4615_v15 }
  0xfa   : > { %10820 = vmatmul.mubr.msk.bf16.gmra.mrb[12].mxu0 %vm15728_vm1, %v1874_v48  ;;  %v4527_v48 = vld [vmem:[%s12375_s14 + $0x6c] sm:$0xe] }
  0xfb   : > { %11018 = vmatmul.mubr.msk.bf16.gmra.mrb[12].mxu1 %vm15728_vm1, %v4324_v6  ;;  %10823 = vmatprep.mubr.msk.bf16.mxu0 %vm15728_vm1, %v1882_v22  ;;  %v2168_v6 = vsel %vm15727_vm2, %v2165_v60, %v2167_v32  ;;  %v2170_v22 = vsel %vm15727_vm2, %v2167_v32, %v2169_v55  ;;  %v10072_v10 = vcombine.low %v4527_v48, %v13204_v33  ;;  %v4619_v33 = vrot.slane %v13331_v16, 2 }
  0xfc   : > { %11021 = vmatprep.mubr.msk.bf16.mxu1 %vm15728_vm1, %v4332_v11  ;;  %v13337_v11 = vld [vmem:[%s12375_s14 + $0xb4] sm:$0xff]   ;;  %v4792_v55 = vshrl.u32 %v13238_v19, 16  ;;  %v2356_v48 = vshll.u32 %v13242_v52, 16 }
  0xfd   : > { %v4621_v36 = vrot.slane %v13337_v11, 2 }
 0x102   : > { %10824 = vmatmul.mubr.msk.bf16.gmra.mrb[16].mxu0 %vm15728_vm1, %v1890_v39  ;;  %v4775_v39 = vshrl.u32 %v10072_v10, 16 }
 0x103   : > { %11022 = vmatmul.mubr.msk.bf16.gmra.mrb[16].mxu1 %vm15728_vm1, %v4340_v41  ;;  %10829 = vmatprep.mubr.msk.bf16.mxu0 %vm15728_vm1, %v2158_v25  ;;  %v4778_v41 = vshll.u32 %v10072_v10, 16  ;;  %v4783_v25 = vshrl.u32 %v13221_v45, 16 }
 0x104   : > { %11027 = vmatprep.mubr.msk.bf16.mxu1 %vm15728_vm1, %v4606_v4  ;;  %v4786_v4 = vshll.u32 %v13221_v45, 16  ;;  %v4777_v63 = vrot.slane %v4775_v39, 1  ;;  %v4797_v39 = vrot.slane %v4795_v34, 2 }
 0x105   : > { %v4780_v1 = vrot.slane %v4778_v41, 2  ;;  %v4785_v60 = vrot.slane %v4783_v25, 1 }
 0x106   : > { %v4788_v59 = vrot.slane %v4786_v4, 2 }
 0x108   : > { %v4789_v13 = vor.u32 %v4788_v59, %v4785_v60 }
 0x10a   : > { %10830 = vmatmul.mubr.msk.bf16.vlgmr.msra.gmra.mrb[0].mxu0 %vm15728_vm1, %v2160_v7  ;;  %v2332_v7 = vrot.slane %v2330_v53, 2 }
 0x10b   : > { %10850 = vmatpush3.bf16.msra.mxu0 %v2455_v20  ;;  %11028 = vmatmul.mubr.msk.bf16.vlgmr.msra.gmra.mrb[0].mxu1 %vm15728_vm1, %v4608_v5  ;;  %v2337_v20 = vrot.slane %v2335_v35, 1  ;;  %v2340_v5 = vrot.slane %v2338_v38, 2 }
 0x10c   : > { %10833 = vmatprep.mubr.msk.bf16.mxu0 %vm15728_vm1, %v2162_v24  ;;  %11031 = vmatprep.mubr.msk.bf16.mxu1 %vm15728_vm1, %v4610_v17  ;;  %v4620_v24 = vsel %vm15727_vm2, %v4617_v42, %v4619_v33  ;;  %v2174_v17 = vsel %vm15727_vm2, %v2171_v46, %v2173_v50  ;;  %v2333_v32 = vor.u32 %v2332_v7, %v2329_v18  ;;  %v2353_v42 = vshrl.u32 %v13242_v52, 16 }
 0x10d   : > { %11048 = vmatpush3.bf16.msra.mxu1 %v4903_v29  ;;  %12135 = vmatprep.subr.msk.bf16.mxu0 %vm15730_vm0, %v13279_v27  ;;  %v4622_v29 = vsel %vm15727_vm2, %v4619_v33, %v4621_v36  ;;  %v2341_v15 = vor.u32 %v2340_v5, %v2337_v20  ;;  %v4794_v33 = vrot.slane %v4792_v55, 1  ;;  %v2362_v20 = vshrl.u32 %v13257_v14, 16 }
 0x10e   : > { %12144 = vmatprep.subr.msk.bf16.mxu1 %vm15730_vm0, %v13286_v0  ;;  %v2355_v41 = vrot.slane %v2353_v42, 1  ;;  %v2365_v5 = vshll.u32 %v13257_v14, 16 }
 0x10f   : > { %v2342_v53 = vsel %vm15725_vm3, %v2333_v32, %v2341_v15 }
 0x112   : > { %10834 = vmatmul.mubr.msk.bf16.gmra.mrb[4].mxu0 %vm15728_vm1, %v2164_v23  ;;  %v2344_v23 = vshrl.u32 %v13233_v61, 16 }
 0x113   : > { %11032 = vmatmul.mubr.msk.bf16.gmra.mrb[4].mxu1 %vm15728_vm1, %v4612_v30  ;;  %10837 = vmatprep.mubr.msk.bf16.mxu0 %vm15728_vm1, %v2166_v62  ;;  %v2347_v30 = vshll.u32 %v13233_v61, 16  ;;  %v2175_v62 = vrot.slane %v13355_v9, 2 }
 0x114   : > { %11035 = vmatprep.mubr.msk.bf16.mxu1 %vm15728_vm1, %v4614_v26  ;;  %v4623_v26 = vrot.slane %v13358_v40, 2 }
 0x115   : > { %v2349_v10 = vrot.slane %v2347_v30, 2  ;;  %v2176_v46 = vsel %vm15727_vm2, %v2173_v50, %v2175_v62  ;;  %v15708_v62 = vshrl.u32 %v13271_v58, 16  ;;  %v2589_v45 = vrot.slane %v2347_v30, 3 }
 0x116   : > { %v4624_v3 = vsel %vm15727_vm2, %v4621_v36, %v4623_v26  ;;  %v15707_v26 = vshll.u32 %v13271_v58, 16 }
 0x11a   : > { %10838 = vmatmul.mubr.msk.bf16.gmra.mrb[8].mxu0 %vm15728_vm1, %v2168_v6  ;;  %v4781_v6 = vor.u32 %v4780_v1, %v4777_v63  ;;  %v15706_v63 = vshll.u32 %v13266_v49, 16  ;;  %v4798_v1 = vor.u32 %v4797_v39, %v4794_v33 }
 0x11b   : > { %11036 = vmatmul.mubr.msk.bf16.gmra.mrb[8].mxu1 %vm15728_vm1, %v4616_v21  ;;  %10841 = vmatprep.mubr.msk.bf16.mxu0 %vm15728_vm1, %v2170_v22  ;;  %v4801_v21 = vshrl.u32 %v13245_v57, 16  ;;  %v4804_v22 = vshll.u32 %v13245_v57, 16  ;;  %v2596_v57 = vrot.slane %v2362_v20, 2 }
 0x11c   : > { %11039 = vmatprep.mubr.msk.bf16.mxu1 %vm15728_vm1, %v4618_v51  ;;  %v2346_v51 = vrot.slane %v2344_v23, 1  ;;  %v4790_v18 = vsel %vm15725_vm3, %v4781_v6, %v4789_v13  ;;  %v2364_v6 = vrot.slane %v2362_v20, 1  ;;  %v4799_v33 = vsel %vm15725_vm3, %v4789_v13, %v4798_v1 }
 0x11d   : > { %v4803_v50 = vrot.slane %v4801_v21, 1  ;;  %v4806_v36 = vrot.slane %v4804_v22, 2  ;;  %v5039_v30 = vrot.slane %v4801_v21, 2  ;;  %v2597_v21 = vrot.slane %v2365_v5, 3 }
 0x11e   : > { %v2350_v7 = vor.u32 %v2349_v10, %v2346_v51  ;;  %v2367_v51 = vrot.slane %v2365_v5, 2  ;;  %v15789_v20 = vshrl.u32 %v13271_v58, 16  ;;  %v15790_v5 = vshll.u32 %v13271_v58, 16 }
 0x11f   : > { %v4807_v59 = vor.u32 %v4806_v36, %v4803_v50  ;;  %v4824_v50 = vrot.slane %v15707_v26, 2  ;;  %v15715_v36 = vshll.u32 %v13299_v54, 16 }
 0x120   : > { %v2351_v32 = vsel %vm15725_vm3, %v2341_v15, %v2350_v7  ;;  %v2660_v15 = vsel %vm15730_vm0, %v13279_v27, 0  ;;  %v5107_v27 = vsel %vm15730_vm0, %v13286_v0, 0  ;;  %v2368_v13 = vor.u32 %v2367_v51, %v2364_v6 }
 0x121   : > { %v15714_v0 = vshll.u32 %v13307_v47, 16  ;;  %v2385_v6 = vrot.slane %v15715_v36, 2  ;;  %v15713_v51 = vshrl.u32 %v13311_v2, 16  ;;  %v5047_v14 = vrot.slane %v15789_v20, 2 }
 0x122   : > { %10842 = vmatmul.mubr.msk.bf16.gmra.mrb[12].mxu0 %vm15728_vm1, %v2172_v44  ;;  %v2358_v44 = vrot.slane %v2356_v48, 2 }
 0x123   : > { %11040 = vmatmul.mubr.msk.bf16.gmra.mrb[12].mxu1 %vm15728_vm1, %v4620_v24  ;;  %10845 = vmatprep.mubr.msk.bf16.mxu0 %vm15728_vm1, %v2174_v17  ;;  %v4810_v24 = vshrl.u32 %v13263_v43, 16  ;;  %v4813_v17 = vshll.u32 %v13263_v43, 16  ;;  %v2598_v43 = vor.u32 %v2597_v21, %v2596_v57 }
 0x124   : > { %11043 = vmatprep.mubr.msk.bf16.mxu1 %vm15728_vm1, %v4622_v29  ;;  %v15717_v29 = vshrl.u32 %v13266_v49, 16  ;;  %v2359_v60 = vor.u32 %v2358_v44, %v2355_v41  ;;  %v15716_v41 = vshrl.u32 %v13299_v54, 16  ;;  %v4808_v44 = vsel %vm15725_vm3, %v4798_v1, %v4807_v59 }
 0x125   : > { %v4812_v10 = vrot.slane %v4810_v24, 1  ;;  %v15711_v1 = vshrl.u32 %v13304_v28, 16 }
 0x126   : > { %v2360_v39 = vsel %vm15725_vm3, %v2350_v7, %v2359_v60  ;;  %v2382_v26 = vrot.slane %v15716_v41, 1 }
 0x12a   : > { %10846 = vmatmul.mubr.msk.bf16.gmra.mrb[16].mxu0 %vm15728_vm1, %v2176_v46  ;;  %v4815_v46 = vrot.slane %v4813_v17, 2 }
 0x12b   : > { %11044 = vmatmul.mubr.msk.bf16.gmra.mrb[16].mxu1 %vm15728_vm1, %v4624_v3  ;;  %10851 = vmatprep.mubr.msk.bf16.mxu0 %vm15728_vm1, %v2342_v53  ;;  %v2373_v3 = vrot.slane %v15717_v29, 1  ;;  %v2376_v53 = vrot.slane %v15706_v63, 2 }
 0x12c   : > { %11049 = vmatprep.mubr.msk.bf16.mxu1 %vm15728_vm1, %v4790_v18  ;;  %v4821_v18 = vrot.slane %v15708_v62, 1  ;;  %v4816_v7 = vor.u32 %v4815_v46, %v4812_v10  ;;  %v15710_v62 = vshrl.u32 %v13307_v47, 16  ;;  %v15712_v10 = vshll.u32 %v13311_v2, 16 }
 0x12d   : > { %v2377_v63 = vor.u32 %v2376_v53, %v2373_v3  ;;  %v2369_v46 = vsel %vm15725_vm3, %v2359_v60, %v2368_v13  ;;  %v4830_v53 = vrot.slane %v15711_v1, 1  ;;  %v4839_v60 = vrot.slane %v15713_v51, 1 }
 0x12e   : > { %v4817_v3 = vsel %vm15725_vm3, %v4807_v59, %v4816_v7  ;;  %v4842_v59 = vrot.slane %v15712_v10, 2  ;;  %v15718_v1 = vshll.u32 %v13331_v16, 16 }
 0x130   : > { %v4843_v36 = vor.u32 %v4842_v59, %v4839_v60  ;;  %v4851_v29 = vrot.slane %v15718_v1, 2 }
 0x132   : > { %10852 = vmatmul.mubr.msk.bf16.vlgmr.msra.gmra.mrb[0].mxu0 %vm15728_vm1, %v2351_v32  ;;  %v15709_v32 = vshll.u32 %v13304_v28, 16 }
 0x133   : > { %10872 = vmatpush3.bf16.msra.mxu0 %v2660_v15  ;;  %11050 = vmatmul.mubr.msk.bf16.vlgmr.msra.gmra.mrb[0].mxu1 %vm15728_vm1, %v4799_v33  ;;  %v4825_v15 = vor.u32 %v4824_v50, %v4821_v18  ;;  %v2378_v33 = vsel %vm15725_vm3, %v2368_v13, %v2377_v63  ;;  %v2394_v18 = vrot.slane %v15714_v0, 2  ;;  %v2398_v13 = vshrl.u32 %v13323_v56, 16 }
 0x134   : > { %10855 = vmatprep.mubr.msk.bf16.mxu0 %vm15728_vm1, %v2360_v39  ;;  %11053 = vmatprep.mubr.msk.bf16.mxu1 %vm15728_vm1, %v4808_v44  ;;  %v4833_v39 = vrot.slane %v15709_v32, 2  ;;  %v2391_v44 = vrot.slane %v15710_v62, 1  ;;  %v2401_v32 = vshll.u32 %v13323_v56, 16  ;;  %v4846_v62 = vshrl.u32 %v13331_v16, 16 }
 0x135   : > { %11070 = vmatpush3.bf16.msra.mxu1 %v5107_v27  ;;  %v4826_v50 = vsel %vm15725_vm3, %v4816_v7, %v4825_v15  ;;  %v2386_v27 = vor.u32 %v2385_v6, %v2382_v26  ;;  %v15719_v26 = vshrl.u32 %v13334_v31, 16  ;;  %v15720_v7 = vshll.u32 %v13334_v31, 16 }
 0x136   : > { %v15721_v6 = vshrl.u32 %v13337_v11, 16  ;;  %v4834_v10 = vor.u32 %v4833_v39, %v4830_v53  ;;  %v2395_v51 = vor.u32 %v2394_v18, %v2391_v44  ;;  %v4848_v41 = vrot.slane %v4846_v62, 1 }
 0x137   : > { %v2387_v0 = vsel %vm15725_vm3, %v2377_v63, %v2386_v27  ;;  %v2412_v53 = vrot.slane %v15720_v7, 2  ;;  %v2419_v7 = vshll.u32 %v13355_v9, 16  ;;  %v15802_v56 = vshrl.u32 %v13337_v11, 16 }
 0x138   : > { %v4857_v63 = vrot.slane %v15721_v6, 1  ;;  %v4835_v44 = vsel %vm15725_vm3, %v4825_v15, %v4834_v10  ;;  %v2396_v18 = vsel %vm15725_vm3, %v2386_v27, %v2395_v51  ;;  %v4844_v60 = vsel %vm15725_vm3, %v4834_v10, %v4843_v36 }
 0x139   : > { %v4852_v1 = vor.u32 %v4851_v29, %v4848_v41  ;;  %v4864_v15 = vshrl.u32 %v13358_v40, 16  ;;  %v4867_v27 = vshll.u32 %v13358_v40, 16  ;;  %v2580_v29 = vshll.u32 %v13211_v37, 16 }
 0x13a   : > { %10856 = vmatmul.mubr.msk.bf16.gmra.mrb[4].mxu0 %vm15728_vm1, %v2369_v46  ;;  %v15722_v46 = vshll.u32 %v13337_v11, 16  ;;  %v5024_v41 = vshrl.u32 %v13218_v12, 16 }
 0x13b   : > { %11054 = vmatmul.mubr.msk.bf16.gmra.mrb[4].mxu1 %vm15728_vm1, %v4817_v3  ;;  %10859 = vmatprep.mubr.msk.bf16.mxu0 %vm15728_vm1, %v2378_v33  ;;  %v2400_v3 = vrot.slane %v2398_v13, 1  ;;  %v2403_v33 = vrot.slane %v2401_v32, 2 }
 0x13c   : > { %11057 = vmatprep.mubr.msk.bf16.mxu1 %vm15728_vm1, %v4826_v50  ;;  %v2409_v50 = vrot.slane %v15719_v26, 1  ;;  %v4860_v39 = vrot.slane %v15722_v46, 2  ;;  %v2416_v26 = vshrl.u32 %v13355_v9, 16  ;;  %v5027_v9 = vshll.u32 %v13218_v12, 16 }
 0x13d   : > { %v2404_v59 = vor.u32 %v2403_v33, %v2400_v3  ;;  %v4853_v3 = vsel %vm15725_vm3, %v4843_v36, %v4852_v1  ;;  %v2585_v12 = vrot.slane %v2338_v38, 3  ;;  %v5031_v36 = vrot.slane %v4783_v25, 2 }
 0x13e   : > { %v2413_v6 = vor.u32 %v2412_v53, %v2409_v50  ;;  %v4861_v46 = vor.u32 %v4860_v39, %v4857_v63  ;;  %v2418_v33 = vrot.slane %v2416_v26, 1  ;;  %v2421_v50 = vrot.slane %v2419_v7, 2 }
 0x13f   : > { %v2405_v10 = vsel %vm15725_vm3, %v2395_v51, %v2404_v59  ;;  %v4866_v63 = vrot.slane %v4864_v15, 1  ;;  %v4869_v39 = vrot.slane %v4867_v27, 2  ;;  %v5029_v51 = vrot.slane %v5027_v9, 3 }
 0x140   : > { %v2414_v53 = vsel %vm15725_vm3, %v2404_v59, %v2413_v6  ;;  %v4862_v40 = vsel %vm15725_vm3, %v4852_v1, %v4861_v46  ;;  %v5032_v26 = vrot.slane %v4786_v4, 3  ;;  %v2422_v1 = vor.u32 %v2421_v50, %v2418_v33 }
 0x141   : > { %v2588_v25 = vrot.slane %v2344_v23, 2  ;;  %v5035_v15 = vrot.slane %v4792_v55, 2  ;;  %v5036_v27 = vrot.slane %v4795_v34, 3  ;;  %v2593_v23 = vrot.slane %v2356_v48, 3 }
 0x142   : > { %10860 = vmatmul.mubr.msk.bf16.gmra.mrb[8].mxu0 %vm15728_vm1, %v2387_v0  ;;  %v2577_v0 = vshrl.u32 %v13211_v37, 16  ;;  %v2584_v37 = vrot.slane %v2335_v35, 2  ;;  %v4870_v35 = vor.u32 %v4869_v39, %v4866_v63  ;;  %v5033_v59 = vor.u32 %v5032_v26, %v5031_v36 }
 0x143   : > { %11058 = vmatmul.mubr.msk.bf16.gmra.mrb[8].mxu1 %vm15728_vm1, %v4835_v44  ;;  %10863 = vmatprep.mubr.msk.bf16.mxu0 %vm15728_vm1, %v2396_v18  ;;  %v2582_v18 = vrot.slane %v2580_v29, 3  ;;  %v2423_v4 = vsel %vm15725_vm3, %v2413_v6, %v2422_v1  ;;  %v5040_v55 = vrot.slane %v4804_v22, 3  ;;  %v2590_v19 = vor.u32 %v2589_v45, %v2588_v25 }
 0x144   : > { %11061 = vmatprep.mubr.msk.bf16.mxu1 %vm15728_vm1, %v4844_v60  ;;  %v2579_v44 = vrot.slane %v2577_v0, 2  ;;  %v5026_v60 = vrot.slane %v5024_v41, 2  ;;  %v2586_v38 = vor.u32 %v2585_v12, %v2584_v37  ;;  %v4871_v0 = vsel %vm15725_vm3, %v4861_v46, %v4870_v35 }
 0x145   : > { %v2592_v41 = vrot.slane %v2353_v42, 2  ;;  %v5037_v34 = vor.u32 %v5036_v27, %v5035_v15  ;;  %v5041_v42 = vor.u32 %v5040_v55, %v5039_v30  ;;  %v5043_v22 = vrot.slane %v4810_v24, 2 }
 0x146   : > { %v2583_v8 = vor.u32 %v2582_v18, %v2579_v44  ;;  %v5030_v7 = vor.u32 %v5029_v51, %v5026_v60  ;;  %v2591_v48 = vsel %vm15724_vm4, %v2586_v38, %v2590_v19  ;;  %v5044_v9 = vrot.slane %v4813_v17, 3 }
 0x147   : > { %v2594_v52 = vor.u32 %v2593_v23, %v2592_v41  ;;  %v5038_v6 = vsel %vm15724_vm4, %v5033_v59, %v5037_v34  ;;  %v15788_v33 = vshll.u32 %v13266_v49, 16  ;;  %v15791_v63 = vshrl.u32 %v13299_v54, 16  ;;  %v12289_v23 = vld [vmem:[%s12375_s14 + $0x6c] ss:$0 sps:$4 sm:$0x77]  }
 0x148   : > { %v2587_v29 = vsel %vm15724_vm4, %v2583_v8, %v2586_v38  ;;  %v5034_v61 = vsel %vm15724_vm4, %v5030_v7, %v5033_v59  ;;  %v5045_v24 = vor.u32 %v5044_v9, %v5043_v22  ;;  %v15792_v44 = vshll.u32 %v13299_v54, 16 }
 0x149   : > { %v2595_v46 = vsel %vm15724_vm4, %v2590_v19, %v2594_v52  ;;  %v2601_v50 = vrot.slane %v15788_v33, 3  ;;  %v2604_v39 = vrot.slane %v15791_v63, 2  ;;  %v2599_v58 = vsel %vm15724_vm4, %v2594_v52, %v2598_v43  ;;  %v10097_v63 = vld [vmem:[%s15680_s4 + $0x4] sm:$0xf] }
 0x14a   : > { %10864 = vmatmul.mubr.msk.bf16.gmra.mrb[12].mxu0 %vm15728_vm1, %v2405_v10  ;;  %v15787_v10 = vshrl.u32 %v13266_v49, 16  ;;  %v2605_v18 = vrot.slane %v15792_v44, 3  ;;  %v15793_v37 = vshrl.u32 %v13304_v28, 16  ;;  %v15794_v60 = vshll.u32 %v13304_v28, 16  ;;  %12145 = vmatprep.subr.msk.bf16.mxu0 %vm15730_vm0, %v10097_v63  ;;  %v10197_v44 = vld [vmem:[%s15680_s4 + $0x4] sm:$0xf] }
 0x14b   : > { %11062 = vmatmul.mubr.msk.bf16.gmra.mrb[12].mxu1 %vm15728_vm1, %v4853_v3  ;;  %10867 = vmatprep.mubr.msk.bf16.mxu0 %vm15728_vm1, %v2414_v53  ;;  %v5042_v53 = vsel %vm15724_vm4, %v5037_v34, %v5041_v42  ;;  %v5046_v36 = vsel %vm15724_vm4, %v5041_v42, %v5045_v24  ;;  %v15795_v1 = vshrl.u32 %v13307_v47, 16  ;;  %v15796_v8 = vshll.u32 %v13307_v47, 16 }
 0x14c   : > { %11065 = vmatprep.mubr.msk.bf16.mxu1 %vm15728_vm1, %v4862_v40  ;;  %v2600_v3 = vrot.slane %v15787_v10, 2  ;;  %v5048_v40 = vrot.slane %v15790_v5, 3  ;;  %v5051_v12 = vrot.slane %v15793_v37, 2  ;;  %v5052_v51 = vrot.slane %v15794_v60, 3  ;;  %12154 = vmatprep.subr.msk.bf16.mxu1 %vm15730_vm0, %v10197_v44 }
 0x14d   : > { %v2608_v35 = vrot.slane %v15795_v1, 2  ;;  %v2609_v38 = vrot.slane %v15796_v8, 3  ;;  %v15797_v7 = vshrl.u32 %v13311_v2, 16  ;;  %v15798_v25 = vshll.u32 %v13311_v2, 16 }
 0x14e   : > { %v2602_v49 = vor.u32 %v2601_v50, %v2600_v3  ;;  %v5049_v17 = vor.u32 %v5048_v40, %v5047_v14  ;;  %v2606_v45 = vor.u32 %v2605_v18, %v2604_v39  ;;  %v2612_v2 = vrot.slane %v2398_v13, 2 }
 0x14f   : > { %v5055_v59 = vrot.slane %v15797_v7, 2  ;;  %v5056_v28 = vrot.slane %v15798_v25, 3  ;;  %v2610_v47 = vor.u32 %v2609_v38, %v2608_v35  ;;  %v5059_v41 = vrot.slane %v4846_v62, 2 }
 0x150   : > { %v2603_v26 = vsel %vm15724_vm4, %v2598_v43, %v2602_v49  ;;  %v5050_v54 = vsel %vm15724_vm4, %v5045_v24, %v5049_v17  ;;  %v2607_v27 = vsel %vm15724_vm4, %v2602_v49, %v2606_v45  ;;  %v15799_v30 = vshll.u32 %v13331_v16, 16 }
 0x151   : > { %v5057_v15 = vor.u32 %v5056_v28, %v5055_v59  ;;  %v15800_v19 = vshrl.u32 %v13334_v31, 16  ;;  %v15801_v52 = vshll.u32 %v13334_v31, 16  ;;  %v15803_v62 = vshll.u32 %v13337_v11, 16 }
 0x152   : > { %10868 = vmatmul.mubr.msk.bf16.gmra.mrb[16].mxu0 %vm15728_vm1, %v2423_v4  ;;  %v5053_v4 = vor.u32 %v5052_v51, %v5051_v12  ;;  %v5060_v55 = vrot.slane %v15799_v30, 3  ;;  %v2621_v57 = vshrl.u32 %v12289_v23, 16  ;;  %v2624_v21 = vshll.u32 %v12289_v23, 16 }
 0x153   : > { %11066 = vmatmul.mubr.msk.bf16.gmra.mrb[16].mxu1 %vm15728_vm1, %v4871_v0  ;;  %10873 = vmatprep.mubr.msk.bf16.mxu0 %vm15728_vm1, %v2587_v29  ;;  %v2613_v29 = vrot.slane %v2401_v32, 3  ;;  %v2616_v34 = vrot.slane %v15800_v19, 2  ;;  %v2617_v42 = vrot.slane %v15801_v52, 3  ;;  %v5063_v32 = vrot.slane %v15802_v56, 2 }
 0x154   : > { %11071 = vmatprep.mubr.msk.bf16.mxu1 %vm15728_vm1, %v5034_v61  ;;  %v5054_v0 = vsel %vm15724_vm4, %v5049_v17, %v5053_v4  ;;  %v2611_v61 = vsel %vm15724_vm4, %v2606_v45, %v2610_v47  ;;  %v5058_v13 = vsel %vm15724_vm4, %v5053_v4, %v5057_v15  ;;  %v5061_v31 = vor.u32 %v5060_v55, %v5059_v41 }
 0x155   : > { %v2614_v16 = vor.u32 %v2613_v29, %v2612_v2  ;;  %v2618_v22 = vor.u32 %v2617_v42, %v2616_v34  ;;  %v2623_v11 = vrot.slane %v2621_v57, 2  ;;  %v2626_v33 = vrot.slane %v2624_v21, 3  ;;  %v7585_v2 = vld [vmem:[%s15680_s4] sm:$0xf] }
 0x156   : > { %v5062_v50 = vsel %vm15724_vm4, %v5057_v15, %v5061_v31  ;;  %v12301_v17 = vmov 0   ;;  %v5515_v39 = vsel %vm15730_vm0, %v10097_v63, 0  ;;  %v7651_v18 = vsel %vm15730_vm0, %v10197_v44, 0 }
 0x157   : > { %v2615_v3 = vsel %vm15724_vm4, %v2610_v47, %v2614_v16  ;;  %v2627_v40 = vor.u32 %v2626_v33, %v2623_v11  ;;  %523 = vst.msk [vmem:[#allocation2 + $0x8] sm:$0xff] %vm15728_vm1, %v12301_v17  ;;  %528 = vst.msk [vmem:[#allocation2 + $0xb8] sm:$0xff] %vm15728_vm1, %v12301_v17 }
 0x158   : > { %525 = vst.msk [vmem:[#allocation2 + $0x10] sm:$0xf] %vm15726_vm7, %v12301_v17 }
 0x159   : > { %v2628_v24 = vsel %vm15724_vm4, %v2618_v22, %v2627_v40  ;;  %527 = vst.msk [vmem:[#allocation2 + $0xb0] sm:$0xf0] %vm15729_vm8, %v12301_v17 }
 0x15a   : > { %10874 = vmatmul.mubr.msk.bf16.vlgmr.msra.gmra.mrb[0].mxu0 %vm15728_vm1, %v2591_v48  ;;  %v12290_v48 = vld [vmem:[%s12375_s14 + $0xbc] ss:$0 sps:$4 sm:$0x77]  }
 0x15b   : > { %11072 = vmatmul.mubr.msk.bf16.vlgmr.msra.gmra.mrb[0].mxu1 %vm15728_vm1, %v5038_v6  ;;  %10877 = vmatprep.mubr.msk.bf16.mxu0 %vm15728_vm1, %v2595_v46  ;;  %v5064_v6 = vrot.slane %v15803_v62, 3  ;;  %v5068_v46 = vshrl.u32 %v12290_v48, 16  ;;  %v5071_v9 = vshll.u32 %v12290_v48, 16 }
 0x15c   : > { %11075 = vmatprep.mubr.msk.bf16.mxu1 %vm15728_vm1, %v5042_v53  ;;  %v2619_v53 = vsel %vm15724_vm4, %v2614_v16, %v2618_v22  ;;  %11092 = vmatpush3.bf16.msra.mxu0 %v5515_v39 }
 0x15d   : > { %v5065_v10 = vor.u32 %v5064_v6, %v5063_v32  ;;  %v5070_v20 = vrot.slane %v5068_v46, 2  ;;  %v5073_v14 = vrot.slane %v5071_v9, 3  ;;  %11290 = vmatpush3.bf16.msra.mxu1 %v7651_v18 }
 0x15e   : > { %12155 = vmatprep.subr.msk.bf16.mxu1 %vm15730_vm0, %v7585_v2 }
 0x15f   : > { %v5066_v5 = vsel %vm15724_vm4, %v5061_v31, %v5065_v10  ;;  %v5074_v43 = vor.u32 %v5073_v14, %v5070_v20 }
 0x161   : > { %v5075_v49 = vsel %vm15724_vm4, %v5065_v10, %v5074_v43 }
 0x162   : > { %10878 = vmatmul.mubr.msk.bf16.gmra.mrb[4].mxu0 %vm15728_vm1, %v2599_v58  ;;  %v280_v58 = vlaneseq }
 0x163   : > { %11076 = vmatmul.mubr.msk.bf16.gmra.mrb[4].mxu1 %vm15728_vm1, %v5046_v36  ;;  %10881 = vmatprep.mubr.msk.bf16.mxu0 %vm15728_vm1, %v2603_v26 }
 0x164   : > { %11079 = vmatprep.mubr.msk.bf16.mxu1 %vm15728_vm1, %v5050_v54  ;;  %v13657_v37 = vshrl.u32 %v280_v58, 7 }
 0x166   : > { %v283_v12 = vadd.s32 16, %v13657_v37  ;;  %v13661_v51 = vadd.s32 24, %v13657_v37  ;;  %v13664_v36 = vadd.s32 8, %v13657_v37  ;;  %v301_v1 = vcvt.s32.f32 %v13657_v37 }
 0x167   : > { %v13669_v8 = vadd.s32 48, %v13657_v37  ;;  %v13673_v54 = vadd.s32 32, %v13657_v37  ;;  %v13678_v47 = vadd.s32 56, %v13657_v37  ;;  %v13691_v23 = vadd.s32 40, %v13657_v37 }
 0x168   : > { %v303_v60 = vcvt.s32.f32 %v283_v12  ;;  %v304_v35 = vcvt.s32.f32 %v13661_v51  ;;  %v302_v38 = vcvt.s32.f32 %v13664_v36  ;;  %v321_v59 = vadd.f32 0.5, %v301_v1 }
 0x169   : > { %v307_v28 = vcvt.s32.f32 %v13669_v8  ;;  %v305_v4 = vcvt.s32.f32 %v13673_v54  ;;  %v13697_v30 = vadd.s32 80, %v13657_v37  ;;  %v308_v19 = vcvt.s32.f32 %v13678_v47 }
 0x16a   : > { %10882 = vmatmul.mubr.msk.bf16.gmra.mrb[8].mxu0 %vm15728_vm1, %v2607_v27  ;;  %v323_v26 = vadd.f32 0.5, %v303_v60  ;;  %v324_v25 = vadd.f32 0.5, %v304_v35  ;;  %v322_v45 = vadd.f32 0.5, %v302_v38  ;;  %v341_v27 = vmul.f32 0.05, %v321_v59 }
 0x16b   : > { %11080 = vmatmul.mubr.msk.bf16.gmra.mrb[8].mxu1 %vm15728_vm1, %v5054_v0  ;;  %10885 = vmatprep.mubr.msk.bf16.mxu0 %vm15728_vm1, %v2611_v61  ;;  %v13683_v0 = vld [vmem:[%s15680_s4] sm:$0xf]  ;;  %v327_v41 = vadd.f32 0.5, %v307_v28  ;;  %v325_v55 = vadd.f32 0.5, %v305_v4  ;;  %v13703_v34 = vadd.s32 64, %v13657_v37  ;;  %v13706_v48 = vadd.s32 88, %v13657_v37 }
 0x16c   : > { %11083 = vmatprep.mubr.msk.bf16.mxu1 %vm15728_vm1, %v5058_v13  ;;  %v343_v7 = vmul.f32 0.05, %v323_v26  ;;  %v344_v29 = vmul.f32 0.05, %v324_v25  ;;  %12146 = vmatprep.subr.msk.bf16.mxu0 %vm15730_vm0, %v13683_v0  ;;  %v342_v61 = vmul.f32 0.05, %v322_v45  ;;  %v361_v42 = vfloor.f32 %v341_v27 }
 0x16d   : > { %v347_v56 = vmul.f32 0.05, %v327_v41  ;;  %v306_v32 = vcvt.s32.f32 %v13691_v23  ;;  %v311_v6 = vcvt.s32.f32 %v13697_v30  ;;  %v13711_v16 = vadd.s32 72, %v13657_v37 }
 0x16e   : > { %v363_v15 = vfloor.f32 %v343_v7  ;;  %v364_v13 = vfloor.f32 %v344_v29  ;;  %v362_v62 = vfloor.f32 %v342_v61  ;;  %v345_v57 = vmul.f32 0.05, %v325_v55 }
 0x16f   : > { %v328_v21 = vadd.f32 0.5, %v308_v19  ;;  %v309_v31 = vcvt.s32.f32 %v13703_v34  ;;  %v13717_v22 = vadd.s32 112, %v13657_v37  ;;  %v381_v9 = vmul.f32 20.0, %v361_v42 }
 0x170   : > { %v383_v52 = vmul.f32 20.0, %v363_v15  ;;  %v312_v10 = vcvt.s32.f32 %v13706_v48  ;;  %v384_v11 = vmul.f32 20.0, %v364_v13  ;;  %v367_v33 = vfloor.f32 %v347_v56 }
 0x171   : > { %v382_v20 = vmul.f32 20.0, %v362_v62  ;;  %v331_v14 = vadd.f32 0.5, %v311_v6  ;;  %v13734_v40 = vadd.s32 104, %v13657_v37  ;;  %v365_v43 = vfloor.f32 %v345_v57 }
 0x172   : > { %10886 = vmatmul.mubr.msk.bf16.gmra.mrb[12].mxu0 %vm15728_vm1, %v2615_v3  ;;  %v13719_v46 = vsub.f32 %v303_v60, %v383_v52  ;;  %v13723_v3 = vadd.s32 96, %v13657_v37  ;;  %v315_v17 = vcvt.s32.f32 %v13717_v22  ;;  %v13739_v63 = vsub.f32 %v301_v1, %v381_v9 }
 0x173   : > { %11084 = vmatmul.mubr.msk.bf16.gmra.mrb[12].mxu1 %vm15728_vm1, %v5062_v50  ;;  %10889 = vmatprep.mubr.msk.bf16.mxu0 %vm15728_vm1, %v2619_v53  ;;  %v326_v50 = vadd.f32 0.5, %v306_v32  ;;  %v13728_v53 = vadd.s32 120, %v13657_v37  ;;  %v332_v39 = vadd.f32 0.5, %v312_v10  ;;  %v13745_v18 = vadd.s32 144, %v13657_v37 }
 0x174   : > { %11087 = vmatprep.mubr.msk.bf16.mxu1 %vm15728_vm1, %v5066_v5  ;;  %v310_v5 = vcvt.s32.f32 %v13711_v16  ;;  %v313_v44 = vcvt.s32.f32 %v13723_v3  ;;  %v13747_v58 = vsub.f32 %v304_v35, %v384_v11  ;;  %v387_v12 = vmul.f32 20.0, %v367_v33 }
 0x175   : > { %v346_v60 = vmul.f32 0.05, %v326_v50  ;;  %v316_v51 = vcvt.s32.f32 %v13728_v53  ;;  %v13750_v36 = vsub.f32 %v302_v38, %v382_v20  ;;  %v351_v26 = vmul.f32 0.05, %v331_v14 }
 0x176   : > { %v330_v1 = vadd.f32 0.5, %v310_v5  ;;  %v314_v7 = vcvt.s32.f32 %v13734_v40  ;;  %v385_v59 = vmul.f32 20.0, %v365_v43  ;;  %v335_v15 = vadd.f32 0.5, %v315_v17 }
 0x177   : > { %v352_v35 = vmul.f32 0.05, %v332_v39  ;;  %v333_v27 = vadd.f32 0.5, %v313_v44  ;;  %v319_v2 = vcvt.s32.f32 %v13745_v18  ;;  %vm423_vm9 = vcmp.ge.f32.partialorder %v13719_v46, 2.0 }
 0x178   : > { %vm443_vm10 = vcmp.lt.f32.partialorder %v13719_v46, 18.0  ;;  %vm421_vm11 = vcmp.ge.f32.partialorder %v13739_v63, 2.0  ;;  %vm441_vm12 = vcmp.lt.f32.partialorder %v13739_v63, 18.0  ;;  %vm424_vm13 = vcmp.ge.f32.partialorder %v13747_v58, 2.0 }
 0x179   : > { %vm444_vm14 = vcmp.lt.f32.partialorder %v13747_v58, 18.0  ;;  %v407_v38 = vsub.f32 %v307_v28, %v387_v12  ;;  %v366_v29 = vfloor.f32 %v346_v60  ;;  %v336_v41 = vadd.f32 0.5, %v316_v51  ;;  %vm13801_vm8 = vmand %vm423_vm9, %vm443_vm10 }
 0x17a   : > { %10890 = vmatmul.mubr.msk.bf16.gmra.mrb[16].mxu0 %vm15728_vm1, %v2628_v24  ;;  %v348_v24 = vmul.f32 0.05, %v328_v21  ;;  %vm422_vm15 = vcmp.ge.f32.partialorder %v13750_v36, 2.0  ;;  %vm442_vm6 = vcmp.lt.f32.partialorder %v13750_v36, 18.0  ;;  %v371_v61 = vfloor.f32 %v351_v26  ;;  %vm13809_vm0 = vmand %vm421_vm11, %vm441_vm12 }
 0x17b   : > { %11088 = vmatmul.mubr.msk.bf16.gmra.mrb[16].mxu1 %vm15728_vm1, %v5075_v49  ;;  %v329_v49 = vadd.f32 0.5, %v309_v31  ;;  %v350_v55 = vmul.f32 0.05, %v330_v1  ;;  %v334_v52 = vadd.f32 0.5, %v314_v7  ;;  %v405_v42 = vsub.f32 %v305_v4, %v385_v59  ;;  %vm13817_vm2 = vmand %vm424_vm13, %vm444_vm14 }
 0x17c   : > { %v368_v25 = vfloor.f32 %v348_v24  ;;  %v355_v8 = vmul.f32 0.05, %v335_v15  ;;  %v372_v28 = vfloor.f32 %v352_v35  ;;  %v353_v62 = vmul.f32 0.05, %v333_v27  ;;  %vm13829_vm9 = vmand %vm422_vm15, %vm442_vm6 }
 0x17d   : > { %v349_v45 = vmul.f32 0.05, %v329_v49  ;;  %v339_v57 = vadd.f32 0.5, %v319_v2  ;;  %v13779_v21 = vadd.s32 128, %v13657_v37  ;;  %vm427_vm5 = vcmp.ge.f32.partialorder %v407_v38, 2.0 }
 0x17e   : > { %v388_v13 = vmul.f32 20.0, %v368_v25  ;;  %v386_v9 = vmul.f32 20.0, %v366_v29  ;;  %v356_v11 = vmul.f32 0.05, %v336_v41  ;;  %v13782_v33 = vadd.s32 152, %v13657_v37 }
 0x17f   : > { %v369_v56 = vfloor.f32 %v349_v45  ;;  %vm447_vm4 = vcmp.lt.f32.partialorder %v407_v38, 18.0  ;;  %v391_v54 = vmul.f32 20.0, %v371_v61  ;;  %v370_v4 = vfloor.f32 %v350_v55 }
 0x180   : > { %v354_v50 = vmul.f32 0.05, %v334_v52  ;;  %vm425_vm3 = vcmp.ge.f32.partialorder %v405_v42, 2.0  ;;  %v408_v20 = vsub.f32 %v308_v19, %v388_v13  ;;  %v375_v43 = vfloor.f32 %v355_v8  ;;  %vm13838_vm11 = vmand %vm427_vm5, %vm447_vm4 }
 0x181   : > { %v389_v14 = vmul.f32 20.0, %v369_v56  ;;  %v392_v24 = vmul.f32 20.0, %v372_v28  ;;  %v373_v49 = vfloor.f32 %v353_v62  ;;  %v359_v39 = vmul.f32 0.05, %v339_v57 }
 0x182   : > { %v317_v12 = vcvt.s32.f32 %v13779_v21  ;;  %v406_v60 = vsub.f32 %v306_v32, %v386_v9  ;;  %v376_v26 = vfloor.f32 %v356_v11  ;;  %v320_v1 = vcvt.s32.f32 %v13782_v33 }
 0x183   : > { %v13791_v59 = vadd.s32 136, %v13657_v37  ;;  %vm445_vm7 = vcmp.lt.f32.partialorder %v405_v42, 18.0  ;;  %v411_v47 = vsub.f32 %v311_v6, %v391_v54  ;;  %v390_v19 = vmul.f32 20.0, %v370_v4  ;;  %v13932_v54 = vld [vmem:[#allocation2 + $0x8] sm:$0xfc] }
 0x184   : > { %v374_v25 = vfloor.f32 %v354_v50  ;;  %vm448_vm1 = vcmp.lt.f32.partialorder %v408_v20, 18.0  ;;  %v409_v45 = vsub.f32 %v309_v31, %v389_v14  ;;  %v395_v15 = vmul.f32 20.0, %v375_v43  ;;  %vm13846_vm14 = vmand %vm425_vm3, %vm445_vm7  ;;  %v13937_v50 = vld [vmem:[%s15678_s2] ss:$0 sm:$0xff] }
 0x185   : > { %v412_v34 = vsub.f32 %v312_v10, %v392_v24  ;;  %v393_v32 = vmul.f32 20.0, %v373_v49  ;;  %v379_v6 = vfloor.f32 %v359_v39  ;;  %v337_v31 = vadd.f32 0.5, %v317_v12  ;;  %v13958_v39 = vld [vmem:[%s15679_s3] ss:$0 sm:$0xff] }
 0x186   : > { %v15810_v46 = vmov 0  ;;  %v396_v63 = vmul.f32 20.0, %v376_v26  ;;  %v340_v58 = vadd.f32 0.5, %v320_v1  ;;  %v318_v48 = vcvt.s32.f32 %v13791_v59 }
 0x187   : > { %v15811_v46 = vsel %vm13829_vm9, 4294967295, %v15810_v46  ;;  %v15812_v10 = vmov 0  ;;  %vm446_vm12 = vcmp.lt.f32.partialorder %v406_v60, 18.0  ;;  %v410_v36 = vsub.f32 %v310_v5, %v390_v19 }
 0x188   : > { %v15813_v10 = vsel %vm13838_vm11, 4294967295, %v15812_v10  ;;  %v394_v35 = vmul.f32 20.0, %v374_v25  ;;  %v15814_v27 = vmov 0  ;;  %vm451_vm15 = vcmp.lt.f32.partialorder %v411_v47, 18.0 }
 0x189   : > { %v15815_v27 = vsel %vm13846_vm14, 4294967295, %v15814_v27  ;;  %v415_v38 = vsub.f32 %v315_v17, %v395_v15  ;;  %vm15816_vm4 = vcmp.ge.f32.partialorder %v408_v20, 2.0  ;;  %v15817_v29 = vmov 0 }
 0x18a   : > { %vm13854_vm5 = vmand %vm15816_vm4, %vm448_vm1  ;;  %v413_v16 = vsub.f32 %v313_v44, %v393_v32  ;;  %v399_v5 = vmul.f32 20.0, %v379_v6  ;;  %v357_v41 = vmul.f32 0.05, %v337_v31  ;;  %vm15819_vm3 = vcmp.ge.f32.partialorder %v406_v60, 2.0 }
 0x18b   : > { %v15818_v29 = vsel %vm13854_vm5, 4294967295, %v15817_v29  ;;  %vm13861_vm7 = vmand %vm15819_vm3, %vm446_vm12  ;;  %v15820_v61 = vmov 0  ;;  %vm452_vm6 = vcmp.lt.f32.partialorder %v412_v34, 18.0  ;;  %v416_v22 = vsub.f32 %v316_v51, %v396_v63 }
 0x18c   : > { %v15821_v61 = vsel %vm13861_vm7, 4294967295, %v15820_v61  ;;  %v360_v17 = vmul.f32 0.05, %v340_v58  ;;  %v338_v55 = vadd.f32 0.5, %v318_v48  ;;  %vm15822_vm1 = vcmp.ge.f32.partialorder %v411_v47, 2.0 }
 0x18d   : > { %vm13870_vm4 = vmand %vm15822_vm1, %vm451_vm15  ;;  %v15823_v52 = vmov 0  ;;  %vm430_vm13 = vcmp.ge.f32.partialorder %v410_v36, 2.0  ;;  %vm450_vm10 = vcmp.lt.f32.partialorder %v410_v36, 18.0  ;;  %v414_v3 = vsub.f32 %v314_v7, %v394_v35 }
 0x18e   : > { %v15824_v52 = vsel %vm13870_vm4, 4294967295, %v15823_v52  ;;  %vm15825_vm12 = vcmp.lt.f32.partialorder %v409_v45, 18.0  ;;  %vm15826_vm3 = vcmp.ge.f32.partialorder %v409_v45, 2.0  ;;  %v15827_v44 = vmov 0  ;;  %vm13889_vm4 = vmand %vm430_vm13, %vm450_vm10 }
 0x18f   : > { %vm13878_vm7 = vmand %vm15826_vm3, %vm15825_vm12  ;;  %vm435_vm5 = vcmp.ge.f32.partialorder %v415_v38, 2.0  ;;  %vm455_vm14 = vcmp.lt.f32.partialorder %v415_v38, 18.0  ;;  %vm15829_vm11 = vcmp.ge.f32.partialorder %v412_v34, 2.0  ;;  %vm433_vm15 = vcmp.ge.f32.partialorder %v413_v16, 2.0 }
 0x190   : > { %v15828_v44 = vsel %vm13878_vm7, 4294967295, %v15827_v44  ;;  %vm13883_vm9 = vmand %vm15829_vm11, %vm452_vm6  ;;  %vm453_vm1 = vcmp.lt.f32.partialorder %v413_v16, 18.0  ;;  %v419_v51 = vsub.f32 %v319_v2, %v399_v5  ;;  %v377_v40 = vfloor.f32 %v357_v41 }
 0x191   : > { %vm436_vm12 = vcmp.ge.f32.partialorder %v416_v22, 2.0  ;;  %vm456_vm3 = vcmp.lt.f32.partialorder %v416_v22, 18.0  ;;  %v380_v42 = vfloor.f32 %v360_v17  ;;  %v358_v13 = vmul.f32 0.05, %v338_v55  ;;  %vm13893_vm7 = vmand %vm435_vm5, %vm455_vm14 }
 0x192   : > { %vm434_vm11 = vcmp.ge.f32.partialorder %v414_v3, 2.0  ;;  %vm454_vm6 = vcmp.lt.f32.partialorder %v414_v3, 18.0  ;;  %v12302_v8 = vmov 0.0   ;;  %vm15836_vm10 = vnez %v15811_v46  ;;  %vm13919_vm13 = vmand %vm433_vm15, %vm453_vm1 }
 0x193   : > { %v13900_v18 = vsel %vm13801_vm8, 1.0, %v12302_v8  ;;  %v13905_v2 = vsel %vm13809_vm0, 1.0, %v12302_v8  ;;  %v13910_v28 = vsel %vm13817_vm2, 1.0, %v12302_v8  ;;  %v13915_v62 = vsel %vm15836_vm10, 1.0, %v12302_v8  ;;  %vm13928_vm8 = vmand %vm436_vm12, %vm456_vm3 }
 0x194   : > { %vm15839_vm0 = vnez %v15813_v10  ;;  %vm439_vm2 = vcmp.ge.f32.partialorder %v419_v51, 2.0  ;;  %vm459_vm14 = vcmp.lt.f32.partialorder %v419_v51, 18.0  ;;  %v397_v4 = vmul.f32 20.0, %v377_v40  ;;  %vm13951_vm1 = vmand %vm434_vm11, %vm454_vm6 }
 0x195   : > { %v13926_v9 = vsel %vm15839_vm0, 1.0, %v12302_v8  ;;  %vm15842_vm5 = vnez %v15815_v27  ;;  %vm15843_vm15 = vnez %v15818_v29  ;;  %v400_v24 = vmul.f32 20.0, %v380_v42 }
 0x196   : > { %v13942_v20 = vsel %vm15842_vm5, 1.0, %v12302_v8  ;;  %v13947_v14 = vsel %vm15843_vm15, 1.0, %v12302_v8  ;;  %v378_v49 = vfloor.f32 %v358_v13  ;;  %vm15846_vm12 = vnez %v15821_v61 }
 0x197   : > { %v13963_v60 = vsel %vm15846_vm12, 1.0, %v12302_v8  ;;  %vm15847_vm3 = vnez %v15824_v52  ;;  %vm15848_vm11 = vnez %v15828_v44  ;;  %v13978_v19 = vsel %vm13883_vm9, 1.0, %v12302_v8  ;;  %vm13998_vm9 = vmand %vm439_vm2, %vm459_vm14 }
 0x198   : > { %v13968_v26 = vsel %vm15847_vm3, 1.0, %v12302_v8  ;;  %v13973_v47 = vsel %vm15848_vm11, 1.0, %v12302_v8  ;;  %v13983_v45 = vsel %vm13889_vm4, 1.0, %v12302_v8  ;;  %v13988_v15 = vsel %vm13893_vm7, 1.0, %v12302_v8 }
 0x199   : > { %v13993_v23 = vsel %vm13919_vm13, 1.0, %v12302_v8  ;;  %v5463_v37 = vrot.slane %v13932_v54, 2  ;;  %v14006_v31 = vsel %vm13928_vm8, 1.0, %v12302_v8  ;;  %v14011_v46 = vsel %vm13951_vm1, 1.0, %v12302_v8  ;;  %v14282_v54 = vld [vmem:[%s15680_s4 + $0x8] sm:$0xf] }
 0x19a   : > { %v14015_v63 = vsub.f32 %v317_v12, %v397_v4  ;;  %v14021_v27 = vsub.f32 %v320_v1, %v400_v24  ;;  %v14023_v38 = vmul.f32 20.0, %v378_v49  ;;  %v14031_v41 = vsel %vm13998_vm9, 1.0, %v12302_v8 }
 0x19b   : > { %vm15853_vm10 = vcmask 1043456   ;;  %vm15854_vm13 = vcmask 64516   ;;  %vm15855_vm0 = vcmask 64512  }
 0x19c   : > { %vm437_vm7 = vcmp.ge.f32.partialorder %v14015_v63, 2.0  ;;  %vm457_vm4 = vcmp.lt.f32.partialorder %v14015_v63, 18.0  ;;  %vm15856_vm8 = vmmov %vm15853_vm10 }
 0x19d   : > { %vm14071_vm6 = vmand %vm437_vm7, %vm457_vm4  ;;  %vm440_vm4 = vcmp.ge.f32.partialorder %v14021_v27, 2.0 }
 0x19e   : > { %vm15857_vm2 = vmmov %vm15854_vm13 }
 0x19f   : > { %vm15858_vm14 = vmmov %vm15855_vm0 }
 0x1a0   : > { %vm15859_vm5 = vmmov %vm15856_vm8 }
 0x1a1   : > { %vm15860_vm15 = vmmov %vm15859_vm5 }
 0x1a2   : > { %vm15861_vm1 = vmmov %vm15855_vm0 }
 0x1a3   : > { %vm15862_vm12 = vmmov %vm15855_vm0 }
 0x1a4   : > { %vm15863_vm3 = vmmov %vm15859_vm5 }
 0x1a5   : > { %vm15864_vm11 = vmmov %vm15863_vm3 }
 0x1a6   : > { %vm15865_vm9 = vmmov %vm15855_vm0 }
 0x1a7   : > { %vm15866_vm7 = vmmov %vm15855_vm0 }
 0x22d   : > { %v10875_v25 = vpop.f32.mrb[0].mxu0 }
 0x22e   : > { %v2824_v34 = vmul.f32 %v10875_v25, %v13937_v50  ;;  %v11073_v32 = vpop.f32.mrb[0].mxu1  ;;  %v2696_v6 = vpop.f32.mrb[1].mxu0 }
 0x22f   : > { %v5271_v58 = vmul.f32 %v11073_v32, %v13937_v50  ;;  %v2822_v10 = vmul.f32 %v13937_v50, %v2696_v6  ;;  %v5143_v36 = vpop.f32.mrb[1].mxu1  ;;  %v10876_v35 = vpop.f32.mrb[2].mxu0 }
 0x230   : > { %v2851_v29 = vadd.f32 %v13958_v39, %v2824_v34  ;;  %v5269_v16 = vmul.f32 %v13937_v50, %v5143_v36  ;;  %v2825_v21 = vmul.f32 %v10876_v35, %v13937_v50  ;;  %v11074_v12 = vpop.f32.mrb[2].mxu1  ;;  %v2699_v5 = vpop.f32.mrb[3].mxu0 }
 0x231   : > { %v5298_v61 = vadd.f32 %v13958_v39, %v5271_v58  ;;  %v2849_v33 = vadd.f32 %v13958_v39, %v2822_v10  ;;  %v5272_v1 = vmul.f32 %v11074_v12, %v13937_v50  ;;  %v2823_v22 = vmul.f32 %v13937_v50, %v2699_v5  ;;  %v5146_v17 = vpop.f32.mrb[3].mxu1 }
 0x232   : > { %v2871_v55 = vmul.f32 0.01, %v2851_v29  ;;  %v5296_v52 = vadd.f32 %v13958_v39, %v5269_v16  ;;  %v2852_v3 = vadd.f32 %v13958_v39, %v2825_v21  ;;  %v5270_v44 = vmul.f32 %v13937_v50, %v5146_v17 }
 0x233   : > { %v5318_v53 = vmul.f32 0.01, %v5298_v61  ;;  %v2869_v51 = vmul.f32 0.01, %v2849_v33  ;;  %v5299_v40 = vadd.f32 %v13958_v39, %v5272_v1  ;;  %v2850_v7 = vadd.f32 %v13958_v39, %v2823_v22 }
 0x234   : > { %v2891_v42 = vmax.f32 %v2851_v29, %v2871_v55  ;;  %v5316_v13 = vmul.f32 0.01, %v5296_v52  ;;  %v2872_v56 = vmul.f32 0.01, %v2852_v3  ;;  %v5297_v57 = vadd.f32 %v13958_v39, %v5270_v44 }
 0x235   : > { %v5338_v11 = vmax.f32 %v5298_v61, %v5318_v53  ;;  %v2889_v4 = vmax.f32 %v2849_v33, %v2869_v51  ;;  %v5319_v43 = vmul.f32 0.01, %v5299_v40  ;;  %v2870_v24 = vmul.f32 0.01, %v2850_v7  ;;  %v10879_v49 = vpop.f32.mrb[4].mxu0 }
 0x236   : > { %v2911_v25 = vmul.f32 %v13900_v18, %v2891_v42  ;;  %v5336_v30 = vmax.f32 %v5296_v52, %v5316_v13  ;;  %v2892_v34 = vmax.f32 %v2852_v3, %v2872_v56  ;;  %v5317_v32 = vmul.f32 0.01, %v5297_v57  ;;  %v11077_v6 = vpop.f32.mrb[4].mxu1  ;;  %v2712_v58 = vpop.f32.mrb[5].mxu0 }
 0x237   : > { %v5358_v10 = vmul.f32 %v13900_v18, %v5338_v11  ;;  %v2909_v36 = vmul.f32 %v13905_v2, %v2889_v4  ;;  %v5339_v35 = vmax.f32 %v5299_v40, %v5319_v43  ;;  %v2890_v29 = vmax.f32 %v2850_v7, %v2870_v24  ;;  %v5159_v16 = vpop.f32.mrb[5].mxu1  ;;  %v10880_v21 = vpop.f32.mrb[6].mxu0 }
 0x238   : > { %v5356_v12 = vmul.f32 %v13905_v2, %v5336_v30  ;;  %v2912_v5 = vmul.f32 %v13910_v28, %v2892_v34  ;;  %v5337_v61 = vmax.f32 %v5297_v57, %v5317_v32  ;;  %v2828_v33 = vmul.f32 %v10879_v49, %v13937_v50  ;;  %v11078_v1 = vpop.f32.mrb[6].mxu1  ;;  %v2715_v22 = vpop.f32.mrb[7].mxu0 }
 0x239   : > { %v5359_v17 = vmul.f32 %v13910_v28, %v5339_v35  ;;  %v2910_v55 = vmul.f32 %v13915_v62, %v2890_v29  ;;  %v5275_v18 = vmul.f32 %v11077_v6, %v13937_v50  ;;  %v2826_v52 = vmul.f32 %v13937_v50, %v2712_v58  ;;  %v5162_v3 = vpop.f32.mrb[7].mxu1 }
 0x23a   : > { %v2930_v44 = vpack.c.bf16 %v2912_v5, %v2911_v25  ;;  %v5357_v53 = vmul.f32 %v13915_v62, %v5337_v61  ;;  %v2855_v2 = vadd.f32 %v13958_v39, %v2828_v33  ;;  %v5273_v51 = vmul.f32 %v13937_v50, %v5159_v16 }
 0x23b   : > { %v5377_v40 = vpack.c.bf16 %v5359_v17, %v5358_v10  ;;  %v2929_v7 = vpack.c.bf16 %v2910_v55, %v2909_v36  ;;  %v5302_v42 = vadd.f32 %v13958_v39, %v5275_v18  ;;  %v2853_v28 = vadd.f32 %v13958_v39, %v2826_v52 }
 0x23c   : > { %v14060_v13 = vrot.slane %v2930_v44, 4  ;;  %v5376_v56 = vpack.c.bf16 %v5357_v53, %v5356_v12  ;;  %v2875_v57 = vmul.f32 0.01, %v2855_v2  ;;  %v14063_v11 = vadd.f32 %v13958_v39, %v5273_v51 }
 0x23d   : > { %v14065_v4 = vrot.slane %v5377_v40, 4  ;;  %v2950_v62 = vrot.slane %v2929_v7, 4  ;;  %v5322_v43 = vmul.f32 0.01, %v5302_v42  ;;  %v2873_v24 = vmul.f32 0.01, %v2853_v28 }
 0x23e   : > { %v5396_v25 = vrot.slane %v5376_v56, 4  ;;  %v2895_v30 = vmax.f32 %v2855_v2, %v2875_v57  ;;  %v14076_v34 = vmul.f32 0.01, %v14063_v11  ;;  %v2829_v32 = vmul.f32 %v10880_v21, %v13937_v50  ;;  %v10883_v6 = vpop.f32.mrb[8].mxu0  ;;  %v11081_v58 = vpop.f32.mrb[8].mxu1 }
 0x23f   : > { %v2952_v10 = vsel %vm15853_vm10, %v2950_v62, %v14060_v13  ;;  %2980 = vst.msk [vmem:[#allocation2 + $0x10] sm:$0xf0] %vm15854_vm13, %v2950_v62  ;;  %v5342_v36 = vmax.f32 %v5302_v42, %v5322_v43  ;;  %v2893_v63 = vmax.f32 %v2853_v28, %v2873_v24  ;;  %v5276_v35 = vmul.f32 %v11078_v1, %v13937_v50  ;;  %v2728_v29 = vpop.f32.mrb[9].mxu0  ;;  %v5175_v16 = vpop.f32.mrb[9].mxu1  ;;  %vm15867_vm10 = vmmov %vm15863_vm3 }
 0x240   : > { %2981 = vst.msk [vmem:[#allocation2 + $0x18] sm:$0xff] %vm15855_vm0, %v2952_v10  ;;  %v5398_v12 = vsel %vm15856_vm8, %v5396_v25, %v14065_v4  ;;  %v2915_v21 = vmul.f32 %v13926_v9, %v2895_v30  ;;  %v2856_v5 = vadd.f32 %v13958_v39, %v2829_v32  ;;  %v10884_v61 = vpop.f32.mrb[10].mxu0  ;;  %v11082_v33 = vpop.f32.mrb[10].mxu1  ;;  %v14092_v17 = vsel %vm14071_vm6, 1.0, %v12302_v8  ;;  %vm15868_vm13 = vmmov %vm15863_vm3 }
 0x241   : > { %5426 = vst.msk [vmem:[#allocation2 + $0x60] sm:$0xf0] %vm15857_vm2, %v5396_v25  ;;  %v5362_v1 = vmul.f32 %v13926_v9, %v5342_v36  ;;  %v5340_v55 = vmax.f32 %v14063_v11, %v14076_v34  ;;  %v5303_v18 = vadd.f32 %v13958_v39, %v5276_v35  ;;  %v2827_v52 = vmul.f32 %v13937_v50, %v2715_v22  ;;  %v2731_v44 = vpop.f32.mrb[11].mxu0  ;;  %v5178_v53 = vpop.f32.mrb[11].mxu1  ;;  %vm15869_vm0 = vmmov %vm15863_vm3 }
 0x242   : > { %5427 = vst.msk [vmem:[#allocation2 + $0x68] sm:$0xff] %vm15858_vm14, %v5398_v12  ;;  %v2913_v2 = vmul.f32 %v13942_v20, %v2893_v63  ;;  %v2876_v51 = vmul.f32 0.01, %v2856_v5  ;;  %v5274_v40 = vmul.f32 %v13937_v50, %v5162_v3  ;;  %v2832_v7 = vmul.f32 %v10883_v6, %v13937_v50  ;;  %vm15870_vm8 = vmmov %vm15869_vm0 }
 0x243   : > { %v5323_v42 = vmul.f32 0.01, %v5303_v18  ;;  %v2854_v28 = vadd.f32 %v13958_v39, %v2827_v52  ;;  %v5279_v9 = vmul.f32 %v11081_v58, %v13937_v50  ;;  %v2830_v56 = vmul.f32 %v13937_v50, %v2728_v29  ;;  %vm15871_vm2 = vmmov %vm15869_vm0 }
 0x244   : > { %v2896_v57 = vmax.f32 %v2856_v5, %v2876_v51  ;;  %v5301_v11 = vadd.f32 %v13958_v39, %v5274_v40  ;;  %v2859_v22 = vadd.f32 %v13958_v39, %v2832_v7  ;;  %v5277_v62 = vmul.f32 %v13937_v50, %v5175_v16  ;;  %vm15872_vm14 = vmmov %vm15861_vm1 }
 0x245   : > { %v5343_v43 = vmax.f32 %v5303_v18, %v5323_v42  ;;  %v2874_v24 = vmul.f32 0.01, %v2854_v28  ;;  %v5306_v3 = vadd.f32 %v13958_v39, %v5279_v9  ;;  %v2857_v49 = vadd.f32 %v13958_v39, %v2830_v56  ;;  %v10887_v25 = vpop.f32.mrb[12].mxu0 }
 0x246   : > { %v2916_v30 = vmul.f32 %v13947_v14, %v2896_v57  ;;  %v5321_v34 = vmul.f32 0.01, %v5301_v11  ;;  %v2879_v32 = vmul.f32 0.01, %v2859_v22  ;;  %v14113_v6 = vadd.f32 %v13958_v39, %v5277_v62  ;;  %v11085_v58 = vpop.f32.mrb[12].mxu1  ;;  %v14115_v10 = vpop.f32.mrb[13].mxu0 }
 0x247   : > { %v5363_v36 = vmul.f32 %v13947_v14, %v5343_v43  ;;  %v2894_v63 = vmax.f32 %v2854_v28, %v2874_v24  ;;  %v5326_v35 = vmul.f32 0.01, %v5306_v3  ;;  %v2877_v29 = vmul.f32 0.01, %v2857_v49  ;;  %v5191_v16 = vpop.f32.mrb[13].mxu1  ;;  %v14118_v12 = vpop.f32.mrb[14].mxu0 }
 0x248   : > { %v2932_v5 = vpack.c.bf16 %v2916_v30, %v2915_v21  ;;  %v5341_v18 = vmax.f32 %v5301_v11, %v5321_v34  ;;  %v2899_v52 = vmax.f32 %v2859_v22, %v2879_v32  ;;  %v14121_v51 = vmul.f32 0.01, %v14113_v6  ;;  %v14123_v40 = vpop.f32.mrb[14].mxu1  ;;  %v14125_v7 = vpop.f32.mrb[15].mxu0 }
 0x249   : > { %v5379_v42 = vpack.c.bf16 %v5363_v36, %v5362_v1  ;;  %v2914_v9 = vmul.f32 %v13963_v60, %v2894_v63  ;;  %v5346_v14 = vmax.f32 %v5306_v3, %v5326_v35  ;;  %v2897_v28 = vmax.f32 %v2857_v49, %v2877_v29  ;;  %v14128_v56 = vpop.f32.mrb[15].mxu1 }
 0x24a   : > { %v5360_v57 = vmul.f32 %v13942_v20, %v5340_v55  ;;  %v14131_v62 = vrot.slane %v2932_v5, 4  ;;  %v5361_v21 = vmul.f32 %v13963_v60, %v5341_v18  ;;  %v14135_v11 = vmul.f32 %v13968_v26, %v2899_v52 }
 0x24b   : > { %v14137_v22 = vrot.slane %v5379_v42, 4  ;;  %v2931_v43 = vpack.c.bf16 %v2914_v9, %v2913_v2  ;;  %v14140_v1 = vmul.f32 %v13968_v26, %v5346_v14  ;;  %v5344_v24 = vmax.f32 %v14113_v6, %v14121_v51 }
 0x24c   : > { %v5378_v3 = vpack.c.bf16 %v5361_v21, %v5360_v57  ;;  %v14145_v49 = vmul.f32 %v13973_v47, %v2897_v28  ;;  %v2833_v20 = vmul.f32 %v10884_v61, %v13937_v50  ;;  %v5280_v60 = vmul.f32 %v11082_v33, %v13937_v50 }
 0x24d   : > { %v2953_v55 = vrot.slane %v2931_v43, 4  ;;  %v2831_v30 = vmul.f32 %v13937_v50, %v2731_v44  ;;  %v5278_v34 = vmul.f32 %v13937_v50, %v5178_v53  ;;  %v2836_v2 = vmul.f32 %v10887_v25, %v13937_v50  ;;  %v14152_v26 = vpop.f32.mrb[16].mxu0 }
 0x24e   : > { %v5399_v32 = vrot.slane %v5378_v3, 4  ;;  %v2860_v6 = vadd.f32 %v13958_v39, %v2833_v20  ;;  %v5307_v36 = vadd.f32 %v13958_v39, %v5280_v60  ;;  %v5283_v63 = vmul.f32 %v11085_v58, %v13937_v50  ;;  %v14157_v35 = vpop.f32.mrb[16].mxu1  ;;  %v14159_v61 = vpop.f32.mrb[17].mxu0 }
 0x24f   : > { %v2954_v33 = vsel %vm15859_vm5, %v14060_v13, %v2953_v55  ;;  %v2956_v44 = vsel %vm15860_vm15, %v2953_v55, %v14131_v62  ;;  %v2858_v53 = vadd.f32 %v13958_v39, %v2831_v30  ;;  %v5305_v25 = vadd.f32 %v13958_v39, %v5278_v34  ;;  %v14167_v29 = vpop.f32.mrb[17].mxu1  ;;  %v14169_v5 = vpop.f32.mrb[18].mxu0  ;;  %vm15873_vm5 = vmmov %vm15861_vm1 }
 0x250   : > { %2982 = vst.msk [vmem:[#allocation2 + $0x20] sm:$0xff] %vm15861_vm1, %v2954_v33  ;;  %v5400_v58 = vsel %vm15863_vm3, %v14065_v4, %v5399_v32  ;;  %v5402_v13 = vsel %vm15864_vm11, %v5399_v32, %v14137_v22  ;;  %v2880_v18 = vmul.f32 0.01, %v2860_v6  ;;  %v5327_v52 = vmul.f32 0.01, %v5307_v36  ;;  %v14177_v51 = vpop.f32.mrb[18].mxu1  ;;  %vm15874_vm15 = vmmov %vm15861_vm1 }
 0x251   : > { %2983 = vst.msk [vmem:[#allocation2 + $0x28] sm:$0xff] %vm15862_vm12, %v2956_v44  ;;  %v14179_v42 = vpop.f32.mrb[19].mxu0  ;;  %v2878_v9 = vmul.f32 0.01, %v2858_v53  ;;  %v5325_v14 = vmul.f32 0.01, %v5305_v25  ;;  %v2863_v28 = vadd.f32 %v13958_v39, %v2836_v2  ;;  %v14185_v57 = vadd.f32 %v13958_v39, %v5283_v63  ;;  %vm15877_vm11 = vmmov %vm15861_vm1 }
 0x252   : > { %5428 = vst.msk [vmem:[#allocation2 + $0x70] sm:$0xff] %vm15865_vm9, %v5400_v58  ;;  %v14187_v4 = vpop.f32.mrb[19].mxu1  ;;  %v2900_v21 = vmax.f32 %v2860_v6, %v2880_v18  ;;  %v5347_v43 = vmax.f32 %v5307_v36, %v5327_v52  ;;  %v2834_v3 = vmul.f32 %v13937_v50, %v14115_v10  ;;  %v5281_v20 = vmul.f32 %v13937_v50, %v5191_v16  ;;  %vm15878_vm9 = vmmov %vm15861_vm1 }
 0x253   : > { %5429 = vst.msk [vmem:[#allocation2 + $0x78] sm:$0xff] %vm15866_vm7, %v5402_v13  ;;  %v2898_v60 = vmax.f32 %v2858_v53, %v2878_v9  ;;  %v5345_v55 = vmax.f32 %v5305_v25, %v5325_v14  ;;  %v2883_v30 = vmul.f32 0.01, %v2863_v28  ;;  %v14193_v34 = vmul.f32 0.01, %v14185_v57 }
 0x254   : > { %v2920_v2 = vmul.f32 %v13978_v19, %v2900_v21  ;;  %v5367_v32 = vmul.f32 %v13978_v19, %v5347_v43  ;;  %v2861_v63 = vadd.f32 %v13958_v39, %v2834_v3  ;;  %v14199_v6 = vadd.f32 %v13958_v39, %v5281_v20 }
 0x255   : > { %v5364_v36 = vmul.f32 %v13973_v47, %v5344_v24  ;;  %v2918_v10 = vmul.f32 %v13983_v45, %v2898_v60  ;;  %v5365_v16 = vmul.f32 %v13983_v45, %v5345_v55  ;;  %v2903_v33 = vmax.f32 %v2863_v28, %v2883_v30  ;;  %v14238_v28 = vld [vmem:[#allocation2 + $0x10] sm:$0xff] }
 0x256   : > { %v2934_v44 = vpack.c.bf16 %v2920_v2, %v14135_v11  ;;  %v5381_v53 = vpack.c.bf16 %v5367_v32, %v14140_v1  ;;  %v2881_v25 = vmul.f32 0.01, %v2861_v63  ;;  %v14207_v58 = vmul.f32 0.01, %v14199_v6 }
 0x257   : > { %vm460_vm6 = vcmp.lt.f32.partialorder %v14021_v27, 18.0  ;;  %v2933_v19 = vpack.c.bf16 %v2918_v10, %v14145_v49  ;;  %v5380_v47 = vpack.c.bf16 %v5365_v16, %v5364_v36  ;;  %v14215_v45 = vsub.f32 %v318_v48, %v14023_v38 }
 0x258   : > { %v5759_v11 = vsel %vm15867_vm10, %v13683_v0, 0  ;;  %v14219_v1 = vrot.slane %v2934_v44, 4  ;;  %v14221_v24 = vrot.slane %v5381_v53, 4  ;;  %v14224_v13 = vmul.f32 %v13988_v15, %v2903_v33  ;;  %vm480_vm7 = vmand %vm440_vm4, %vm460_vm6 }
 0x259   : > { %v5350_v18 = vmax.f32 %v14185_v57, %v14193_v34  ;;  %v2957_v49 = vrot.slane %v2933_v19, 4  ;;  %v5403_v52 = vrot.slane %v5380_v47, 4  ;;  %v2837_v59 = vmul.f32 %v14118_v12, %v13937_v50  ;;  %v14240_v57 = vld [vmem:[#allocation2 + $0x18] sm:$0xff]  ;;  %vm15879_vm4 = vmmov %vm15869_vm0 }
 0x25a   : > { %v5284_v48 = vmul.f32 %v14123_v40, %v13937_v50  ;;  %v2901_v38 = vmax.f32 %v2861_v63, %v2881_v25  ;;  %v5348_v0 = vmax.f32 %v14199_v6, %v14207_v58  ;;  %v2835_v9 = vmul.f32 %v13937_v50, %v14125_v7 }
 0x25b   : > { %v5282_v14 = vmul.f32 %v13937_v50, %v14128_v56  ;;  %v2958_v12 = vsel %vm15868_vm13, %v14131_v62, %v2957_v49  ;;  %v2960_v40 = vsel %vm15869_vm0, %v2957_v49, %v14219_v1  ;;  %v5404_v21 = vsel %vm15870_vm8, %v14137_v22, %v5403_v52  ;;  %vm15880_vm13 = vmmov %vm15869_vm0 }
 0x25c   : > { %v5406_v43 = vsel %vm15871_vm2, %v5403_v52, %v14221_v24  ;;  %2984 = vst.msk [vmem:[#allocation2 + $0x30] sm:$0xff] %vm15872_vm14, %v2958_v12  ;;  %v2864_v7 = vadd.f32 %v13958_v39, %v2837_v59  ;;  %v5311_v56 = vadd.f32 %v13958_v39, %v5284_v48  ;;  %v2862_v62 = vadd.f32 %v13958_v39, %v2835_v9  ;;  %vm15881_vm8 = vmmov %vm15861_vm1 }
 0x25d   : > { %2985 = vst.msk [vmem:[#allocation2 + $0x38] sm:$0xff] %vm15873_vm5, %v2960_v40  ;;  %v5309_v3 = vadd.f32 %v13958_v39, %v5282_v14  ;;  %v5464_v22 = vrot.slane %v14238_v28, 2  ;;  %v5466_v20 = vrot.slane %v14240_v57, 2  ;;  %v2840_v60 = vmul.f32 %v14152_v26, %v13937_v50  ;;  %v14324_v40 = vld [vmem:[#allocation2 + $0x20] sm:$0xff]  ;;  %vm15882_vm2 = vmmov %vm15861_vm1 }
 0x25e   : > { %5430 = vst.msk [vmem:[#allocation2 + $0x80] sm:$0xff] %vm15874_vm15, %v5404_v21  ;;  %v5287_v55 = vmul.f32 %v14157_v35, %v13937_v50  ;;  %v2884_v30 = vmul.f32 0.01, %v2864_v7  ;;  %v5331_v34 = vmul.f32 0.01, %v5311_v56  ;;  %v2838_v32 = vmul.f32 %v13937_v50, %v14159_v61  ;;  %vm15883_vm14 = vmmov %vm15869_vm0 }
 0x25f   : > { %5431 = vst.msk [vmem:[#allocation2 + $0x88] sm:$0xff] %vm15861_vm1, %v5406_v43  ;;  %v2882_v2 = vmul.f32 0.01, %v2862_v62  ;;  %v5329_v63 = vmul.f32 0.01, %v5309_v3  ;;  %vm15875_vm12 = vcmask 1045504   ;;  %v14273_v26 = vadd.f32 %v13958_v39, %v2840_v60  ;;  %vm15884_vm5 = vmmov %vm15869_vm0 }
 0x260   : > { %v5465_v6 = vsel %vm15875_vm12, %v5463_v37, %v5464_v22  ;;  %vm15876_vm3 = vmmov %vm15875_vm12  ;;  %v2904_v10 = vmax.f32 %v2864_v7, %v2884_v30  ;;  %v5351_v35 = vmax.f32 %v5311_v56, %v5331_v34  ;;  %v14277_v33 = vadd.f32 %v13958_v39, %v5287_v55 }
 0x261   : > { %v5467_v36 = vsel %vm15876_vm3, %v5464_v22, %v5466_v20  ;;  %v2902_v16 = vmax.f32 %v2862_v62, %v2882_v2  ;;  %11093 = vmatprep.mubr.msk.bf16.mxu0 %vm15877_vm11, %v5465_v6  ;;  %v5370_v37 = vmul.f32 %v13988_v15, %v5350_v18  ;;  %v2921_v61 = vmul.f32 %v13993_v23, %v2901_v38  ;;  %v14334_v62 = vld [vmem:[#allocation2 + $0x28] sm:$0xff]  ;;  %vm15885_vm15 = vmmov %vm15861_vm1 }
 0x262   : > { %v5349_v44 = vmax.f32 %v5309_v3, %v5329_v63  ;;  %11094 = vmatmul.mubr.msk.bf16.vlgmr.msra.gmra.mrb[20].mxu0 %vm15878_vm9, %v5467_v36  ;;  %v5285_v53 = vmul.f32 %v13937_v50, %v14167_v29  ;;  %v2924_v25 = vmul.f32 %v14006_v31, %v2904_v10  ;;  %v5371_v58 = vmul.f32 %v14006_v31, %v5351_v35  ;;  %vm15887_vm11 = vmmov %vm15861_vm1 }
 0x263   : > { %v2922_v19 = vmul.f32 %v14011_v46, %v2902_v16  ;;  %v14297_v15 = vmul.f32 0.01, %v14273_v26  ;;  %11114 = vmatpush3.bf16.msra.mxu0 %v5759_v11  ;;  %v5368_v47 = vmul.f32 %v13993_v23, %v5348_v0  ;;  %v5334_v29 = vmul.f32 0.01, %v14277_v33  ;;  %v14336_v3 = vld [vmem:[#allocation2 + $0x30] sm:$0xff]  ;;  %vm15888_vm9 = vmmov %vm15876_vm3 }
 0x264   : > { %v5369_v18 = vmul.f32 %v14011_v46, %v5349_v44  ;;  %v14303_v49 = vadd.f32 %v13958_v39, %v2838_v32  ;;  %12147 = vmatprep.subr.msk.bf16.mxu0 %vm15879_vm4, %v14282_v54  ;;  %v2936_v31 = vpack.c.bf16 %v2924_v25, %v14224_v13  ;;  %v5383_v27 = vpack.c.bf16 %v5371_v58, %v5370_v37  ;;  %vm15890_vm4 = vmmov %vm15861_vm1 }
 0x265   : > { %v2935_v52 = vpack.c.bf16 %v2922_v19, %v2921_v61  ;;  %v9780_v59 = vsel %vm480_vm7, 1.0, %v12302_v8  ;;  %v14310_v11 = vadd.f32 %v13958_v39, %v5285_v53  ;;  %vm438_vm6 = vcmp.ge.f32.partialorder %v14215_v45, 2.0  ;;  %vm15889_vm7 = vmmov %vm15876_vm3 }
 0x266   : > { %v5382_v48 = vpack.c.bf16 %v5369_v18, %v5368_v47  ;;  %vm458_vm10 = vcmp.lt.f32.partialorder %v14215_v45, 18.0  ;;  %v14314_v23 = vrot.slane %v2936_v31, 4  ;;  %v14316_v46 = vrot.slane %v5383_v27, 4 }
 0x267   : > { %v2961_v38 = vrot.slane %v2935_v52, 4  ;;  %v2907_v13 = vmax.f32 %v14273_v26, %v14297_v15  ;;  %v5354_v9 = vmax.f32 %v14277_v33, %v5334_v29  ;;  %v2885_v14 = vmul.f32 0.01, %v14303_v49  ;;  %vm478_vm12 = vmand %vm438_vm6, %vm458_vm10  ;;  %v14364_v26 = vld [vmem:[#allocation2 + $0x38] sm:$0xff] }
 0x268   : > { %v5407_v0 = vrot.slane %v5382_v48, 4  ;;  %v2841_v12 = vmul.f32 %v14169_v5, %v13937_v50  ;;  %v5288_v7 = vmul.f32 %v14177_v51, %v13937_v50  ;;  %v2839_v56 = vmul.f32 %v13937_v50, %v14179_v42  ;;  %15886 = vst [vmem:[#allocation3_spill] sm:$0xff] %v14364_v26  ;;  %vm15891_vm6 = vmmov %vm15861_vm1 }
 0x269   : > { %v2962_v21 = vsel %vm15880_vm13, %v14219_v1, %v2961_v38  ;;  %v2964_v43 = vsel %vm15869_vm0, %v2961_v38, %v14314_v23  ;;  %v5332_v22 = vmul.f32 0.01, %v14310_v11  ;;  %v5286_v60 = vmul.f32 %v13937_v50, %v14187_v4  ;;  %vm15892_vm10 = vmmov %vm15876_vm3 }
 0x26a   : > { %2986 = vst.msk [vmem:[#allocation2 + $0x40] sm:$0xff] %vm15881_vm8, %v2962_v21  ;;  %v5408_v5 = vsel %vm15883_vm14, %v14221_v24, %v5407_v0  ;;  %v5410_v1 = vsel %vm15884_vm5, %v5407_v0, %v14316_v46  ;;  %v2868_v51 = vadd.f32 %v13958_v39, %v2841_v12  ;;  %v5315_v42 = vadd.f32 %v13958_v39, %v5288_v7  ;;  %vm15893_vm13 = vmmov %vm15876_vm3  ;;  %v5437_v0 = vld [vmem:[#allocation2 + $0x8] sm:$0xfe] }
 0x26b   : > { %2987 = vst.msk [vmem:[#allocation2 + $0x48] sm:$0xff] %vm15882_vm2, %v2964_v43  ;;  %v2866_v24 = vadd.f32 %v13958_v39, %v2839_v56  ;;  %v5468_v55 = vrot.slane %v14324_v40, 2  ;;  %v2905_v30 = vmax.f32 %v14303_v49, %v2885_v14  ;;  %v5470_v2 = vrot.slane %v14334_v62, 2  ;;  %vm15896_vm2 = vmmov %vm15884_vm5 }
 0x26c   : > { %5432 = vst.msk [vmem:[#allocation2 + $0x90] sm:$0xff] %vm15885_vm15, %v5408_v5  ;;  %v2888_v34 = vmul.f32 0.01, %v2868_v51  ;;  %v5472_v32 = vrot.slane %v14336_v3, 2  ;;  %v5335_v63 = vmul.f32 0.01, %v5315_v42  ;;  %v5313_v36 = vadd.f32 %v13958_v39, %v5286_v60  ;;  %vm15897_vm14 = vmmov %vm15896_vm2 }
 0x26d   : > { %5433 = vst.msk [vmem:[#allocation2 + $0x98] sm:$0xff] %vm15861_vm1, %v5410_v1  ;;  %v2886_v6 = vmul.f32 0.01, %v2866_v24  ;;  %v5469_v45 = vsel %vm15876_vm3, %v5466_v20, %v5468_v55  ;;  %v9778_v4 = vsel %vm478_vm12, 1.0, %v12302_v8  ;;  %v5471_v10 = vsel %vm15888_vm9, %v5468_v55, %v5470_v2  ;;  %vm15898_vm5 = vmmov %vm15861_vm1 }
 0x26e   : > { %v2908_v50 = vmax.f32 %v2868_v51, %v2888_v34  ;;  %11097 = vmatprep.mubr.msk.bf16.mxu0 %vm15887_vm11, %v5469_v45  ;;  %v5473_v35 = vsel %vm15889_vm7, %v5470_v2, %v5472_v32  ;;  %v5352_v16 = vmax.f32 %v14310_v11, %v5332_v22  ;;  %v5355_v33 = vmax.f32 %v5315_v42, %v5335_v63  ;;  %vm15899_vm15 = vmmov %vm15861_vm1 }
 0x26f   : > { %v2906_v37 = vmax.f32 %v2866_v24, %v2886_v6  ;;  %v5333_v39 = vmul.f32 0.01, %v5313_v36  ;;  %11098 = vmatmul.mubr.msk.bf16.gmra.mrb[24].mxu0 %vm15890_vm4, %v5471_v10  ;;  %v2927_v20 = vmul.f32 %v14031_v41, %v2907_v13  ;;  %v5374_v61 = vmul.f32 %v14031_v41, %v5354_v9  ;;  %vm15900_vm12 = vmmov %vm15861_vm1  ;;  %v14405_v24 = vld [vmem:[#allocation2 + $0x70] sm:$0xff] }
 0x270   : > { %v2928_v44 = vmul.f32 %v9780_v59, %v2908_v50  ;;  %11101 = vmatprep.mubr.msk.bf16.mxu0 %vm15891_vm6, %v5473_v35  ;;  %v5474_v8 = vrot.slane %v14364_v26, 2  ;;  %v2925_v53 = vmul.f32 %v14092_v17, %v2905_v30  ;;  %v5375_v25 = vmul.f32 %v9780_v59, %v5355_v33  ;;  %vm15901_vm3 = vmmov %vm15896_vm2  ;;  %15906 = vst [vmem:[#allocation4_spill] sm:$0xff] %v14405_v24 }
 0x271   : > { %v2926_v58 = vmul.f32 %v9778_v4, %v2906_v37  ;;  %v5353_v19 = vmax.f32 %v5313_v36, %v5333_v39  ;;  %v14377_v15 = vld [vmem:[#allocation2 + $0x40] sm:$0xff]  ;;  %v5372_v29 = vmul.f32 %v14092_v17, %v5352_v16  ;;  %vm15894_vm0 = vcmask 60416   ;;  %vm15902_vm11 = vmmov %vm15896_vm2 }
 0x272   : > { %v2938_v47 = vpack.c.bf16 %v2928_v44, %v2927_v20  ;;  %v5476_v18 = vrot.slane %v14377_v15, 2  ;;  %v5385_v49 = vpack.c.bf16 %v5375_v25, %v5374_v61  ;;  %v5475_v52 = vsel %vm15892_vm10, %v5472_v32, %v5474_v8  ;;  %v14383_v13 = vld [vmem:[#allocation2 + $0x48] sm:$0xff]  ;;  %vm15895_vm8 = vmmov %vm15894_vm0 }
 0x273   : > { %v2937_v31 = vpack.c.bf16 %v2926_v58, %v2925_v53  ;;  %v5373_v41 = vmul.f32 %v9778_v4, %v5353_v19  ;;  %v5478_v12 = vrot.slane %v14383_v13, 2  ;;  %v5631_v7 = vshrl.u32 %v5437_v0, 16  ;;  %vm15903_vm9 = vmmov %vm15861_vm1  ;;  %v12291_v4 = vld [vmem:[%s15680_s4] sm:$0xf]  ;;  %v14450_v53 = vld [vmem:[%s15680_s4 + $0x8] sm:$0xf] }
 0x274   : > { %v2967_v27 = vrot.slane %v2938_v47, 4  ;;  %v5413_v48 = vrot.slane %v5385_v49, 4  ;;  %v5477_v59 = vsel %vm15893_vm13, %v5474_v8, %v5476_v18  ;;  %vm15904_vm7 = vmmov %vm15861_vm1  ;;  %v15734_v56 = vshrl.u32 %v14238_v28, 16  ;;  %v14455_v19 = vld [vmem:[#allocation2 + $0x78] sm:$0xff]  ;;  %v14458_v47 = vld [vmem:[#allocation2 + $0x80] sm:$0xff] }
 0x275   : > { %v2965_v11 = vrot.slane %v2937_v31, 4  ;;  %v5384_v38 = vpack.c.bf16 %v5373_v41, %v5372_v29  ;;  %v15733_v5 = vshll.u32 %v14238_v28, 16  ;;  %vm15905_vm4 = vmmov %vm15892_vm10  ;;  %v5633_v51 = vrot.slane %v5631_v7, 1  ;;  %15920 = vst [vmem:[#allocation7_spill] sm:$0xff] %v14458_v47 }
 0x276   : > { %2990 = vst.msk [vmem:[#allocation2 + $0x60] sm:$0xf] %vm15894_vm0, %v2967_v27  ;;  %v5479_v1 = vsel %vm15905_vm4, %v5476_v18, %v5478_v12  ;;  %v5641_v60 = vrot.slane %v15734_v56, 1  ;;  %vm15908_vm6 = vmmov %vm15861_vm1  ;;  %v7604_v45 = vrot.slane %v14405_v24, 2  ;;  %v14433_v37 = vshrl.u32 %v14240_v57, 16 }
 0x277   : > { %5436 = vst.msk [vmem:[#allocation2 + $0xb0] sm:$0xf] %vm15895_vm8, %v5413_v48  ;;  %v2966_v17 = vsel %vm15896_vm2, %v14314_v23, %v2965_v11  ;;  %v2968_v9 = vsel %vm15897_vm14, %v2965_v11, %v2967_v27  ;;  %v5411_v14 = vrot.slane %v5384_v38, 4  ;;  %11102 = vmatmul.mubr.msk.bf16.gmra.mrb[28].mxu0 %vm15898_vm5, %v5475_v52  ;;  %v5634_v23 = vshll.u32 %v5437_v0, 16  ;;  %vm15909_vm10 = vmmov %vm15896_vm2 }
 0x278   : > { %2988 = vst.msk [vmem:[#allocation2 + $0x50] sm:$0xff] %vm15899_vm15, %v2966_v17  ;;  %11105 = vmatprep.mubr.msk.bf16.mxu0 %vm15900_vm12, %v5477_v59  ;;  %v5644_v55 = vrot.slane %v15733_v5, 2  ;;  %v7895_v10 = vsel %vm15909_vm10, %v12291_v4, 0  ;;  %vm15910_vm13 = vmmov %vm15905_vm4  ;;  %v14436_v39 = vshll.u32 %v14240_v57, 16  ;;  %v14442_v44 = vshrl.u32 %v14324_v40, 16 }
 0x279   : > { %2989 = vst.msk [vmem:[#allocation2 + $0x58] sm:$0xff] %vm15861_vm1, %v2968_v9  ;;  %v5412_v21 = vsel %vm15901_vm3, %v14316_v46, %v5411_v14  ;;  %v5414_v43 = vsel %vm15902_vm11, %v5411_v14, %v5413_v48  ;;  %v5636_v42 = vrot.slane %v5634_v23, 2  ;;  %v14407_v46 = vld [vmem:[#allocation2 + $0x68] sm:$0xff]  ;;  %vm15911_vm0 = vmmov %vm15905_vm4  ;;  %v14445_v8 = vshll.u32 %v14324_v40, 16 }
 0x27a   : > { %5434 = vst.msk [vmem:[#allocation2 + $0xa0] sm:$0xff] %vm15903_vm9, %v5412_v21  ;;  %15907 = vst [vmem:[#allocation5_spill] sm:$0xff] %v14407_v46  ;;  %v7602_v50 = vrot.slane %v14407_v46, 2  ;;  %v5645_v61 = vor.u32 %v5644_v55, %v5641_v60  ;;  %v5650_v18 = vrot.slane %v14433_v37, 1  ;;  %v5653_v29 = vrot.slane %v14436_v39, 2  ;;  %v14489_v21 = vld [vmem:[#allocation2 + $0x90] sm:$0xff] }
 0x27b   : > { %5435 = vst.msk [vmem:[#allocation2 + $0xa8] sm:$0xff] %vm15904_vm7, %v5414_v43  ;;  %v5637_v35 = vor.u32 %v5636_v42, %v5633_v51  ;;  %vm15912_vm8 = vmmov %vm15861_vm1  ;;  %vm15922_vm9 = vsmask.f32 6400  ;;  %v7606_v31 = vrot.slane %v14455_v19, 2  ;;  %v5659_v41 = vrot.slane %v14442_v44, 1 }
 0x27c   : > { %vm15913_vm2 = vmmov %vm15861_vm1  ;;  %15915 = vst [vmem:[#allocation6_spill] sm:$0xff] %v14445_v8  ;;  %v5662_v27 = vrot.slane %v14445_v8, 2  ;;  %v7608_v52 = vrot.slane %v14458_v47, 2  ;;  %v5654_v48 = vor.u32 %v5653_v29, %v5650_v18  ;;  %v14472_v11 = vshrl.u32 %v14334_v62, 16  ;;  %v14499_v51 = vld [vmem:[%s15680_s4 + $0x10] sm:$0xf] }
 0x27d   : > { %v14403_v22 = vld [vmem:[#allocation2 + $0x60] sm:$0xff]  ;;  %vm15914_vm14 = vmmov %vm15911_vm0  ;;  %v5646_v49 = vsel %vm15922_vm9, %v5637_v35, %v5645_v61  ;;  %v14475_v38 = vshll.u32 %v14334_v62, 16  ;;  %v14479_v17 = vshrl.u32 %v14336_v3, 16  ;;  %v14482_v9 = vshll.u32 %v14336_v3, 16 }
 0x27e   : > { %v7600_v2 = vrot.slane %v14403_v22, 2  ;;  %vm15916_vm5 = vmmov %vm15911_vm0  ;;  %15924 = vst [vmem:[#allocation8_spill] sm:$0xff] %v14472_v11  ;;  %v5663_v0 = vor.u32 %v5662_v27, %v5659_v41  ;;  %v5668_v23 = vrot.slane %v14472_v11, 1  ;;  %v14518_v4 = vshrl.u32 %v14377_v15, 16 }
 0x27f   : > { %11106 = vmatmul.mubr.msk.bf16.gmra.mrb[32].mxu0 %vm15908_vm6, %v5479_v1  ;;  %v14414_v30 = vld [vmem:[#allocation2 + $0x50] sm:$0xff]  ;;  %vm15917_vm15 = vmmov %vm15861_vm1  ;;  %15925 = vst [vmem:[#allocation9_spill] sm:$0xff] %v14475_v38  ;;  %v5671_v1 = vrot.slane %v14475_v38, 2  ;;  %v5677_v55 = vrot.slane %v14479_v17, 1 }
 0x280   : > { %v14416_v34 = vld [vmem:[#allocation2 + $0x58] sm:$0xfc]  ;;  %v14419_v32 = vld [vmem:[#allocation2 + $0x58] sm:$0x3]  ;;  %v5480_v63 = vrot.slane %v14414_v30, 2  ;;  %v7603_v20 = vsel %vm15914_vm14, %v7600_v2, %v7602_v50  ;;  %vm15918_vm1 = vmmov %vm15911_vm0  ;;  %15927 = vst [vmem:[#allocation10_spill] sm:$0xff] %v14479_v17 }
 0x281   : > { %v7599_v6 = vrot.slane %v14416_v34, 2  ;;  %v5482_v36 = vrot.slane %v14419_v32, 2  ;;  %v7605_v58 = vsel %vm15918_vm1, %v7602_v50, %v7604_v45  ;;  %vm15919_vm12 = vmmov %vm15913_vm2  ;;  %15928 = vst [vmem:[#allocation11_spill] sm:$0xff] %v14482_v9 }
 0x282   : > { %v5481_v16 = vsel %vm15910_vm13, %v5478_v12, %v5480_v63  ;;  %vm15921_vm11 = vmmov %vm15913_vm2  ;;  %v14486_v12 = vld [vmem:[#allocation2 + $0x88] sm:$0xff]  ;;  %15939 = vst [vmem:[#allocation14_spill] sm:$0xff] %v14518_v4 }
 0x283   : > { %v7601_v33 = vsel %vm15911_vm0, %v7599_v6, %v7600_v2  ;;  %11109 = vmatprep.mubr.msk.bf16.mxu0 %vm15912_vm8, %v5481_v16  ;;  %v5483_v25 = vsel %vm15916_vm5, %v5480_v63, %v5482_v36  ;;  %vm15923_vm7 = vmmov %vm15913_vm2  ;;  %15931 = vst [vmem:[#allocation12_spill] sm:$0xff] %v14486_v12  ;;  %v7610_v60 = vrot.slane %v14486_v12, 2  ;;  %v7612_v2 = vrot.slane %v14489_v21, 2  ;;  %v14525_v16 = vld [vmem:[#allocation2 + $0x98] sm:$0xff] }
 0x284   : > { %11291 = vmatprep.mubr.msk.bf16.mxu1 %vm15913_vm2, %v7601_v33  ;;  %vm15926_vm4 = vmmov %vm15911_vm0  ;;  %v14509_v63 = vshrl.u32 %v14364_v26, 16  ;;  %v14512_v6 = vshll.u32 %v14364_v26, 16  ;;  %v5672_v36 = vor.u32 %v5671_v1, %v5668_v23  ;;  %v7614_v29 = vrot.slane %v14525_v16, 2 }
 0x285   : > { %11292 = vmatmul.mubr.msk.bf16.vlgmr.msra.gmra.mrb[20].mxu1 %vm15917_vm15, %v7603_v20  ;;  %v7607_v59 = vsel %vm15926_vm4, %v7604_v45, %v7606_v31  ;;  %vm15929_vm6 = vmmov %vm15913_vm2  ;;  %v7611_v45 = vsel %vm15918_vm1, %v7608_v52, %v7610_v60  ;;  %v15731_v23 = vshll.u32 %v14403_v22, 16 }
 0x286   : > { %11312 = vmatpush3.bf16.msra.mxu1 %v7895_v10  ;;  %11295 = vmatprep.mubr.msk.bf16.mxu1 %vm15919_vm12, %v7605_v58  ;;  %vm15930_vm10 = vmmov %vm15911_vm0  ;;  %15937 = vst [vmem:[#allocation13_spill] sm:$0xff] %v14512_v6  ;;  %v14521_v10 = vshll.u32 %v14377_v15, 16  ;;  %v5686_v33 = vrot.slane %v14509_v63, 1  ;;  %v5689_v20 = vrot.slane %v14512_v6, 2 }
 0x287   : > { %12156 = vmatprep.subr.msk.bf16.mxu1 %vm15901_vm3, %v14450_v53  ;;  %11110 = vmatmul.mubr.msk.bf16.gmra.mrb[36].mxu0 %vm15921_vm11, %v5483_v25  ;;  %v7609_v14 = vsel %vm15930_vm10, %v7606_v31, %v7608_v52  ;;  %vm15932_vm13 = vmmov %vm15913_vm2  ;;  %v7574_v25 = vld [vmem:[#allocation2 + $0x58] sm:$0xfe] }
 0x288   : > { %11115 = vmatprep.mubr.msk.bf16.mxu0 %vm15923_vm7, %v5646_v49  ;;  %vm15933_vm0 = vmmov %vm15901_vm3  ;;  %15940 = vst [vmem:[#allocation15_spill] sm:$0xff] %v14521_v10  ;;  %v5695_v49 = vrot.slane %v14518_v4, 1  ;;  %v5698_v31 = vrot.slane %v14521_v10, 2  ;;  %v7767_v27 = vshrl.u32 %v7574_v25, 16  ;;  %v7770_v52 = vshll.u32 %v7574_v25, 16 }
 0x289   : > { %v5961_v43 = vsel %vm15933_vm0, %v14282_v54, 0  ;;  %vm15934_vm8 = vmmov %vm15922_vm9  ;;  %v5680_v54 = vrot.slane %v14482_v9, 2 }
 0x28a   : > { %v5655_v7 = vsel %vm15934_vm8, %v5645_v61, %v5654_v48  ;;  %vm15935_vm14 = vmmov %vm15934_vm8  ;;  %v14530_v61 = vld [vmem:[#allocation2 + $0xa0] sm:$0xff] }
 0x28b   : > { %v5664_v42 = vsel %vm15935_vm14, %v5654_v48, %v5663_v0  ;;  %vm15936_vm5 = vmmov %vm15913_vm2  ;;  %v5681_v50 = vor.u32 %v5680_v54, %v5677_v55  ;;  %v7616_v41 = vrot.slane %v14530_v61, 2  ;;  %v5690_v48 = vor.u32 %v5689_v20, %v5686_v33  ;;  %v14557_v55 = vld [vmem:[#allocation2 + $0xa8] sm:$0x3] }
 0x28c   : > { %vm15938_vm15 = vmmov %vm15933_vm0  ;;  %v7769_v54 = vrot.slane %v7767_v27, 1  ;;  %v14574_v27 = vshrl.u32 %v14405_v24, 16 }
 0x28d   : > { %11296 = vmatmul.mubr.msk.bf16.gmra.mrb[24].mxu1 %vm15929_vm6, %v7607_v59  ;;  %vm15941_vm12 = vmmov %vm15913_vm2  ;;  %v14541_v59 = vshrl.u32 %v14383_v13, 16 }
 0x28e   : > { %11299 = vmatprep.mubr.msk.bf16.mxu1 %vm15932_vm13, %v7609_v14  ;;  %vm15942_vm3 = vmmov %vm15918_vm1  ;;  %v14547_v14 = vshrl.u32 %v14414_v30, 16  ;;  %v7795_v56 = vrot.slane %v14574_v27, 1 }
 0x28f   : > { %11116 = vmatmul.mubr.msk.bf16.vlgmr.msra.gmra.mrb[20].mxu0 %vm15913_vm2, %v5655_v7  ;;  %v7613_v35 = vsel %vm15942_vm3, %v7610_v60, %v7612_v2  ;;  %vm15943_vm11 = vmmov %vm15913_vm2  ;;  %v15732_v7 = vshrl.u32 %v14403_v22, 16 }
 0x290   : > { %11119 = vmatprep.mubr.msk.bf16.mxu0 %vm15936_vm5, %v5664_v42  ;;  %11136 = vmatpush3.bf16.msra.mxu0 %v5961_v43  ;;  %vm15944_vm9 = vmmov %vm15934_vm8  ;;  %v14550_v43 = vshll.u32 %v14414_v30, 16  ;;  %v5699_v42 = vor.u32 %v5698_v31, %v5695_v49  ;;  %v5713_v20 = vrot.slane %v14547_v14, 1  ;;  %v12292_v49 = vld [vmem:[#allocation2 + $0x8] sm:$0xfc] }
 0x291   : > { %12148 = vmatprep.subr.msk.bf16.mxu0 %vm15938_vm15, %v14499_v51  ;;  %v5673_v58 = vsel %vm15944_vm9, %v5663_v0, %v5672_v36  ;;  %vm15945_vm7 = vmmov %vm15913_vm2  ;;  %v14544_v0 = vshll.u32 %v14383_v13, 16  ;;  %v7777_v25 = vrot.slane %v15732_v7, 1  ;;  %v5878_v31 = vshrl.u32 %v12292_v49, 16 }
 0x292   : > { %vm15946_vm4 = vmmov %vm15934_vm8 }
 0x293   : > { %v5682_v18 = vsel %vm15946_vm4, %v5672_v36, %v5681_v50  ;;  %vm15947_vm6 = vmmov %vm15913_vm2  ;;  %v7772_v36 = vrot.slane %v7770_v52, 2  ;;  %v5707_v33 = vrot.slane %v14544_v0, 2  ;;  %v14577_v52 = vshll.u32 %v14405_v24, 16 }
 0x294   : > { %vm15948_vm10 = vmmov %vm15918_vm1 }
 0x295   : > { %11300 = vmatmul.mubr.msk.bf16.gmra.mrb[28].mxu1 %vm15941_vm12, %v7611_v45  ;;  %v7615_v1 = vsel %vm15948_vm10, %v7612_v2, %v7614_v29  ;;  %vm15949_vm13 = vmmov %vm15913_vm2  ;;  %v5716_v2 = vrot.slane %v14550_v43, 2  ;;  %vm15965_vm10 = vcmask 1043456  }
 0x296   : > { %11303 = vmatprep.mubr.msk.bf16.mxu1 %vm15943_vm11, %v7613_v35  ;;  %vm15950_vm0 = vmmov %vm15918_vm1  ;;  %v5704_v35 = vrot.slane %v14541_v59, 1 }
 0x297   : > { %11120 = vmatmul.mubr.msk.bf16.gmra.mrb[24].mxu0 %vm15945_vm7, %v5673_v58  ;;  %v7617_v60 = vsel %vm15950_vm0, %v7614_v29, %v7616_v41  ;;  %vm15951_vm8 = vmmov %vm15946_vm4  ;;  %v7780_v58 = vrot.slane %v15731_v23, 2  ;;  %v7773_v29 = vor.u32 %v7772_v36, %v7769_v54  ;;  %v5717_v54 = vor.u32 %v5716_v2, %v5713_v20 }
 0x298   : > { %11123 = vmatprep.mubr.msk.bf16.mxu0 %vm15947_vm6, %v5682_v18  ;;  %v5691_v45 = vsel %vm15951_vm8, %v5681_v50, %v5690_v48  ;;  %vm15952_vm14 = vmmov %vm15913_vm2  ;;  %v7618_v18 = vrot.slane %v14557_v55, 2  ;;  %v5881_v23 = vshll.u32 %v12292_v49, 16  ;;  %v5880_v20 = vrot.slane %v5878_v31, 2 }
 0x299   : > { %vm15953_vm5 = vmmov %vm15946_vm4  ;;  %v7781_v36 = vor.u32 %v7780_v58, %v7777_v25  ;;  %v15962_v2 = vshrl.u32 %v14238_v28, 16  ;;  %v15963_v58 = vshll.u32 %v14238_v28, 16  ;;  %v14610_v49 = vshrl.u32 %v14458_v47, 16 }
 0x29a   : > { %v5700_v50 = vsel %vm15953_vm5, %v5690_v48, %v5699_v42  ;;  %vm15954_vm15 = vmmov %vm15913_vm2  ;;  %v14585_v48 = vshll.u32 %v14407_v46, 16  ;;  %v15739_v28 = vrot.slane %v14324_v40, 4 }
 0x29b   : > { %vm15955_vm1 = vmmov %vm15950_vm0  ;;  %v5885_v25 = vrot.slane %v15962_v2, 2 }
 0x29c   : > { %v7619_v7 = vsel %vm15955_vm1, %v7616_v41, %v7618_v18  ;;  %vm15956_vm12 = vmmov %vm15913_vm2  ;;  %v14603_v18 = vshrl.u32 %v14455_v19, 16 }
 0x29d   : > { %11304 = vmatmul.mubr.msk.bf16.gmra.mrb[32].mxu1 %vm15949_vm13, %v7615_v1  ;;  %v5720_v1 = vshrl.u32 %v14419_v32, 16  ;;  %vm15957_vm3 = vmmov %vm15946_vm4 }
 0x29e   : > { %11307 = vmatprep.mubr.msk.bf16.mxu1 %vm15913_vm2, %v7617_v60  ;;  %v5723_v60 = vshll.u32 %v14419_v32, 16  ;;  %v7782_v5 = vsel %vm15957_vm3, %v7773_v29, %v7781_v36  ;;  %v7798_v32 = vrot.slane %v14577_v52, 2  ;;  %vm15958_vm11 = vmmov %vm15913_vm2  ;;  %v14606_v29 = vshll.u32 %v14455_v19, 16 }
 0x29f   : > { %11124 = vmatmul.mubr.msk.bf16.gmra.mrb[28].mxu0 %vm15952_vm14, %v5691_v45  ;;  %v14582_v45 = vshrl.u32 %v14407_v46, 16  ;;  %v5722_v24 = vrot.slane %v5720_v1, 1  ;;  %vm15959_vm9 = vmmov %vm15957_vm3 }
 0x2a0   : > { %11127 = vmatprep.mubr.msk.bf16.mxu0 %vm15954_vm15, %v5700_v50  ;;  %v5708_v50 = vor.u32 %v5707_v33, %v5704_v35  ;;  %v5725_v26 = vrot.slane %v5723_v60, 2  ;;  %v7789_v35 = vrot.slane %v14585_v48, 2  ;;  %vm15960_vm7 = vmmov %vm15957_vm3  ;;  %v8096_v60 = vsel %vm15965_vm10, %v14450_v53, 0 }
 0x2a1   : > { %v7786_v46 = vrot.slane %v14582_v45, 1  ;;  %vm15961_vm4 = vmmov %vm15913_vm2 }
 0x2a2   : > { %v5709_v33 = vsel %vm15959_vm9, %v5699_v42, %v5708_v50  ;;  %v5718_v41 = vsel %vm15960_vm7, %v5708_v50, %v5717_v54  ;;  %vm15964_vm6 = vmmov %vm15913_vm2  ;;  %v7799_v42 = vor.u32 %v7798_v32, %v7795_v56  ;;  %v5726_v31 = vor.u32 %v5725_v26, %v5722_v24  ;;  %v14625_v26 = vld [vmem:[%s15680_s4 + $0x10] sm:$0xf] }
 0x2a3   : > { %v7790_v1 = vor.u32 %v7789_v35, %v7786_v46  ;;  %vm15966_vm13 = vmmov %vm15957_vm3  ;;  %v7804_v56 = vrot.slane %v14603_v18, 1  ;;  %v7807_v32 = vrot.slane %v14606_v29, 2  ;;  %v7813_v46 = vrot.slane %v14610_v49, 1 }
 0x2a4   : > { %vm15967_vm0 = vmmov %vm15913_vm2 }
 0x2a5   : > { %11308 = vmatmul.mubr.msk.bf16.gmra.mrb[36].mxu1 %vm15956_vm12, %v7619_v7  ;;  %v5883_v7 = vrot.slane %v5881_v23, 3  ;;  %v14613_v23 = vshll.u32 %v14458_v47, 16  ;;  %v7791_v2 = vsel %vm15966_vm13, %v7781_v36, %v7790_v1  ;;  %vm15968_vm8 = vmmov %vm15957_vm3  ;;  %vm15974_vm12 = vsmask.f32 5376 }
 0x2a6   : > { %11313 = vmatprep.mubr.msk.bf16.mxu1 %vm15958_vm11, %v7782_v5  ;;  %v5886_v5 = vrot.slane %v15963_v58, 3  ;;  %v7800_v24 = vsel %vm15968_vm8, %v7790_v1, %v7799_v42  ;;  %vm15969_vm2 = vmmov %vm15965_vm10  ;;  %v5894_v58 = vrot.slane %v14445_v8, 3  ;;  %v14648_v1 = vshll.u32 %v14486_v12, 16 }
 0x2a7   : > { %11128 = vmatmul.mubr.msk.bf16.gmra.mrb[32].mxu0 %vm15961_vm4, %v5709_v33  ;;  %v5884_v50 = vor.u32 %v5883_v7, %v5880_v20  ;;  %v15738_v33 = vrot.slane %v14334_v62, 4  ;;  %v7816_v53 = vrot.slane %v14613_v23, 2  ;;  %vm15970_vm14 = vmmov %vm15957_vm3  ;;  %v5889_v20 = vrot.slane %v14433_v37, 2 }
 0x2a8   : > { %11131 = vmatprep.mubr.msk.bf16.mxu0 %vm15964_vm6, %v5718_v41  ;;  %v5887_v41 = vor.u32 %v5886_v5, %v5885_v25  ;;  %v5727_v35 = vsel %vm15970_vm14, %v5717_v54, %v5726_v31  ;;  %vm15971_vm5 = vmmov %vm15967_vm0  ;;  %v5890_v7 = vrot.slane %v14436_v39, 3  ;;  %v5893_v25 = vrot.slane %v14442_v44, 2 }
 0x2a9   : > { %v14636_v36 = vsel %vm15969_vm2, %v15739_v28, %v15738_v33  ;;  %v14645_v5 = vshrl.u32 %v14486_v12, 16  ;;  %vm15972_vm15 = vmmov %vm15969_vm2  ;;  %v7808_v31 = vor.u32 %v7807_v32, %v7804_v56  ;;  %v14660_v33 = vshll.u32 %v14489_v21, 16 }
 0x2aa   : > { %vm15973_vm1 = vmmov %vm15967_vm0  ;;  %v5888_v54 = vsel %vm15974_vm12, %v5884_v50, %v5887_v41  ;;  %v5891_v28 = vor.u32 %v5890_v7, %v5889_v20  ;;  %v6136_v12 = vrot.slane %v14383_v13, 4  ;;  %v5895_v47 = vor.u32 %v5894_v58, %v5893_v25 }
 0x2ab   : > { %vm15975_vm3 = vmmov %vm15967_vm0  ;;  %v7825_v50 = vrot.slane %v14648_v1, 2  ;;  %v15745_v56 = vrot.slane %v14414_v30, 4  ;;  %v7834_v20 = vrot.slane %v14660_v33, 2  ;;  %v5897_v25 = vrot.slane %v14472_v11, 2 }
 0x2ac   : > { %vm15976_vm11 = vmmov %vm15960_vm7  ;;  %v5898_v58 = vrot.slane %v14475_v38, 3  ;;  %v5902_v8 = vrot.slane %v14482_v9, 3 }
 0x2ad   : > { %11314 = vmatmul.mubr.msk.bf16.vlgmr.msra.gmra.mrb[20].mxu1 %vm15967_vm0, %v7791_v2  ;;  %v7817_v2 = vor.u32 %v7816_v53, %v7813_v46  ;;  %v7809_v32 = vsel %vm15976_vm11, %v7799_v42, %v7808_v31  ;;  %vm15977_vm9 = vmmov %vm15969_vm2 }
 0x2ae   : > { %11334 = vmatpush3.bf16.msra.mxu1 %v8096_v60  ;;  %11317 = vmatprep.mubr.msk.bf16.mxu1 %vm15971_vm5, %v7800_v24  ;;  %v15742_v60 = vrot.slane %v14377_v15, 4  ;;  %v14657_v24 = vshrl.u32 %v14489_v21, 16  ;;  %vm15978_vm7 = vmmov %vm15967_vm0 }
 0x2af   : > { %12157 = vmatprep.subr.msk.bf16.mxu1 %vm15972_vm15, %v14625_v26  ;;  %11132 = vmatmul.mubr.msk.bf16.gmra.mrb[36].mxu0 %vm15973_vm1, %v5727_v35  ;;  %v7822_v35 = vrot.slane %v14645_v5, 1  ;;  %vm15979_vm4 = vmmov %vm15968_vm8 }
 0x2b0   : > { %11137 = vmatprep.mubr.msk.bf16.mxu0 %vm15975_vm3, %v5888_v54  ;;  %v14670_v46 = vsel %vm15977_vm9, %v15742_v60, %v6136_v12  ;;  %v7818_v53 = vsel %vm15979_vm4, %v7808_v31, %v7817_v2  ;;  %v7831_v13 = vrot.slane %v14657_v24, 1  ;;  %vm15980_vm6 = vmmov %vm15969_vm2  ;;  %v5901_v60 = vrot.slane %v14479_v17, 2 }
 0x2b1   : > { %v14679_v7 = vsel %vm15980_vm6, %v6136_v12, %v15745_v56  ;;  %vm15981_vm10 = vmmov %vm15974_vm12  ;;  %v14693_v12 = vld [vmem:[%s15680_s4 + $0xc] sm:$0xf] }
 0x2b2   : > { %v5892_v42 = vsel %vm15981_vm10, %v5887_v41, %v5891_v28  ;;  %vm15982_vm13 = vmmov %vm15967_vm0  ;;  %v14697_v41 = vshrl.u32 %v14525_v16, 16  ;;  %v5903_v56 = vor.u32 %v5902_v8, %v5901_v60  ;;  %v5906_v8 = vrot.slane %v14512_v6, 3 }
 0x2b3   : > { %vm15983_vm0 = vmmov %vm15969_vm2 }
 0x2b4   : > { %v6175_v54 = vsel %vm15983_vm0, %v14499_v51, 0  ;;  %vm15984_vm8 = vmmov %vm15981_vm10  ;;  %v14703_v51 = vshrl.u32 %v14530_v61, 16  ;;  %v7840_v9 = vrot.slane %v14697_v41, 1 }
 0x2b5   : > { %11318 = vmatmul.mubr.msk.bf16.gmra.mrb[24].mxu1 %vm15978_vm7, %v7809_v32  ;;  %v5896_v31 = vsel %vm15984_vm8, %v5891_v28, %v5895_v47  ;;  %v7826_v32 = vor.u32 %v7825_v50, %v7822_v35  ;;  %vm15985_vm2 = vmmov %vm15973_vm1  ;;  %v14706_v28 = vshll.u32 %v14530_v61, 16  ;;  %v7835_v35 = vor.u32 %v7834_v20, %v7831_v13 }
 0x2b6   : > { %11321 = vmatprep.mubr.msk.bf16.mxu1 %vm15982_vm13, %v7818_v53  ;;  %v14700_v53 = vshll.u32 %v14525_v16, 16  ;;  %vm15986_vm14 = vmmov %vm15973_vm1  ;;  %v5899_v50 = vor.u32 %v5898_v58, %v5897_v25  ;;  %v7849_v38 = vrot.slane %v14703_v51, 1  ;;  %v5905_v25 = vrot.slane %v14509_v63, 2 }
 0x2b7   : > { %11138 = vmatmul.mubr.msk.bf16.vlgmr.msra.gmra.mrb[20].mxu0 %vm15985_vm2, %v5892_v42  ;;  %vm15987_vm5 = vmmov %vm15983_vm0  ;;  %v7852_v11 = vrot.slane %v14706_v28, 2  ;;  %v5910_v58 = vrot.slane %v14521_v10, 3  ;;  %v15760_v10 = vrot.slane %v14530_v61, 4 }
 0x2b8   : > { %11141 = vmatprep.mubr.msk.bf16.mxu0 %vm15986_vm14, %v5896_v31  ;;  %11158 = vmatpush3.bf16.msra.mxu0 %v6175_v54  ;;  %vm15988_vm15 = vmmov %vm15979_vm4  ;;  %v7843_v17 = vrot.slane %v14700_v53, 2  ;;  %v15761_v54 = vrot.slane %v14489_v21, 4  ;;  %v5907_v6 = vor.u32 %v5906_v8, %v5905_v25 }
 0x2b9   : > { %12149 = vmatprep.subr.msk.bf16.mxu0 %vm15987_vm5, %v14693_v12  ;;  %v7827_v42 = vsel %vm15988_vm15, %v7817_v2, %v7826_v32  ;;  %vm15989_vm12 = vmmov %vm15979_vm4  ;;  %v5909_v2 = vrot.slane %v14518_v4, 2  ;;  %v8269_v4 = vrot.slane %v14525_v16, 4 }
 0x2ba   : > { %v7836_v13 = vsel %vm15989_vm12, %v7826_v32, %v7835_v35  ;;  %vm15990_vm3 = vmmov %vm15984_vm8  ;;  %v7844_v31 = vor.u32 %v7843_v17, %v7840_v9  ;;  %v7853_v32 = vor.u32 %v7852_v11, %v7849_v38 }
 0x2bb   : > { %v5900_v20 = vsel %vm15990_vm3, %v5895_v47, %v5899_v50  ;;  %vm15991_vm11 = vmmov %vm15973_vm1  ;;  %v7856_v47 = vshrl.u32 %v14557_v55, 16  ;;  %v5911_v9 = vor.u32 %v5910_v58, %v5909_v2  ;;  %v16003_v2 = vshll.u32 %v14403_v22, 16 }
 0x2bc   : > { %vm15992_vm9 = vmmov %vm15990_vm3 }
 0x2bd   : > { %11322 = vmatmul.mubr.msk.bf16.gmra.mrb[28].mxu1 %vm15973_vm1, %v7827_v42  ;;  %v5904_v60 = vsel %vm15992_vm9, %v5899_v50, %v5903_v56  ;;  %vm15993_vm7 = vmmov %vm15973_vm1  ;;  %v7859_v42 = vshll.u32 %v14557_v55, 16  ;;  %v8016_v50 = vshll.u32 %v14416_v34, 16  ;;  %v7858_v55 = vrot.slane %v7856_v47, 1 }
 0x2be   : > { %11325 = vmatprep.mubr.msk.bf16.mxu1 %vm15991_vm11, %v7836_v13  ;;  %vm15994_vm4 = vmmov %vm15973_vm1  ;;  %v8013_v13 = vshrl.u32 %v14416_v34, 16  ;;  %v8021_v58 = vrot.slane %v16003_v2, 3 }
 0x2bf   : > { %11142 = vmatmul.mubr.msk.bf16.gmra.mrb[24].mxu0 %vm15993_vm7, %v5900_v20  ;;  %vm15995_vm6 = vmmov %vm15983_vm0  ;;  %v7861_v34 = vrot.slane %v7859_v42, 2  ;;  %v8018_v25 = vrot.slane %v8016_v50, 3  ;;  %v5917_v42 = vrot.slane %v14547_v14, 2 }
 0x2c0   : > { %11145 = vmatprep.mubr.msk.bf16.mxu0 %vm15994_vm4, %v5904_v60  ;;  %v14737_v17 = vsel %vm15995_vm6, %v15761_v54, %v8269_v4  ;;  %vm15996_vm10 = vmmov %vm15983_vm0  ;;  %v8015_v20 = vrot.slane %v8013_v13, 2  ;;  %v5913_v60 = vrot.slane %v14541_v59, 2  ;;  %v5874_v13 = vld [vmem:[#allocation2 + $0x58] sm:$0x7] }
 0x2c1   : > { %v14742_v11 = vsel %vm15996_vm10, %v8269_v4, %v15760_v10  ;;  %vm15997_vm13 = vmmov %vm15989_vm12  ;;  %v5914_v4 = vrot.slane %v14544_v0, 3  ;;  %v16002_v10 = vshrl.u32 %v14403_v22, 16  ;;  %v7862_v47 = vor.u32 %v7861_v34, %v7858_v55 }
 0x2c2   : > { %v7845_v38 = vsel %vm15997_vm13, %v7835_v35, %v7844_v31  ;;  %vm15998_vm0 = vmmov %vm15973_vm1  ;;  %v8019_v50 = vor.u32 %v8018_v25, %v8015_v20  ;;  %v5922_v54 = vshrl.u32 %v5874_v13, 16  ;;  %v8028_v55 = vrot.slane %v14574_v27, 2 }
 0x2c3   : > { %vm15999_vm8 = vmmov %vm15989_vm12  ;;  %v8020_v35 = vrot.slane %v16002_v10, 2  ;;  %v5925_v10 = vshll.u32 %v5874_v13, 16  ;;  %v8029_v34 = vrot.slane %v14577_v52, 3  ;;  %v8025_v20 = vrot.slane %v14585_v48, 3 }
 0x2c4   : > { %v7854_v16 = vsel %vm15999_vm8, %v7844_v31, %v7853_v32  ;;  %vm16000_vm2 = vmmov %vm15990_vm3  ;;  %vm16015_vm13 = vcmask 1043456   ;;  %v8032_v13 = vrot.slane %v14603_v18, 2 }
 0x2c5   : > { %11326 = vmatmul.mubr.msk.bf16.gmra.mrb[32].mxu1 %vm15998_vm0, %v7845_v38  ;;  %v5908_v8 = vsel %vm16000_vm2, %v5903_v56, %v5907_v6  ;;  %vm16001_vm14 = vmmov %vm15998_vm0  ;;  %v5918_v56 = vrot.slane %v14550_v43, 3  ;;  %v5915_v38 = vor.u32 %v5914_v4, %v5913_v60  ;;  %v5924_v60 = vrot.slane %v5922_v54, 2 }
 0x2c6   : > { %11329 = vmatprep.mubr.msk.bf16.mxu1 %vm16001_vm14, %v7854_v16  ;;  %vm16004_vm5 = vmmov %vm15998_vm0  ;;  %v8022_v16 = vor.u32 %v8021_v58, %v8020_v35  ;;  %v5927_v4 = vrot.slane %v5925_v10, 3  ;;  %v14771_v35 = vld [vmem:[#allocation2 + $0x10] sm:$0xf0]  ;;  %v8030_v58 = vor.u32 %v8029_v34, %v8028_v55  ;;  %v6124_v54 = vrot.slane %v14240_v57, 4 }
 0x2c7   : > { %11146 = vmatmul.mubr.msk.bf16.gmra.mrb[28].mxu0 %vm16004_vm5, %v5908_v8  ;;  %vm16005_vm15 = vmmov %vm16000_vm2  ;;  %v5919_v2 = vor.u32 %v5918_v56, %v5917_v42  ;;  %v8024_v8 = vrot.slane %v14582_v45, 2  ;;  %v8308_v42 = vsel %vm16015_vm13, %v14625_v26, 0  ;;  %v6123_v56 = vrot.slane %v14771_v35, 4 }
 0x2c8   : > { %v5912_v31 = vsel %vm16005_vm15, %v5907_v6, %v5911_v9  ;;  %vm16006_vm1 = vmmov %vm15998_vm0  ;;  %v8036_v26 = vrot.slane %v14610_v49, 2 }
 0x2c9   : > { %11149 = vmatprep.mubr.msk.bf16.mxu0 %vm16006_vm1, %v5912_v31  ;;  %vm16007_vm12 = vmmov %vm15999_vm8  ;;  %v8026_v31 = vor.u32 %v8025_v20, %v8024_v8  ;;  %v8040_v8 = vrot.slane %v14645_v5, 2  ;;  %v8041_v20 = vrot.slane %v14648_v1, 3 }
 0x2ca   : > { %v7863_v22 = vsel %vm16007_vm12, %v7853_v32, %v7862_v47  ;;  %vm16008_vm3 = vmmov %vm15998_vm0  ;;  %v5928_v47 = vor.u32 %v5927_v4, %v5924_v60  ;;  %v8045_v60 = vrot.slane %v14660_v33, 3 }
 0x2cb   : > { %vm16009_vm11 = vmmov %vm16000_vm2 }
 0x2cc   : > { %v8023_v6 = vsel %vm16009_vm11, %v8019_v50, %v8022_v16  ;;  %vm16010_vm9 = vmmov %vm15998_vm0  ;;  %v8033_v50 = vrot.slane %v14606_v29, 3 }
 0x2cd   : > { %11330 = vmatmul.mubr.msk.bf16.gmra.mrb[36].mxu1 %vm16008_vm3, %v7863_v22  ;;  %vm16011_vm7 = vmmov %vm16000_vm2  ;;  %v8037_v22 = vrot.slane %v14613_v23, 3 }
 0x2ce   : > { %11335 = vmatprep.mubr.msk.bf16.mxu1 %vm16010_vm9, %v8023_v6  ;;  %v5916_v25 = vsel %vm16011_vm7, %v5911_v9, %v5915_v38  ;;  %vm16012_vm4 = vmmov %vm15998_vm0  ;;  %v8034_v6 = vor.u32 %v8033_v50, %v8032_v13  ;;  %v8049_v13 = vrot.slane %v14700_v53, 3 }
 0x2cf   : > { %11150 = vmatmul.mubr.msk.bf16.gmra.mrb[32].mxu0 %vm16012_vm4, %v5916_v25  ;;  %vm16013_vm6 = vmmov %vm16000_vm2  ;;  %v8038_v55 = vor.u32 %v8037_v22, %v8036_v26  ;;  %v8044_v25 = vrot.slane %v14657_v24, 2  ;;  %v8010_v26 = vld [vmem:[#allocation2 + $0xa8] sm:$0x7] }
 0x2d0   : > { %v5920_v32 = vsel %vm16013_vm6, %v5915_v38, %v5919_v2  ;;  %vm16014_vm10 = vmmov %vm15998_vm0  ;;  %v14784_v38 = vld [vmem:[%s15680_s4 + $0xc] sm:$0xf] }
 0x2d1   : > { %11153 = vmatprep.mubr.msk.bf16.mxu0 %vm16014_vm10, %v5920_v32  ;;  %vm16016_vm0 = vmmov %vm16000_vm2  ;;  %v16029_v32 = vrot.slane %v14324_v40, 4  ;;  %v6130_v40 = vrot.slane %v14336_v3, 4  ;;  %v16038_v3 = vrot.slane %v14334_v62, 4 }
 0x2d2   : > { %v8027_v9 = vsel %vm16016_vm0, %v8022_v16, %v8026_v31  ;;  %vm16017_vm8 = vmmov %vm16006_vm1 }
 0x2d3   : > { %vm16018_vm2 = vmmov %vm16016_vm0 }
 0x2d4   : > { %v8031_v10 = vsel %vm16018_vm2, %v8026_v31, %v8030_v58  ;;  %vm16019_vm14 = vmmov %vm16006_vm1  ;;  %v14813_v31 = vld [vmem:[%s15680_s4 + $0x14] sm:$0xf] }
 0x2d5   : > { %11336 = vmatmul.mubr.msk.bf16.vlgmr.msra.gmra.mrb[20].mxu1 %vm16017_vm8, %v8027_v9  ;;  %vm16020_vm5 = vmmov %vm16016_vm0 }
 0x2d6   : > { %11356 = vmatpush3.bf16.msra.mxu1 %v8308_v42  ;;  %11339 = vmatprep.mubr.msk.bf16.mxu1 %vm16019_vm14, %v8031_v10  ;;  %v5929_v57 = vsel %vm16020_vm5, %v5919_v2, %v5928_v47  ;;  %vm16021_vm15 = vmmov %vm16015_vm13  ;;  %v8042_v47 = vor.u32 %v8041_v20, %v8040_v8  ;;  %v8046_v42 = vor.u32 %v8045_v60, %v8044_v25  ;;  %v8053_v10 = vrot.slane %v14706_v28, 3  ;;  %v14840_v25 = vld [vmem:[#allocation2 + $0x60] sm:$0xf0] }
 0x2d7   : > { %12158 = vmatprep.subr.msk.bf16.mxu1 %vm16021_vm15, %v14784_v38  ;;  %11154 = vmatmul.mubr.msk.bf16.gmra.mrb[36].mxu0 %vm16006_vm1, %v5929_v57  ;;  %vm16022_vm12 = vmmov %vm16015_vm13  ;;  %v16047_v60 = vrot.slane %v14377_v15, 4 }
 0x2d8   : > { %v6125_v16 = vsel %vm16022_vm12, %v6123_v56, %v6124_v54  ;;  %vm16023_vm3 = vmmov %vm16006_vm1  ;;  %v16034_v56 = vld [vmem:[#allocation3_spill] sm:$0xff] }
 0x2d9   : > { %11159 = vmatprep.mubr.msk.bf16.mxu0 %vm16023_vm3, %v6125_v16  ;;  %vm16024_vm11 = vmmov %vm16016_vm0  ;;  %v6132_v9 = vrot.slane %v16034_v56, 4 }
 0x2da   : > { %v8035_v34 = vsel %vm16024_vm11, %v8030_v58, %v8034_v6  ;;  %vm16025_vm9 = vmmov %vm16006_vm1 }
 0x2db   : > { %vm16026_vm7 = vmmov %vm16016_vm0 }
 0x2dc   : > { %v8039_v2 = vsel %vm16026_vm7, %v8034_v6, %v8038_v55  ;;  %vm16027_vm4 = vmmov %vm16006_vm1  ;;  %v8057_v6 = vshrl.u32 %v8010_v26, 16 }
 0x2dd   : > { %11340 = vmatmul.mubr.msk.bf16.gmra.mrb[24].mxu1 %vm16025_vm9, %v8035_v34  ;;  %vm16028_vm6 = vmmov %vm16022_vm12 }
 0x2de   : > { %11343 = vmatprep.mubr.msk.bf16.mxu1 %vm16027_vm4, %v8039_v2  ;;  %v6419_v4 = vsel %vm16028_vm6, %v14693_v12, 0  ;;  %vm16030_vm10 = vmmov %vm16028_vm6  ;;  %v8043_v12 = vsel %vm16018_vm2, %v8038_v55, %v8042_v47  ;;  %v8060_v55 = vshll.u32 %v8010_v26, 16  ;;  %v8059_v20 = vrot.slane %v8057_v6, 2  ;;  %v14867_v6 = vld [vmem:[#allocation2 + $0x60] sm:$0xf] }
 0x2df   : > { %v6127_v58 = vsel %vm16030_vm10, %v6124_v54, %v16029_v32  ;;  %vm16031_vm13 = vmmov %vm16006_vm1  ;;  %v8048_v54 = vrot.slane %v14697_v41, 2 }
 0x2e0   : > { %11160 = vmatmul.mubr.msk.bf16.vlgmr.msra.gmra.mrb[20].mxu0 %vm16031_vm13, %v6127_v58  ;;  %vm16032_vm0 = vmmov %vm16006_vm1  ;;  %v8062_v2 = vrot.slane %v8060_v55, 3  ;;  %v14846_v58 = vld [vmem:[#allocation2 + $0x58] sm:$0xff] }
 0x2e1   : > { %11163 = vmatprep.mubr.msk.bf16.mxu0 %vm16032_vm0, %v14636_v36  ;;  %11180 = vmatpush3.bf16.msra.mxu0 %v6419_v4  ;;  %vm16033_vm8 = vmmov %vm16028_vm6  ;;  %v8052_v36 = vrot.slane %v14703_v51, 2  ;;  %v8050_v16 = vor.u32 %v8049_v13, %v8048_v54  ;;  %v6140_v56 = vrot.slane %v14846_v58, 4 }
 0x2e2   : > { %12150 = vmatprep.subr.msk.bf16.mxu0 %vm16033_vm8, %v14813_v31  ;;  %vm16035_vm14 = vmmov %vm16032_vm0  ;;  %v8063_v32 = vor.u32 %v8062_v2, %v8059_v20  ;;  %v6142_v20 = vrot.slane %v14867_v6, 4  ;;  %v6310_v2 = vrot.slane %v14442_v44, 3 }
 0x2e3   : > { %vm16036_vm5 = vmmov %vm16018_vm2  ;;  %v8054_v34 = vor.u32 %v8053_v10, %v8052_v36  ;;  %v16057_v36 = vld [vmem:[#allocation4_spill] sm:$0xff] }
 0x2e4   : > { %v8047_v50 = vsel %vm16036_vm5, %v8042_v47, %v8046_v42  ;;  %vm16037_vm15 = vmmov %vm16032_vm0  ;;  %v8256_v47 = vrot.slane %v14840_v25, 4  ;;  %v8259_v10 = vrot.slane %v16057_v36, 4 }
 0x2e5   : > { %11344 = vmatmul.mubr.msk.bf16.gmra.mrb[28].mxu1 %vm16035_vm14, %v8043_v12  ;;  %vm16039_vm1 = vmmov %vm16028_vm6  ;;  %v6096_v12 = vld [vmem:[#allocation2 + $0x10] sm:$0xf8] }
 0x2e6   : > { %11347 = vmatprep.mubr.msk.bf16.mxu1 %vm16037_vm15, %v8047_v50  ;;  %v6131_v22 = vsel %vm16039_vm1, %v16038_v3, %v6130_v40  ;;  %vm16040_vm12 = vmmov %vm16032_vm0  ;;  %v6291_v15 = vshrl.u32 %v6096_v12, 16  ;;  %v6294_v13 = vshll.u32 %v6096_v12, 16  ;;  %v16055_v50 = vrot.slane %v14414_v30, 4  ;;  %v16071_v12 = vld [vmem:[#allocation9_spill] sm:$0xff] }
 0x2e7   : > { %vm16041_vm3 = vmmov %vm16039_vm1 }
 0x2e8   : > { %11164 = vmatmul.mubr.msk.bf16.gmra.mrb[24].mxu0 %vm16040_vm12, %v6131_v22  ;;  %v6133_v57 = vsel %vm16041_vm3, %v6130_v40, %v6132_v9  ;;  %vm16042_vm11 = vmmov %vm16032_vm0  ;;  %v6293_v26 = vrot.slane %v6291_v15, 3  ;;  %v6296_v3 = vrot.slane %v6294_v13, 4  ;;  %v6301_v22 = vrot.slane %v14433_v37, 3 }
 0x2e9   : > { %11167 = vmatprep.mubr.msk.bf16.mxu0 %vm16042_vm11, %v6133_v57  ;;  %vm16043_vm9 = vmmov %vm16018_vm2  ;;  %v6304_v57 = vrot.slane %v14436_v39, 4  ;;  %v8552_v30 = vsel %vm16041_vm3, %v14784_v38, 0 }
 0x2ea   : > { %v8051_v8 = vsel %vm16043_vm9, %v8046_v42, %v8050_v16  ;;  %vm16044_vm7 = vmmov %vm16032_vm0  ;;  %v16050_v42 = vld [vmem:[#allocation5_spill] sm:$0xff] }
 0x2eb   : > { %vm16045_vm4 = vmmov %vm16018_vm2  ;;  %v8257_v40 = vrot.slane %v16050_v42, 4  ;;  %v16070_v42 = vld [vmem:[#allocation8_spill] sm:$0xff] }
 0x2ec   : > { %v8055_v62 = vsel %vm16045_vm4, %v8050_v16, %v8054_v34  ;;  %vm16046_vm6 = vmmov %vm16032_vm0  ;;  %v8261_v16 = vrot.slane %v14455_v19, 4 }
 0x2ed   : > { %11348 = vmatmul.mubr.msk.bf16.gmra.mrb[32].mxu1 %vm16044_vm7, %v8051_v8  ;;  %vm16048_vm10 = vmmov %vm16039_vm1  ;;  %v6305_v8 = vor.u32 %v6304_v57, %v6301_v22  ;;  %v16081_v22 = vld [vmem:[#allocation11_spill] sm:$0xff] }
 0x2ee   : > { %11351 = vmatprep.mubr.msk.bf16.mxu1 %vm16046_vm6, %v8055_v62  ;;  %v6135_v4 = vsel %vm16048_vm10, %v6132_v9, %v16047_v60  ;;  %vm16049_vm13 = vmmov %vm16032_vm0  ;;  %v16065_v62 = vld [vmem:[#allocation6_spill] sm:$0xff]  ;;  %v6331_v57 = vrot.slane %v16081_v22, 4 }
 0x2ef   : > { %vm16051_vm8 = vmmov %vm16018_vm2  ;;  %v6313_v60 = vrot.slane %v16065_v62, 4 }
 0x2f0   : > { %11168 = vmatmul.mubr.msk.bf16.gmra.mrb[28].mxu0 %vm16049_vm13, %v6135_v4  ;;  %v8064_v54 = vsel %vm16051_vm8, %v8054_v34, %v8063_v32  ;;  %vm16052_vm2 = vmmov %vm16032_vm0  ;;  %v6297_v34 = vor.u32 %v6296_v3, %v6293_v26  ;;  %v16069_v32 = vld [vmem:[#allocation7_spill] sm:$0xff]  ;;  %v16080_v26 = vld [vmem:[#allocation10_spill] sm:$0xff] }
 0x2f1   : > { %11171 = vmatprep.mubr.msk.bf16.mxu0 %vm16032_vm0, %v14670_v46  ;;  %vm16053_vm14 = vmmov %vm16039_vm1  ;;  %v6314_v13 = vor.u32 %v6313_v60, %v6310_v2  ;;  %v6328_v3 = vrot.slane %v16080_v26, 3  ;;  %v16091_v2 = vld [vmem:[#allocation14_spill] sm:$0xff] }
 0x2f2   : > { %v8258_v9 = vsel %vm16053_vm14, %v8256_v47, %v8257_v40  ;;  %vm16054_vm5 = vmmov %vm16032_vm0  ;;  %v8263_v47 = vrot.slane %v16069_v32, 4  ;;  %v6346_v60 = vrot.slane %v16091_v2, 3 }
 0x2f3   : > { %vm16056_vm15 = vmmov %vm16039_vm1 }
 0x2f4   : > { %v6141_v46 = vsel %vm16056_vm15, %v16055_v50, %v6140_v56  ;;  %vm16058_vm1 = vmmov %vm16032_vm0 }
 0x2f5   : > { %11352 = vmatmul.mubr.msk.bf16.gmra.mrb[36].mxu1 %vm16052_vm2, %v8064_v54  ;;  %vm16059_vm12 = vmmov %vm16032_vm0  ;;  %v6322_v54 = vrot.slane %v16071_v12, 4 }
 0x2f6   : > { %11357 = vmatprep.mubr.msk.bf16.mxu1 %vm16054_vm5, %v8258_v9  ;;  %vm16060_vm11 = vmmov %vm16041_vm3 }
 0x2f7   : > { %v8260_v55 = vsel %vm16060_vm11, %v8257_v40, %v8259_v10  ;;  %vm16061_vm9 = vmmov %vm16032_vm0  ;;  %v6319_v40 = vrot.slane %v16070_v42, 3 }
 0x2f8   : > { %11172 = vmatmul.mubr.msk.bf16.gmra.mrb[32].mxu0 %vm16058_vm1, %v14679_v7  ;;  %v14875_v7 = vld [vmem:[%s15680_s4 + $0x14] sm:$0xf]  ;;  %vm16062_vm7 = vmmov %vm16041_vm3 }
 0x2f9   : > { %11175 = vmatprep.mubr.msk.bf16.mxu0 %vm16059_vm12, %v6141_v46  ;;  %v8262_v19 = vsel %vm16062_vm7, %v8259_v10, %v8261_v16  ;;  %vm16063_vm4 = vmmov %vm16032_vm0  ;;  %v6323_v50 = vor.u32 %v6322_v54, %v6319_v40  ;;  %v8231_v40 = vld [vmem:[#allocation2 + $0x60] sm:$0xf8] }
 0x2fa   : > { %vm16064_vm6 = vmmov %vm16041_vm3 }
 0x2fb   : > { %v6143_v38 = vsel %vm16064_vm6, %v6140_v56, %v6142_v20  ;;  %vm16066_vm10 = vmmov %vm16041_vm3  ;;  %v16073_v56 = vld [vmem:[#allocation12_spill] sm:$0xff] }
 0x2fc   : > { %vm16067_vm13 = vmmov %vm16032_vm0  ;;  %vm16068_vm0 = vsmask.f32 4352  ;;  %v8265_v15 = vrot.slane %v16073_v56, 4  ;;  %v6355_v56 = vrot.slane %v14541_v59, 3 }
 0x2fd   : > { %11358 = vmatmul.mubr.msk.bf16.vlgmr.msra.gmra.mrb[20].mxu1 %vm16061_vm9, %v8260_v55  ;;  %v6306_v4 = vsel %vm16068_vm0, %v6297_v34, %v6305_v8  ;;  %vm16072_vm8 = vmmov %vm16058_vm1  ;;  %v6337_v55 = vrot.slane %v14509_v63, 3  ;;  %v16084_v34 = vld [vmem:[#allocation13_spill] sm:$0xff] }
 0x2fe   : > { %11378 = vmatpush3.bf16.msra.mxu1 %v8552_v30  ;;  %11361 = vmatprep.mubr.msk.bf16.mxu1 %vm16063_vm4, %v8262_v19  ;;  %vm16074_vm2 = vmmov %vm16041_vm3  ;;  %v6340_v20 = vrot.slane %v16084_v34, 4 }
 0x2ff   : > { %12159 = vmatprep.subr.msk.bf16.mxu1 %vm16066_vm10, %v14875_v7  ;;  %v8264_v9 = vsel %vm16074_vm2, %v8261_v16, %v8263_v47  ;;  %vm16075_vm14 = vmmov %vm16058_vm1  ;;  %v14905_v16 = vld [vmem:[%s15680_s4 + $0x1c] sm:$0xf] }
 0x300   : > { %11176 = vmatmul.mubr.msk.bf16.gmra.mrb[36].mxu0 %vm16067_vm13, %v6143_v38  ;;  %vm16076_vm5 = vmmov %vm16074_vm2  ;;  %v6341_v38 = vor.u32 %v6340_v20, %v6337_v55 }
 0x301   : > { %11181 = vmatprep.mubr.msk.bf16.mxu0 %vm16072_vm8, %v6306_v4  ;;  %v8266_v46 = vsel %vm16076_vm5, %v8263_v47, %v8265_v15  ;;  %vm16077_vm15 = vmmov %vm16058_vm1  ;;  %v16092_v4 = vld [vmem:[#allocation15_spill] sm:$0xff] }
 0x302   : > { %vm16078_vm1 = vmmov %vm16074_vm2  ;;  %v6349_v32 = vrot.slane %v16092_v4, 4  ;;  %v14922_v47 = vld [vmem:[#allocation2 + $0xa8] sm:$0xff] }
 0x303   : > { %v6622_v36 = vsel %vm16078_vm1, %v14813_v31, 0  ;;  %vm16079_vm12 = vmmov %vm16068_vm0  ;;  %v6332_v31 = vor.u32 %v6331_v57, %v6328_v3  ;;  %v16098_v3 = vrot.slane %v14530_v61, 4  ;;  %v8434_v61 = vrot.slane %v14582_v45, 3 }
 0x304   : > { %v6315_v10 = vsel %vm16079_vm12, %v6305_v8, %v6314_v13  ;;  %vm16082_vm3 = vmmov %vm16063_vm4  ;;  %v16087_v8 = vrot.slane %v14489_v21, 4 }
 0x305   : > { %11362 = vmatmul.mubr.msk.bf16.gmra.mrb[24].mxu1 %vm16075_vm14, %v8264_v9  ;;  %vm16083_vm11 = vmmov %vm16068_vm0  ;;  %v8427_v9 = vshll.u32 %v8231_v40, 16 }
 0x306   : > { %11365 = vmatprep.mubr.msk.bf16.mxu1 %vm16077_vm15, %v8266_v46  ;;  %v6324_v30 = vsel %vm16083_vm11, %v6314_v13, %v6323_v50  ;;  %vm16085_vm9 = vmmov %vm16082_vm3  ;;  %v8424_v13 = vshrl.u32 %v8231_v40, 16  ;;  %v6350_v46 = vor.u32 %v6349_v32, %v6346_v60  ;;  %v8437_v32 = vrot.slane %v14585_v48, 4 }
 0x307   : > { %vm16086_vm7 = vmmov %vm16078_vm1  ;;  %v8429_v55 = vrot.slane %v8427_v9, 4  ;;  %v8446_v9 = vrot.slane %v14577_v52, 4 }
 0x308   : > { %11182 = vmatmul.mubr.msk.bf16.vlgmr.msra.gmra.mrb[20].mxu0 %vm16082_vm3, %v6315_v10  ;;  %vm16088_vm4 = vmmov %vm16078_vm1 }
 0x309   : > { %11185 = vmatprep.mubr.msk.bf16.mxu0 %vm16085_vm9, %v6324_v30  ;;  %11202 = vmatpush3.bf16.msra.mxu0 %v6622_v36  ;;  %v8268_v19 = vsel %vm16088_vm4, %v8265_v15, %v16087_v8  ;;  %vm16089_vm6 = vmmov %vm16082_vm3  ;;  %v6358_v15 = vrot.slane %v14544_v0, 4  ;;  %v14932_v36 = vshrl.u32 %v14846_v58, 16  ;;  %v8426_v30 = vrot.slane %v8424_v13, 3 }
 0x30a   : > { %12151 = vmatprep.subr.msk.bf16.mxu0 %vm16086_vm7, %v14905_v16  ;;  %vm16090_vm10 = vmmov %vm16082_vm3  ;;  %v6367_v8 = vrot.slane %v14550_v43, 4  ;;  %v8443_v13 = vrot.slane %v14574_v27, 3 }
 0x30b   : > { %vm16093_vm13 = vmmov %vm16068_vm0  ;;  %v6359_v10 = vor.u32 %v6358_v15, %v6355_v56  ;;  %v6373_v60 = vrot.slane %v14932_v36, 3  ;;  %v8430_v40 = vor.u32 %v8429_v55, %v8426_v30  ;;  %v8438_v15 = vor.u32 %v8437_v32, %v8434_v61 }
 0x30c   : > { %v6333_v54 = vsel %vm16093_vm13, %v6323_v50, %v6332_v31  ;;  %vm16094_vm0 = vmmov %vm16082_vm3  ;;  %v14935_v50 = vshll.u32 %v14846_v58, 16  ;;  %v6383_v55 = vshll.u32 %v14867_v6, 16  ;;  %v6546_v32 = vrot.slane %v14433_v37, 4  ;;  %v14982_v37 = vld [vmem:[%s15680_s4 + $0x1c] sm:$0xf] }
 0x30d   : > { %11366 = vmatmul.mubr.msk.bf16.gmra.mrb[28].mxu1 %vm16089_vm6, %v8268_v19  ;;  %vm16095_vm8 = vmmov %vm16083_vm11  ;;  %v14946_v19 = vld [vmem:[#allocation2 + $0xb0] sm:$0xf] }
 0x30e   : > { %11369 = vmatprep.mubr.msk.bf16.mxu1 %vm16090_vm10, %v14737_v17  ;;  %v6342_v21 = vsel %vm16095_vm8, %v6332_v31, %v6341_v38  ;;  %vm16096_vm2 = vmmov %vm16094_vm0  ;;  %v8273_v17 = vrot.slane %v14922_v47, 4  ;;  %v6364_v31 = vrot.slane %v14547_v14, 3 }
 0x30f   : > { %vm16097_vm14 = vmmov %vm16094_vm0 }
 0x310   : > { %11186 = vmatmul.mubr.msk.bf16.gmra.mrb[24].mxu0 %vm16094_vm0, %v6333_v54  ;;  %vm16099_vm5 = vmmov %vm16078_vm1  ;;  %v6368_v54 = vor.u32 %v6367_v8, %v6364_v31  ;;  %v8452_v31 = vrot.slane %v14603_v18, 3  ;;  %v8455_v8 = vrot.slane %v14606_v29, 4 }
 0x311   : > { %11189 = vmatprep.mubr.msk.bf16.mxu0 %vm16096_vm2, %v6342_v21  ;;  %v8274_v57 = vsel %vm16099_vm5, %v16098_v3, %v8273_v17  ;;  %vm16100_vm15 = vmmov %vm16095_vm8  ;;  %v8275_v21 = vrot.slane %v14946_v19, 4 }
 0x312   : > { %v6351_v20 = vsel %vm16100_vm15, %v6341_v38, %v6350_v46  ;;  %vm16101_vm1 = vmmov %vm16094_vm0 }
 0x313   : > { %vm16102_vm12 = vmmov %vm16094_vm0 }
 0x314   : > { %vm16103_vm3 = vmmov %vm16095_vm8 }
 0x315   : > { %11370 = vmatmul.mubr.msk.bf16.gmra.mrb[32].mxu1 %vm16097_vm14, %v14742_v11  ;;  %v6376_v11 = vrot.slane %v14935_v50, 4  ;;  %v6360_v38 = vsel %vm16103_vm3, %v6350_v46, %v6359_v10  ;;  %vm16104_vm11 = vmmov %vm16094_vm0  ;;  %v6542_v46 = vshll.u32 %v14771_v35, 16 }
 0x316   : > { %11373 = vmatprep.mubr.msk.bf16.mxu1 %vm16101_vm1, %v8274_v57  ;;  %vm16105_vm9 = vmmov %vm16088_vm4  ;;  %v6380_v57 = vshrl.u32 %v14867_v6, 16 }
 0x317   : > { %v6377_v56 = vor.u32 %v6376_v11, %v6373_v60  ;;  %v8276_v3 = vsel %vm16105_vm9, %v8273_v17, %v8275_v21  ;;  %vm16106_vm7 = vmmov %vm16094_vm0  ;;  %v8447_v11 = vor.u32 %v8446_v9, %v8443_v13  ;;  %v6544_v61 = vrot.slane %v6542_v46, 5 }
 0x318   : > { %11190 = vmatmul.mubr.msk.bf16.gmra.mrb[28].mxu0 %vm16102_vm12, %v6351_v20  ;;  %v6539_v20 = vshrl.u32 %v14771_v35, 16  ;;  %vm16107_vm4 = vmmov %vm16103_vm3  ;;  %v6382_v6 = vrot.slane %v6380_v57, 3  ;;  %v8456_v21 = vor.u32 %v8455_v8, %v8452_v31  ;;  %v8461_v9 = vrot.slane %v14610_v49, 3 }
 0x319   : > { %11193 = vmatprep.mubr.msk.bf16.mxu0 %vm16104_vm11, %v6360_v38  ;;  %v8439_v30 = vsel %vm16107_vm4, %v8430_v40, %v8438_v15  ;;  %vm16108_vm6 = vmmov %vm16094_vm0  ;;  %v6547_v38 = vrot.slane %v14436_v39, 5  ;;  %v6385_v40 = vrot.slane %v6383_v55, 4  ;;  %v8470_v57 = vrot.slane %v14645_v5, 3 }
 0x31a   : > { %vm16109_vm10 = vmmov %vm16103_vm3  ;;  %v6541_v35 = vrot.slane %v6539_v20, 4  ;;  %v8464_v20 = vrot.slane %v14613_v23, 4  ;;  %v6551_v55 = vrot.slane %v16065_v62, 5  ;;  %v8479_v62 = vrot.slane %v14657_v24, 3 }
 0x31b   : > { %v6369_v17 = vsel %vm16109_vm10, %v6359_v10, %v6368_v54  ;;  %vm16110_vm13 = vmmov %vm16103_vm3  ;;  %v6548_v13 = vor.u32 %v6547_v38, %v6546_v32  ;;  %v6386_v39 = vor.u32 %v6385_v40, %v6382_v6  ;;  %v8488_v38 = vrot.slane %v14697_v41, 3 }
 0x31c   : > { %v6378_v60 = vsel %vm16110_vm13, %v6368_v54, %v6377_v56  ;;  %vm16111_vm8 = vmmov %vm16094_vm0  ;;  %v6545_v54 = vor.u32 %v6544_v61, %v6541_v35  ;;  %v8465_v8 = vor.u32 %v8464_v20, %v8461_v9  ;;  %v8482_v61 = vrot.slane %v14660_v33, 4 }
 0x31d   : > { %11374 = vmatmul.mubr.msk.bf16.gmra.mrb[36].mxu1 %vm16106_vm7, %v8276_v3  ;;  %vm16112_vm2 = vmmov %vm16103_vm3  ;;  %v6558_v40 = vrot.slane %v16080_v26, 4  ;;  %v6562_v9 = vrot.slane %v14509_v63, 4  ;;  %v15023_v26 = vshrl.u32 %v14922_v47, 16  ;;  %v8497_v63 = vrot.slane %v14703_v51, 3 }
 0x31e   : > { %11379 = vmatprep.mubr.msk.bf16.mxu1 %vm16108_vm6, %v8439_v30  ;;  %v8448_v3 = vsel %vm16112_vm2, %v8438_v15, %v8447_v11  ;;  %vm16113_vm14 = vmmov %vm16099_vm5  ;;  %vm6537_vm5 = vsmask.f32 3328  ;;  %v6550_v30 = vrot.slane %v14442_v44, 4 }
 0x31f   : > { %v8753_v10 = vsel %vm16113_vm14, %v14875_v7, 0  ;;  %vm16114_vm15 = vmmov %vm16094_vm0  ;;  %v8473_v7 = vrot.slane %v14648_v1, 4  ;;  %v6549_v31 = vsel %vm6537_vm5, %v6545_v54, %v6548_v13  ;;  %v8483_v54 = vor.u32 %v8482_v61, %v8479_v62 }
 0x320   : > { %11194 = vmatmul.mubr.msk.bf16.gmra.mrb[32].mxu0 %vm16094_vm0, %v6369_v17  ;;  %vm16115_vm1 = vmmov %vm16112_vm2  ;;  %v6554_v17 = vrot.slane %v16070_v42, 4  ;;  %v8491_v42 = vrot.slane %v14700_v53, 4 }
 0x321   : > { %11197 = vmatprep.mubr.msk.bf16.mxu0 %vm16111_vm8, %v6378_v60  ;;  %v8457_v15 = vsel %vm16115_vm1, %v8447_v11, %v8456_v21  ;;  %vm16116_vm12 = vmmov %vm16094_vm0  ;;  %v6555_v60 = vrot.slane %v16071_v12, 5  ;;  %v8474_v11 = vor.u32 %v8473_v7, %v8470_v57  ;;  %v8506_v7 = vrot.slane %v15023_v26, 3 }
 0x322   : > { %vm16117_vm3 = vmmov %vm16115_vm1 }
 0x323   : > { %v6387_v46 = vsel %vm16117_vm3, %v6377_v56, %v6386_v39  ;;  %vm16118_vm11 = vmmov %vm16105_vm9  ;;  %v6552_v56 = vor.u32 %v6551_v55, %v6550_v30  ;;  %v6556_v35 = vor.u32 %v6555_v60, %v6554_v17  ;;  %v6566_v30 = vrot.slane %v16091_v2, 4 }
 0x324   : > { %vm16119_vm9 = vmmov %vm16094_vm0  ;;  %v6567_v55 = vrot.slane %v16092_v4, 5  ;;  %v8673_v2 = vshll.u32 %v14840_v25, 16  ;;  %v8513_v4 = vshrl.u32 %v14946_v19, 16 }
 0x325   : > { %11380 = vmatmul.mubr.msk.bf16.vlgmr.msra.gmra.mrb[20].mxu1 %vm16114_vm15, %v8448_v3  ;;  %vm16120_vm7 = vmmov %vm16094_vm0  ;;  %v6553_v6 = vsel %vm6537_vm5, %v6548_v13, %v6552_v56  ;;  %v15015_v3 = vld [vmem:[%s15680_s4 + $0x18] sm:$0xf]  ;;  %v8492_v13 = vor.u32 %v8491_v42, %v8488_v38  ;;  %v8677_v42 = vrot.slane %v14582_v45, 4 }
 0x326   : > { %11400 = vmatpush3.bf16.msra.mxu1 %v8753_v10  ;;  %11383 = vmatprep.mubr.msk.bf16.mxu1 %vm16116_vm12, %v8457_v15  ;;  %vm16121_vm4 = vmmov %vm16115_vm1  ;;  %v6557_v10 = vsel %vm6537_vm5, %v6552_v56, %v6556_v35  ;;  %v8670_v56 = vshrl.u32 %v14840_v25, 16  ;;  %v6568_v62 = vor.u32 %v6567_v55, %v6566_v30  ;;  %v8675_v38 = vrot.slane %v8673_v2, 5  ;;  %v15089_v2 = vld [vmem:[%s15680_s4 + $0x18] sm:$0xf] }
 0x327   : > { %12160 = vmatprep.subr.msk.bf16.mxu1 %vm16118_vm11, %v14982_v37  ;;  %v8466_v44 = vsel %vm16121_vm4, %v8456_v21, %v8465_v8  ;;  %vm16122_vm6 = vmmov %vm16094_vm0  ;;  %v6559_v21 = vrot.slane %v16081_v22, 5  ;;  %v15026_v22 = vshll.u32 %v14922_v47, 16 }
 0x328   : > { %11198 = vmatmul.mubr.msk.bf16.gmra.mrb[36].mxu0 %vm16119_vm9, %v6387_v46  ;;  %vm16123_vm10 = vmmov %vm16115_vm1 }
 0x329   : > { %11203 = vmatprep.mubr.msk.bf16.mxu0 %vm16120_vm7, %v6549_v31  ;;  %v8475_v32 = vsel %vm16123_vm10, %v8465_v8, %v8474_v11  ;;  %vm16124_vm13 = vmmov %vm16094_vm0  ;;  %v6560_v20 = vor.u32 %v6559_v21, %v6558_v40  ;;  %v8509_v46 = vrot.slane %v15026_v22, 4  ;;  %v6570_v8 = vrot.slane %v14541_v59, 4 }
 0x32a   : > { %vm16125_vm0 = vmmov %vm16118_vm11  ;;  %v6575_v21 = vrot.slane %v14550_v43, 5  ;;  %v8681_v43 = vrot.slane %v14574_v27, 4 }
 0x32b   : > { %v6857_v12 = vsel %vm16125_vm0, %v14905_v16, 0  ;;  %vm16126_vm8 = vmmov %vm16122_vm6  ;;  %v6563_v16 = vrot.slane %v16084_v34, 5  ;;  %v8500_v34 = vrot.slane %v14706_v28, 4  ;;  %v6561_v31 = vsel %vm6537_vm5, %v6556_v35, %v6560_v20 }
 0x32c   : > { %vm16127_vm2 = vmmov %vm16122_vm6  ;;  %v8516_v35 = vshll.u32 %v14946_v19, 16  ;;  %v6574_v19 = vrot.slane %v14547_v14, 4 }
 0x32d   : > { %11384 = vmatmul.mubr.msk.bf16.gmra.mrb[24].mxu1 %vm16122_vm6, %v8466_v44  ;;  %vm16128_vm14 = vmmov %vm16125_vm0  ;;  %v6564_v15 = vor.u32 %v6563_v16, %v6562_v9  ;;  %v8501_v60 = vor.u32 %v8500_v34, %v8497_v63  ;;  %v8510_v44 = vor.u32 %v8509_v46, %v8506_v7  ;;  %v6534_v16 = vld [vmem:[#allocation2 + $0x60] sm:$0x1f]  ;;  %v8682_v63 = vrot.slane %v14577_v52, 5 }
 0x32e   : > { %11387 = vmatprep.mubr.msk.bf16.mxu1 %vm16124_vm13, %v8475_v32  ;;  %vm16129_vm15 = vmmov %vm16115_vm1  ;;  %v8672_v32 = vrot.slane %v8670_v56, 4  ;;  %v8518_v40 = vrot.slane %v8516_v35, 4  ;;  %v8685_v7 = vrot.slane %v14603_v18, 4  ;;  %v8686_v46 = vrot.slane %v14606_v29, 5  ;;  %v15080_v29 = vld [vmem:[#allocation2 + $0x18] sm:$0xc0] }
 0x32f   : > { %v8484_v39 = vsel %vm16129_vm15, %v8474_v11, %v8483_v54  ;;  %vm16130_vm1 = vmmov %vm16127_vm2  ;;  %v6565_v17 = vsel %vm6537_vm5, %v6560_v20, %v6564_v15  ;;  %v6571_v11 = vrot.slane %v14544_v0, 5  ;;  %v6569_v25 = vsel %vm6537_vm5, %v6564_v15, %v6568_v62 }
 0x330   : > { %11204 = vmatmul.mubr.msk.bf16.vlgmr.msra.gmra.mrb[20].mxu0 %vm16126_vm8, %v6553_v6  ;;  %vm16131_vm12 = vmmov %vm16117_vm3  ;;  %v8515_v6 = vrot.slane %v8513_v4, 3  ;;  %v6576_v20 = vor.u32 %v6575_v21, %v6574_v19  ;;  %v6583_v15 = vshrl.u32 %v6534_v16, 16  ;;  %v8683_v27 = vor.u32 %v8682_v63, %v8681_v43  ;;  %v8667_v43 = vld [vmem:[#allocation2 + $0xb0] sm:$0x1f] }
 0x331   : > { %11207 = vmatprep.mubr.msk.bf16.mxu0 %vm16127_vm2, %v6557_v10  ;;  %11224 = vmatpush3.bf16.msra.mxu0 %v6857_v12  ;;  %v8493_v57 = vsel %vm16131_vm12, %v8483_v54, %v8492_v13  ;;  %vm16132_vm3 = vmmov %vm16130_vm1  ;;  %v6572_v61 = vor.u32 %v6571_v11, %v6570_v8  ;;  %v8678_v12 = vrot.slane %v14585_v48, 5  ;;  %v6578_v10 = vrot.slane %v14932_v36, 4  ;;  %v15076_v8 = vld [vmem:[#allocation2 + $0x20] sm:$0xff] }
 0x332   : > { %12152 = vmatprep.subr.msk.bf16.mxu0 %vm16128_vm14, %v15015_v3  ;;  %vm16133_vm11 = vmmov %vm16130_vm1  ;;  %v6579_v54 = vrot.slane %v14935_v50, 5  ;;  %v8676_v48 = vor.u32 %v8675_v38, %v8672_v32  ;;  %v6585_v52 = vrot.slane %v6583_v15, 4  ;;  %vm16146_vm12 = vcmask 1043456  }
 0x333   : > { %vm16134_vm9 = vmmov %vm16130_vm1  ;;  %v6573_v45 = vsel %vm6537_vm5, %v6568_v62, %v6572_v61  ;;  %v8679_v9 = vor.u32 %v8678_v12, %v8677_v42  ;;  %v6577_v30 = vsel %vm6537_vm5, %v6572_v61, %v6576_v20  ;;  %v8985_v18 = vsel %vm16146_vm12, %v14982_v37, 0  ;;  %v15102_v61 = vld [vmem:[#allocation2 + $0x28] sm:$0xff] }
 0x334   : > { %vm16135_vm7 = vmmov %vm16121_vm4  ;;  %v6806_v11 = vrot.slane %v15076_v8, 6  ;;  %v8689_v56 = vrot.slane %v14610_v49, 4  ;;  %v8693_v4 = vrot.slane %v14645_v5, 4  ;;  %v8694_v35 = vrot.slane %v14648_v1, 5  ;;  %v15105_v5 = vld [vmem:[#allocation2 + $0x30] sm:$0xff] }
 0x335   : > { %11388 = vmatmul.mubr.msk.bf16.gmra.mrb[28].mxu1 %vm16130_vm1, %v8484_v39  ;;  %v8502_v59 = vsel %vm16135_vm7, %v8492_v13, %v8501_v60  ;;  %vm16136_vm4 = vmmov %vm16130_vm1  ;;  %v8519_v13 = vor.u32 %v8518_v40, %v8515_v6  ;;  %v6580_v39 = vor.u32 %v6579_v54, %v6578_v10  ;;  %v8680_v34 = vsel %vm6537_vm5, %v8676_v48, %v8679_v9  ;;  %v15127_v54 = vld [vmem:[#allocation2 + $0x38] sm:$0xff] }
 0x336   : > { %11391 = vmatprep.mubr.msk.bf16.mxu1 %vm16132_vm3, %v8493_v57  ;;  %vm16137_vm6 = vmmov %vm16135_vm7  ;;  %v6586_v57 = vshll.u32 %v6534_v16, 16  ;;  %vm6804_vm3 = vcmask 1041408   ;;  %v8695_v1 = vor.u32 %v8694_v35, %v8693_v4  ;;  %v6810_v42 = vrot.slane %v15105_v5, 6  ;;  %v15168_v4 = vld [vmem:[#allocation2 + $0x60] sm:$0xff] }
 0x337   : > { %v8511_v0 = vsel %vm16137_vm6, %v8501_v60, %v8510_v44  ;;  %vm16138_vm10 = vmmov %vm16130_vm1  ;;  %v6581_v55 = vsel %vm6537_vm5, %v6576_v20, %v6580_v39  ;;  %v8684_v60 = vsel %vm6537_vm5, %v8679_v9, %v8683_v27  ;;  %v8697_v12 = vrot.slane %v14657_v24, 4  ;;  %v15123_v24 = vld [vmem:[%s15680_s4 + $0x20] sm:$0xf] }
 0x338   : > { %11208 = vmatmul.mubr.msk.bf16.gmra.mrb[24].mxu0 %vm16133_vm11, %v6561_v31  ;;  %vm16139_vm13 = vmmov %vm16130_vm1  ;;  %v6588_v31 = vrot.slane %v6586_v57, 5  ;;  %v8701_v40 = vrot.slane %v14697_v41, 4  ;;  %v8702_v19 = vrot.slane %v14700_v53, 5  ;;  %v15130_v53 = vld [vmem:[#allocation2 + $0x40] sm:$0xff]  ;;  %v8705_v16 = vrot.slane %v14703_v51, 4  ;;  %v15147_v51 = vld [vmem:[#allocation2 + $0x48] sm:$0xff] }
 0x339   : > { %11211 = vmatprep.mubr.msk.bf16.mxu0 %vm16134_vm9, %v6565_v17  ;;  %vm16140_vm0 = vmmov %vm16130_vm1  ;;  %v8687_v17 = vor.u32 %v8686_v46, %v8685_v7  ;;  %v6814_v9 = vrot.slane %v15130_v53, 6  ;;  %v8714_v7 = vshrl.u32 %v8667_v43, 16  ;;  %v8717_v46 = vshll.u32 %v8667_v43, 16  ;;  %v15209_v43 = vld [vmem:[#allocation2 + $0x88] sm:$0xff] }
 0x33a   : > { %vm16141_vm8 = vmmov %vm16137_vm6  ;;  %v6589_v62 = vor.u32 %v6588_v31, %v6585_v52 }
 0x33b   : > { %v8520_v14 = vsel %vm16141_vm8, %v8510_v44, %v8519_v13  ;;  %vm16142_vm2 = vmmov %vm16140_vm0  ;;  %v8690_v44 = vrot.slane %v14613_v23, 5  ;;  %v8688_v37 = vsel %vm6537_vm5, %v8683_v27, %v8687_v17  ;;  %v8706_v13 = vrot.slane %v14706_v28, 5 }
 0x33c   : > { %vm16143_vm14 = vmmov %vm16140_vm0  ;;  %v6590_v49 = vsel %vm6537_vm5, %v6580_v39, %v6589_v62  ;;  %v8709_v39 = vrot.slane %v15023_v26, 4  ;;  %v8716_v31 = vrot.slane %v8714_v7, 4 }
 0x33d   : > { %11392 = vmatmul.mubr.msk.bf16.gmra.mrb[32].mxu1 %vm16136_vm4, %v8502_v59  ;;  %vm16144_vm15 = vmmov %vm16140_vm0  ;;  %v6805_v59 = vrot.slane %v15080_v29, 6  ;;  %v8691_v32 = vor.u32 %v8690_v44, %v8689_v56  ;;  %v8707_v28 = vor.u32 %v8706_v13, %v8705_v16  ;;  %v15163_v56 = vld [vmem:[#allocation2 + $0x68] sm:$0xc0] }
 0x33e   : > { %11395 = vmatprep.mubr.msk.bf16.mxu1 %vm16138_vm10, %v8511_v0  ;;  %vm16145_vm1 = vmmov %vm16140_vm0  ;;  %v6808_v0 = vrot.slane %v15102_v61, 6  ;;  %v8933_v35 = vrot.slane %v15163_v56, 6 }
 0x33f   : > { %vm16147_vm11 = vmmov %vm16140_vm0  ;;  %v6807_v23 = vsel %vm6804_vm3, %v6805_v59, %v6806_v11  ;;  %v8692_v38 = vsel %vm6537_vm5, %v8687_v17, %v8691_v32  ;;  %v8696_v6 = vsel %vm6537_vm5, %v8691_v32, %v8695_v1  ;;  %v8719_v17 = vrot.slane %v8717_v46, 5  ;;  %v6777_v59 = vld [vmem:[#allocation2 + $0x18] sm:$0xe0] }
 0x340   : > { %11212 = vmatmul.mubr.msk.bf16.gmra.mrb[28].mxu0 %vm16139_vm13, %v6569_v25  ;;  %vm16148_vm9 = vmmov %vm16140_vm0  ;;  %v8698_v25 = vrot.slane %v14660_v33, 5  ;;  %v6809_v10 = vsel %vm6804_vm3, %v6806_v11, %v6808_v0  ;;  %v6811_v33 = vsel %vm6804_vm3, %v6808_v0, %v6810_v42  ;;  %v6985_v32 = vshll.u32 %v15076_v8, 16  ;;  %v15176_v0 = vld [vmem:[#allocation2 + $0x78] sm:$0xff] }
 0x341   : > { %11215 = vmatprep.mubr.msk.bf16.mxu0 %vm16140_vm0, %v6573_v45  ;;  %vm16149_vm7 = vmmov %vm16146_vm12  ;;  %v8703_v45 = vor.u32 %v8702_v19, %v8701_v40  ;;  %v8720_v62 = vor.u32 %v8719_v17, %v8716_v31  ;;  %v8936_v40 = vrot.slane %v15176_v0, 6 }
 0x342   : > { %vm16150_vm4 = vmmov %vm16140_vm0  ;;  %v8699_v41 = vor.u32 %v8698_v25, %v8697_v12  ;;  %v15180_v12 = vld [vmem:[#allocation2 + $0x80] sm:$0xff] }
 0x343   : > { %vm16151_vm6 = vmmov %vm16140_vm0 }
 0x344   : > { %vm16152_vm10 = vmmov %vm16140_vm0  ;;  %v8700_v48 = vsel %vm6537_vm5, %v8695_v1, %v8699_v41  ;;  %v8704_v20 = vsel %vm6537_vm5, %v8699_v41, %v8703_v45 }
 0x345   : > { %11396 = vmatmul.mubr.msk.bf16.gmra.mrb[36].mxu1 %vm16142_vm2, %v8520_v14  ;;  %vm16153_vm13 = vmmov %vm16140_vm0  ;;  %v8710_v14 = vrot.slane %v15026_v22, 5 }
 0x346   : > { %11401 = vmatprep.mubr.msk.bf16.mxu1 %vm16143_vm14, %v8680_v34  ;;  %vm16154_vm0 = vmmov %vm16149_vm7  ;;  %v15150_v34 = vld [vmem:[#allocation2 + $0x50] sm:$0xff] }
 0x347   : > { %v7102_v21 = vsel %vm16154_vm0, %v15015_v3, 0  ;;  %vm16155_vm8 = vmmov %vm16145_vm1  ;;  %v6812_v3 = vrot.slane %v15127_v54, 6  ;;  %v8711_v57 = vor.u32 %v8710_v14, %v8709_v39  ;;  %v6818_v27 = vrot.slane %v15150_v34, 6  ;;  %v15204_v14 = vld [vmem:[%s15680_s4 + $0x20] sm:$0xf] }
 0x348   : > { %11216 = vmatmul.mubr.msk.bf16.gmra.mrb[32].mxu0 %vm16144_vm15, %v6577_v30  ;;  %vm16156_vm2 = vmmov %vm16145_vm1  ;;  %v6816_v30 = vrot.slane %v15147_v51, 6  ;;  %v7003_v39 = vshll.u32 %v15105_v5, 16 }
 0x349   : > { %11219 = vmatprep.mubr.msk.bf16.mxu0 %vm16145_vm1, %v6581_v55  ;;  %vm16157_vm14 = vmmov %vm16154_vm0  ;;  %v6813_v15 = vsel %vm6804_vm3, %v6810_v42, %v6812_v3  ;;  %v6815_v63 = vsel %vm6804_vm3, %v6812_v3, %v6814_v9  ;;  %v8708_v55 = vsel %vm6537_vm5, %v8703_v45, %v8707_v28  ;;  %v8712_v52 = vsel %vm6537_vm5, %v8707_v28, %v8711_v57  ;;  %v15212_v28 = vld [vmem:[#allocation2 + $0x90] sm:$0xff] }
 0x34a   : > { %vm16158_vm15 = vmmov %vm16145_vm1  ;;  %v6819_v11 = vsel %vm6804_vm3, %v6816_v30, %v6818_v27  ;;  %v6977_v42 = vshll.u32 %v6777_v59, 16  ;;  %v8942_v31 = vrot.slane %v15212_v28, 6 }
 0x34b   : > { %vm16159_vm12 = vmmov %vm16145_vm1 }
 0x34c   : > { %vm16168_vm0 = vmmov %vm16145_vm1  ;;  %v6979_v45 = vrot.slane %v6977_v42, 6 }
 0x34d   : > { %11402 = vmatmul.mubr.msk.bf16.vlgmr.msra.gmra.mrb[20].mxu1 %vm16147_vm11, %v8684_v60  ;;  %vm16160_vm11 = vmmov %vm16145_vm1  ;;  %v6817_v60 = vsel %vm6804_vm3, %v6814_v9, %v6816_v30  ;;  %v6994_v9 = vshll.u32 %v15102_v61, 16 }
 0x34e   : > { %11422 = vmatpush3.bf16.msra.mxu1 %v8985_v18  ;;  %11405 = vmatprep.mubr.msk.bf16.mxu1 %vm16148_vm9, %v8688_v37  ;;  %vm16161_vm9 = vmmov %vm16145_vm1  ;;  %v15158_v18 = vld [vmem:[#allocation2 + $0x70] sm:$0xff]  ;;  %v6820_v37 = vrot.slane %v14846_v58, 6  ;;  %v6974_v58 = vshrl.u32 %v6777_v59, 16 }
 0x34f   : > { %12161 = vmatprep.subr.msk.bf16.mxu1 %vm16149_vm7, %v15089_v2  ;;  %vm16162_vm7 = vmmov %vm16145_vm1  ;;  %v8934_v44 = vrot.slane %v15158_v18, 6  ;;  %v6996_v46 = vrot.slane %v6994_v9, 6 }
 0x350   : > { %11220 = vmatmul.mubr.msk.bf16.gmra.mrb[36].mxu0 %vm16150_vm4, %v6590_v49  ;;  %vm16163_vm4 = vmmov %vm16145_vm1  ;;  %v8721_v49 = vsel %vm6537_vm5, %v8711_v57, %v8720_v62  ;;  %v6821_v25 = vsel %vm6804_vm3, %v6818_v27, %v6820_v37  ;;  %v6976_v41 = vrot.slane %v6974_v58, 5 }
 0x351   : > { %11225 = vmatprep.mubr.msk.bf16.mxu0 %vm16151_vm6, %v6807_v23  ;;  %vm16164_vm6 = vmmov %vm16145_vm1  ;;  %v6982_v23 = vshrl.u32 %v15076_v8, 16  ;;  %v8935_v1 = vsel %vm6804_vm3, %v8933_v35, %v8934_v44  ;;  %v8937_v16 = vsel %vm6804_vm3, %v8934_v44, %v8936_v40  ;;  %v7021_v35 = vshll.u32 %v15130_v53, 16 }
 0x352   : > { %vm16167_vm5 = vmmov %vm16145_vm1 }
 0x353   : > { %v6984_v19 = vrot.slane %v6982_v23, 5 }
 0x355   : > { %11406 = vmatmul.mubr.msk.bf16.gmra.mrb[24].mxu1 %vm16152_vm10, %v8692_v38  ;;  %vm16165_vm10 = vmmov %vm16145_vm1  ;;  %v6822_v38 = vrot.slane %v15168_v4, 6 }
 0x356   : > { %11409 = vmatprep.mubr.msk.bf16.mxu1 %vm16153_vm13, %v8696_v6  ;;  %vm16166_vm13 = vmmov %vm16145_vm1 }
 0x357   : > { %v6823_v6 = vsel %vm6804_vm3, %v6820_v37, %v6822_v38  ;;  %v7018_v37 = vshrl.u32 %v15130_v53, 16  ;;  %v9174_v53 = vrot.slane %v15023_v26, 5 }
 0x358   : > { %11226 = vmatmul.mubr.msk.bf16.vlgmr.msra.gmra.mrb[20].mxu0 %vm16155_vm8, %v6809_v10  ;;  %v8938_v10 = vrot.slane %v15180_v12, 6  ;;  %vm16169_vm8 = vmmov %vm16157_vm14 }
 0x359   : > { %11229 = vmatprep.mubr.msk.bf16.mxu0 %vm16156_vm2, %v6811_v33  ;;  %11246 = vmatpush3.bf16.msra.mxu0 %v7102_v21  ;;  %v6987_v21 = vrot.slane %v6985_v32, 6  ;;  %v15192_v33 = vld [vmem:[#allocation2 + $0x68] sm:$0x3f]  ;;  %v9229_v3 = vsel %vm16169_vm8, %v15089_v2, 0  ;;  %vm16170_vm2 = vmmov %vm16168_vm0 }
 0x35a   : > { %12153 = vmatprep.subr.msk.bf16.mxu0 %vm16157_vm14, %v15123_v24  ;;  %vm6972_vm14 = vsmask.f32 2304  ;;  %v8939_v2 = vsel %vm6804_vm3, %v8936_v40, %v8938_v10 }
 0x35b   : > { %v6988_v13 = vor.u32 %v6987_v21, %v6984_v19  ;;  %v7020_v19 = vrot.slane %v7018_v37, 5 }
 0x35d   : > { %11410 = vmatmul.mubr.msk.bf16.gmra.mrb[28].mxu1 %vm16158_vm15, %v8700_v48  ;;  %v6991_v48 = vshrl.u32 %v15102_v61, 16  ;;  %vm16171_vm15 = vmmov %vm16168_vm0 }
 0x35e   : > { %11413 = vmatprep.mubr.msk.bf16.mxu1 %vm16145_vm1, %v8704_v20  ;;  %v7000_v20 = vshrl.u32 %v15105_v5, 16  ;;  %vm16172_vm1 = vmmov %vm16169_vm8 }
 0x35f   : > { %v6993_v7 = vrot.slane %v6991_v48, 5  ;;  %vm16182_vm8 = vmmov %vm16168_vm0 }
 0x360   : > { %11230 = vmatmul.mubr.msk.bf16.gmra.mrb[24].mxu0 %vm16159_vm12, %v6813_v15  ;;  %v6824_v15 = vrot.slane %v15192_v33, 6  ;;  %vm16173_vm12 = vmmov %vm16168_vm0  ;;  %v7002_v27 = vrot.slane %v7000_v20, 5 }
 0x361   : > { %11233 = vmatprep.mubr.msk.bf16.mxu0 %vm16160_vm11, %v6815_v63  ;;  %v6980_v63 = vor.u32 %v6979_v45, %v6976_v41  ;;  %vm16174_vm11 = vmmov %vm16168_vm0  ;;  %v6997_v17 = vor.u32 %v6996_v46, %v6993_v7  ;;  %v7027_v41 = vshrl.u32 %v15147_v51, 16  ;;  %v7030_v45 = vshll.u32 %v15147_v51, 16 }
 0x362   : > { %v6825_v57 = vsel %vm6804_vm3, %v6822_v38, %v6824_v15  ;;  %v7039_v15 = vshll.u32 %v15150_v34, 16 }
 0x363   : > { %v6989_v30 = vsel %vm6972_vm14, %v6980_v63, %v6988_v13  ;;  %v6998_v58 = vsel %vm6972_vm14, %v6988_v13, %v6997_v17  ;;  %v7036_v13 = vshrl.u32 %v15150_v34, 16  ;;  %v7032_v7 = vrot.slane %v7030_v45, 6 }
 0x365   : > { %11414 = vmatmul.mubr.msk.bf16.gmra.mrb[32].mxu1 %vm16161_vm9, %v8708_v55  ;;  %v8940_v55 = vrot.slane %v15209_v43, 6  ;;  %vm16175_vm9 = vmmov %vm16168_vm0 }
 0x366   : > { %11417 = vmatprep.mubr.msk.bf16.mxu1 %vm16162_vm7, %v8712_v52  ;;  %v7005_v52 = vrot.slane %v7003_v39, 6  ;;  %vm16176_vm7 = vmmov %vm16168_vm0 }
 0x367   : > { %v8941_v44 = vsel %vm6804_vm3, %v8938_v10, %v8940_v55  ;;  %v8943_v59 = vsel %vm6804_vm3, %v8940_v55, %v8942_v31  ;;  %v7038_v55 = vrot.slane %v7036_v13, 5 }
 0x368   : > { %11234 = vmatmul.mubr.msk.bf16.gmra.mrb[28].mxu0 %vm16163_vm4, %v6817_v60  ;;  %v7009_v60 = vshrl.u32 %v15127_v54, 16  ;;  %v7006_v62 = vor.u32 %v7005_v52, %v7002_v27  ;;  %vm16177_vm4 = vmmov %vm16172_vm1  ;;  %v7041_v27 = vrot.slane %v7039_v15, 6  ;;  %v15278_v52 = vld [vmem:[#allocation2 + $0xb0] sm:$0xff] }
 0x369   : > { %11237 = vmatprep.mubr.msk.bf16.mxu0 %vm16164_vm6, %v6819_v11  ;;  %v7012_v11 = vshll.u32 %v15127_v54, 16  ;;  %v7305_v38 = vsel %vm16177_vm4, %v15123_v24, 0  ;;  %vm16178_vm6 = vmmov %vm16168_vm0  ;;  %v7023_v24 = vrot.slane %v7021_v35, 6  ;;  %v9181_v54 = vshrl.u32 %v15278_v52, 16 }
 0x36a   : > { %v7011_v42 = vrot.slane %v7009_v60, 5 }
 0x36d   : > { %11418 = vmatmul.mubr.msk.bf16.gmra.mrb[36].mxu1 %vm16165_vm10, %v8721_v49  ;;  %v15237_v49 = vld [vmem:[#allocation2 + $0x98] sm:$0xff]  ;;  %vm16179_vm10 = vmmov %vm16168_vm0 }
 0x36e   : > { %11423 = vmatprep.mubr.msk.bf16.mxu1 %vm16166_vm13, %v8935_v1  ;;  %v15240_v1 = vld [vmem:[#allocation2 + $0xa0] sm:$0xff]  ;;  %v8944_v40 = vrot.slane %v15237_v49, 6  ;;  %vm16180_vm13 = vmmov %vm16168_vm0 }
 0x36f   : > { %v8946_v21 = vrot.slane %v15240_v1, 6  ;;  %v9163_v61 = vshrl.u32 %v15240_v1, 16 }
 0x370   : > { %11238 = vmatmul.mubr.msk.bf16.gmra.mrb[32].mxu0 %vm16167_vm5, %v6821_v25  ;;  %v7014_v25 = vrot.slane %v7012_v11, 6  ;;  %vm16181_vm5 = vmmov %vm16168_vm0 }
 0x371   : > { %11241 = vmatprep.mubr.msk.bf16.mxu0 %vm16168_vm0, %v6823_v6  ;;  %v7007_v6 = vsel %vm6972_vm14, %v6997_v17, %v7006_v62  ;;  %v9109_v17 = vshrl.u32 %v15158_v18, 16 }
 0x372   : > { %v7015_v10 = vor.u32 %v7014_v25, %v7011_v42  ;;  %v7042_v42 = vor.u32 %v7041_v27, %v7038_v55  ;;  %v15285_v25 = vld [vmem:[#allocation2 + $0xb8] sm:$0x3f]  ;;  %v9118_v55 = vshrl.u32 %v15176_v0, 16  ;;  %v9121_v27 = vshll.u32 %v15176_v0, 16 }
 0x373   : > { %v9193_v51 = vshll.u32 %v15285_v25, 16 }
 0x374   : > { %v7016_v63 = vsel %vm6972_vm14, %v7006_v62, %v7015_v10 }
 0x375   : > { %11424 = vmatmul.mubr.msk.bf16.vlgmr.msra.gmra.mrb[20].mxu1 %vm16170_vm2, %v8937_v16  ;;  %v7024_v16 = vor.u32 %v7023_v24, %v7020_v19  ;;  %vm16183_vm2 = vmmov %vm16168_vm0  ;;  %v7057_v19 = vshll.u32 %v15168_v4, 16  ;;  %v9111_v24 = vrot.slane %v9109_v17, 5 }
 0x376   : > { %11444 = vmatpush3.bf16.msra.mxu1 %v9229_v3  ;;  %11427 = vmatprep.mubr.msk.bf16.mxu1 %vm16171_vm15, %v8939_v2  ;;  %v8945_v3 = vsel %vm6804_vm3, %v8942_v31, %v8944_v40  ;;  %v8947_v2 = vsel %vm6804_vm3, %v8944_v40, %v8946_v21  ;;  %v8908_v31 = vld [vmem:[#allocation2 + $0x68] sm:$0xe0]  ;;  %vm16184_vm15 = vmmov %vm16168_vm0 }
 0x377   : > { %12162 = vmatprep.subr.msk.bf16.mxu1 %vm16172_vm1, %v15204_v14  ;;  %v7025_v46 = vsel %vm6972_vm14, %v7015_v10, %v7024_v16  ;;  %vm16185_vm1 = vmmov %vm16168_vm0 }
 0x378   : > { %11242 = vmatmul.mubr.msk.bf16.gmra.mrb[36].mxu0 %vm16173_vm12, %v6825_v57  ;;  %v7029_v57 = vrot.slane %v7027_v41, 5  ;;  %vm16186_vm12 = vmmov %vm16168_vm0 }
 0x379   : > { %11247 = vmatprep.mubr.msk.bf16.mxu0 %vm16174_vm11, %v6989_v30  ;;  %v8948_v30 = vrot.slane %v14922_v47, 6  ;;  %v9104_v47 = vshll.u32 %v8908_v31, 16  ;;  %vm16187_vm11 = vmmov %vm16168_vm0 }
 0x37a   : > { %v7033_v62 = vor.u32 %v7032_v7, %v7029_v57 }
 0x37b   : > { %v9106_v7 = vrot.slane %v9104_v47, 6  ;;  %v15764_v47 = vshll.u32 %v15180_v12, 16 }
 0x37d   : > { %11428 = vmatmul.mubr.msk.bf16.gmra.mrb[24].mxu1 %vm16175_vm9, %v8941_v44  ;;  %v15763_v44 = vshll.u32 %v15158_v18, 16  ;;  %vm16189_vm9 = vmmov %vm16168_vm0 }
 0x37e   : > { %11431 = vmatprep.mubr.msk.bf16.mxu1 %vm16176_vm7, %v8943_v59  ;;  %v8950_v59 = vrot.slane %v15278_v52, 6  ;;  %vm16190_vm7 = vmmov %vm16168_vm0 }
 0x37f   : > { %v9114_v10 = vrot.slane %v15763_v44, 6  ;;  %v9120_v44 = vrot.slane %v9118_v55, 5 }
 0x380   : > { %11248 = vmatmul.mubr.msk.bf16.vlgmr.msra.gmra.mrb[20].mxu0 %vm16178_vm6, %v6998_v58  ;;  %v8949_v58 = vsel %vm6804_vm3, %v8946_v21, %v8948_v30  ;;  %v8951_v40 = vsel %vm6804_vm3, %v8948_v30, %v8950_v59  ;;  %v7047_v21 = vrot.slane %v14932_v36, 5  ;;  %vm16191_vm6 = vmmov %vm16168_vm0 }
 0x381   : > { %11251 = vmatprep.mubr.msk.bf16.mxu0 %vm16179_vm10, %v7007_v6  ;;  %11268 = vmatpush3.bf16.msra.mxu0 %v7305_v38  ;;  %v9101_v38 = vshrl.u32 %v8908_v31, 16  ;;  %v15762_v6 = vshrl.u32 %v15168_v4, 16  ;;  %v9115_v31 = vor.u32 %v9114_v10, %v9111_v24  ;;  %vm7220_vm10 = vsmask.f32 1280 }
 0x383   : > { %v9103_v57 = vrot.slane %v9101_v38, 5  ;;  %v7056_v30 = vrot.slane %v15762_v6, 5  ;;  %v9127_v38 = vshrl.u32 %v15180_v12, 16 }
 0x385   : > { %11432 = vmatmul.mubr.msk.bf16.gmra.mrb[28].mxu1 %vm16180_vm13, %v8945_v3  ;;  %v7050_v3 = vrot.slane %v14935_v50, 6  ;;  %vm16192_vm13 = vmmov %vm16168_vm0 }
 0x386   : > { %11435 = vmatprep.mubr.msk.bf16.mxu1 %vm16181_vm5, %v8947_v2  ;;  %v7034_v2 = vsel %vm6972_vm14, %v7024_v16, %v7033_v62  ;;  %v7059_v16 = vrot.slane %v7057_v19, 6  ;;  %vm16193_vm5 = vmmov %vm16168_vm0 }
 0x388   : > { %11252 = vmatmul.mubr.msk.bf16.gmra.mrb[24].mxu0 %vm16168_vm0, %v7016_v63  ;;  %v8952_v63 = vrot.slane %v15285_v25, 6  ;;  %v7060_v24 = vor.u32 %v7059_v16, %v7056_v30  ;;  %v7229_v30 = vrot.slane %v6982_v23, 6 }
 0x389   : > { %11255 = vmatprep.mubr.msk.bf16.mxu0 %vm16182_vm8, %v7025_v46  ;;  %v7043_v46 = vsel %vm6972_vm14, %v7033_v62, %v7042_v42  ;;  %v7063_v62 = vshrl.u32 %v15192_v33, 16  ;;  %vm16194_vm8 = vmmov %vm16168_vm0 }
 0x38a   : > { %v8953_v6 = vsel %vm6804_vm3, %v8950_v59, %v8952_v63  ;;  %vm16188_vm3 = vmmov %vm16168_vm0  ;;  %v7222_v59 = vshrl.u32 %v15080_v29, 16  ;;  %v7225_v63 = vshll.u32 %v15080_v29, 16 }
 0x38d   : > { %11436 = vmatmul.mubr.msk.bf16.gmra.mrb[32].mxu1 %vm16183_vm2, %v8949_v58  ;;  %v7051_v58 = vor.u32 %v7050_v3, %v7047_v21  ;;  %v9129_v21 = vrot.slane %v9127_v38, 5  ;;  %v9132_v3 = vrot.slane %v15764_v47, 6  ;;  %v7227_v47 = vrot.slane %v7225_v63, 7  ;;  %vm16195_vm2 = vmmov %vm16168_vm0 }
 0x38e   : > { %11439 = vmatprep.mubr.msk.bf16.mxu1 %vm16184_vm15, %v8951_v40  ;;  %v9107_v40 = vor.u32 %v9106_v7, %v9103_v57  ;;  %v7233_v63 = vrot.slane %v6991_v48, 6  ;;  %vm16196_vm15 = vmmov %vm16168_vm0 }
 0x38f   : > { %v7061_v57 = vsel %vm6972_vm14, %v7051_v58, %v7060_v24  ;;  %v9133_v29 = vor.u32 %v9132_v3, %v9129_v21 }
 0x390   : > { %11256 = vmatmul.mubr.msk.bf16.gmra.mrb[28].mxu0 %vm16185_vm1, %v7034_v2  ;;  %v7066_v2 = vshll.u32 %v15192_v33, 16  ;;  %v9116_v10 = vsel %vm6972_vm14, %v9107_v40, %v9115_v31  ;;  %v7052_v33 = vsel %vm6972_vm14, %v7042_v42, %v7051_v58  ;;  %v7230_v40 = vrot.slane %v6985_v32, 7  ;;  %vm16197_vm1 = vmmov %vm16168_vm0 }
 0x391   : > { %11259 = vmatprep.mubr.msk.bf16.mxu0 %vm16186_vm12, %v7043_v46  ;;  %v9123_v46 = vrot.slane %v9121_v27, 6  ;;  %v9136_v42 = vshrl.u32 %v15209_v43, 16  ;;  %v9145_v58 = vshrl.u32 %v15212_v28, 16  ;;  %vm16198_vm12 = vmmov %vm16168_vm0 }
 0x392   : > { %v7068_v7 = vrot.slane %v7066_v2, 6  ;;  %v7224_v2 = vrot.slane %v7222_v59, 6  ;;  %v7231_v32 = vor.u32 %v7230_v40, %v7229_v30 }
 0x393   : > { %v9124_v16 = vor.u32 %v9123_v46, %v9120_v44  ;;  %v9430_v44 = vsel %vm16177_vm4, %v15204_v14, 0  ;;  %v9138_v46 = vrot.slane %v9136_v42, 5  ;;  %v9147_v3 = vrot.slane %v9145_v58, 5  ;;  %vm16204_vm4 = vmmov %vm16168_vm0 }
 0x394   : > { %v7228_v59 = vor.u32 %v7227_v47, %v7224_v2  ;;  %v9154_v47 = vshrl.u32 %v15237_v49, 16 }
 0x395   : > { %11440 = vmatmul.mubr.msk.bf16.gmra.mrb[36].mxu1 %vm16187_vm11, %v8953_v6  ;;  %v7065_v6 = vrot.slane %v7063_v62, 5  ;;  %v9148_v62 = vshll.u32 %v15212_v28, 16  ;;  %v9125_v8 = vsel %vm6972_vm14, %v9115_v31, %v9124_v16  ;;  %v9134_v21 = vsel %vm6972_vm14, %v9124_v16, %v9133_v29  ;;  %vm16199_vm11 = vmmov %vm16168_vm0 }
 0x396   : > { %11445 = vmatprep.mubr.msk.bf16.mxu1 %vm16188_vm3, %v9116_v10  ;;  %v9139_v10 = vshll.u32 %v15209_v43, 16  ;;  %v9157_v16 = vshll.u32 %v15237_v49, 16  ;;  %v9156_v40 = vrot.slane %v9154_v47, 5  ;;  %vm16200_vm3 = vmmov %vm16168_vm0  ;;  %v9383_v49 = vrot.slane %v15026_v22, 7 }
 0x397   : > { %v7069_v23 = vor.u32 %v7068_v7, %v7065_v6  ;;  %v9150_v14 = vrot.slane %v9148_v62, 6  ;;  %v7237_v6 = vrot.slane %v7000_v20, 6  ;;  %v7238_v7 = vrot.slane %v7003_v39, 7 }
 0x398   : > { %11260 = vmatmul.mubr.msk.bf16.gmra.mrb[32].mxu0 %vm16189_vm9, %v7052_v33  ;;  %v9141_v33 = vrot.slane %v9139_v10, 6  ;;  %v9159_v2 = vrot.slane %v9157_v16, 6  ;;  %vm16201_vm9 = vmmov %vm16168_vm0 }
 0x399   : > { %11263 = vmatprep.mubr.msk.bf16.mxu0 %vm16190_vm7, %v7061_v57  ;;  %v7070_v31 = vsel %vm6972_vm14, %v7060_v24, %v7069_v23  ;;  %v7234_v57 = vrot.slane %v6994_v9, 7  ;;  %v7232_v24 = vsel %vm7220_vm10, %v7228_v59, %v7231_v32  ;;  %v9151_v48 = vor.u32 %v9150_v14, %v9147_v3  ;;  %vm16202_vm7 = vmmov %vm16168_vm0 }
 0x39a   : > { %v9142_v30 = vor.u32 %v9141_v33, %v9138_v46  ;;  %v9166_v9 = vshll.u32 %v15240_v1, 16  ;;  %v7239_v39 = vor.u32 %v7238_v7, %v7237_v6  ;;  %v7242_v46 = vrot.slane %v7012_v11, 7 }
 0x39b   : > { %v7235_v20 = vor.u32 %v7234_v57, %v7233_v63  ;;  %v7245_v33 = vrot.slane %v7018_v37, 6  ;;  %v9184_v11 = vshll.u32 %v15278_v52, 16  ;;  %v7249_v7 = vrot.slane %v7027_v41, 6  ;;  %v15500_v52 = vld [vmem:[%s15681_s5] ss:$0 sm:$0xff] }
 0x39c   : > { %v9143_v5 = vsel %vm6972_vm14, %v9133_v29, %v9142_v30  ;;  %v9152_v23 = vsel %vm6972_vm14, %v9142_v30, %v9151_v48  ;;  %v7241_v29 = vrot.slane %v7009_v60, 6  ;;  %v7253_v30 = vrot.slane %v7036_v13, 6 }
 0x39d   : > { %11446 = vmatmul.mubr.msk.bf16.vlgmr.msra.gmra.mrb[20].mxu1 %vm16191_vm6, %v9125_v8  ;;  %v9168_v8 = vrot.slane %v9166_v9, 6  ;;  %v7236_v3 = vsel %vm7220_vm10, %v7231_v32, %v7235_v20  ;;  %v7240_v14 = vsel %vm7220_vm10, %v7235_v20, %v7239_v39  ;;  %v9186_v20 = vrot.slane %v9184_v11, 6  ;;  %vm16205_vm6 = vmmov %vm16168_vm0 }
 0x39e   : > { %11466 = vmatpush3.bf16.msra.mxu1 %v9430_v44  ;;  %11449 = vmatprep.mubr.msk.bf16.mxu1 %vm16192_vm13, %v9134_v21  ;;  %v9165_v44 = vrot.slane %v9163_v61, 5  ;;  %v7246_v21 = vrot.slane %v7021_v35, 7  ;;  %v7243_v60 = vor.u32 %v7242_v46, %v7241_v29  ;;  %v9177_v35 = vrot.slane %v15026_v22, 6  ;;  %vm16206_vm13 = vmmov %vm16168_vm0 }
 0x39f   : > { %v9190_v41 = vshrl.u32 %v15285_v25, 16  ;;  %v9195_v29 = vrot.slane %v9193_v51, 6  ;;  %v16203_v25 = vshll.u32 %v15158_v18, 16  ;;  %v7217_v18 = vld [vmem:[#allocation2 + $0x68] sm:$0x7f]  ;;  %v9386_v1 = vrot.slane %v9181_v54, 6 }
 0x3a0   : > { %11264 = vmatmul.mubr.msk.bf16.gmra.mrb[36].mxu0 %vm16193_vm5, %v7070_v31  ;;  %v9160_v31 = vor.u32 %v9159_v2, %v9156_v40  ;;  %v9169_v59 = vor.u32 %v9168_v8, %v9165_v44  ;;  %v7247_v63 = vor.u32 %v7246_v21, %v7245_v33  ;;  %v7244_v57 = vsel %vm7220_vm10, %v7239_v39, %v7243_v60  ;;  %vm16208_vm5 = vmmov %vm16168_vm0 }
 0x3a1   : > { %11269 = vmatprep.mubr.msk.bf16.mxu0 %vm16168_vm0, %v7232_v24  ;;  %v7250_v24 = vrot.slane %v7030_v45, 7  ;;  %v7254_v39 = vrot.slane %v7039_v15, 7  ;;  %v9347_v40 = vshrl.u32 %v15163_v56, 16  ;;  %v9350_v2 = vshll.u32 %v15163_v56, 16 }
 0x3a2   : > { %v9161_v37 = vsel %vm6972_vm14, %v9151_v48, %v9160_v31  ;;  %v9170_v32 = vsel %vm6972_vm14, %v9160_v31, %v9169_v59  ;;  %v7248_v6 = vsel %vm7220_vm10, %v7243_v60, %v7247_v63  ;;  %v9183_v48 = vrot.slane %v9181_v54, 5 }
 0x3a3   : > { %v7251_v45 = vor.u32 %v7250_v24, %v7249_v7  ;;  %v7255_v44 = vor.u32 %v7254_v39, %v7253_v30  ;;  %v9192_v8 = vrot.slane %v9190_v41, 5  ;;  %v9354_v15 = vrot.slane %v9109_v17, 6 }
 0x3a4   : > { %v9187_v13 = vor.u32 %v9186_v20, %v9183_v48  ;;  %v9355_v46 = vrot.slane %v16203_v25, 7  ;;  %v7257_v33 = vrot.slane %v14932_v36, 6  ;;  %v7258_v21 = vrot.slane %v14935_v50, 7 }
 0x3a5   : > { %11450 = vmatmul.mubr.msk.bf16.gmra.mrb[24].mxu1 %vm16194_vm8, %v9143_v5  ;;  %v9178_v5 = vor.u32 %v9177_v35, %v9174_v53  ;;  %v7252_v56 = vsel %vm7220_vm10, %v7247_v63, %v7251_v45  ;;  %v7256_v31 = vsel %vm7220_vm10, %v7251_v45, %v7255_v44  ;;  %v16207_v60 = vshrl.u32 %v15168_v4, 16  ;;  %vm16211_vm8 = vmmov %vm16168_vm0 }
 0x3a6   : > { %11453 = vmatprep.mubr.msk.bf16.mxu1 %vm16195_vm2, %v9152_v23  ;;  %v9356_v17 = vor.u32 %v9355_v46, %v9354_v15  ;;  %v7262_v36 = vrot.slane %v7057_v19, 7  ;;  %v7259_v63 = vor.u32 %v7258_v21, %v7257_v33  ;;  %v7266_v35 = vshrl.u32 %v7217_v18, 16  ;;  %vm16212_vm2 = vmmov %vm16168_vm0 }
 0x3a7   : > { %v9179_v23 = vsel %vm6972_vm14, %v9169_v59, %v9178_v5  ;;  %v9188_v34 = vsel %vm6972_vm14, %v9178_v5, %v9187_v13  ;;  %v9196_v59 = vor.u32 %v9195_v29, %v9192_v8  ;;  %v7269_v7 = vshll.u32 %v7217_v18, 16 }
 0x3a8   : > { %11270 = vmatmul.mubr.msk.bf16.vlgmr.msra.gmra.mrb[20].mxu0 %vm16196_vm15, %v7236_v3  ;;  %v9349_v3 = vrot.slane %v9347_v40, 6  ;;  %v9362_v4 = vrot.slane %v9127_v38, 6  ;;  %v16209_v19 = vshll.u32 %v15180_v12, 16  ;;  %v7260_v48 = vsel %vm7220_vm10, %v7255_v44, %v7259_v63  ;;  %vm16213_vm15 = vmmov %vm16168_vm0 }
 0x3a9   : > { %11273 = vmatprep.mubr.msk.bf16.mxu0 %vm16197_vm1, %v7240_v14  ;;  %v9352_v14 = vrot.slane %v9350_v2, 7  ;;  %v9197_v50 = vsel %vm6972_vm14, %v9187_v13, %v9196_v59  ;;  %vm16210_vm14 = vmmov %vm16168_vm0  ;;  %v7271_v20 = vrot.slane %v7269_v7, 7  ;;  %v9366_v12 = vrot.slane %v9136_v42, 6 }
 0x3aa   : > { %v9363_v24 = vrot.slane %v16209_v19, 7  ;;  %v9367_v39 = vrot.slane %v9139_v10, 7  ;;  %v9370_v45 = vrot.slane %v9145_v58, 6  ;;  %v9371_v13 = vrot.slane %v9148_v62, 7  ;;  %vm16214_vm1 = vmmov %vm16168_vm0 }
 0x3ab   : > { %v9353_v53 = vor.u32 %v9352_v14, %v9349_v3  ;;  %v9374_v2 = vrot.slane %v9154_v47, 6  ;;  %v9378_v58 = vrot.slane %v9163_v61, 6  ;;  %v9379_v62 = vrot.slane %v9166_v9, 7  ;;  %v15505_v3 = vld [vmem:[%s15682_s6] ss:$0 sm:$0xff] }
 0x3ac   : > { %v9364_v5 = vor.u32 %v9363_v24, %v9362_v4  ;;  %v9368_v42 = vor.u32 %v9367_v39, %v9366_v12  ;;  %v9372_v43 = vor.u32 %v9371_v13, %v9370_v45  ;;  %v9382_v47 = vrot.slane %v15023_v26, 6 }
 0x3ad   : > { %11454 = vmatmul.mubr.msk.bf16.gmra.mrb[28].mxu1 %vm16198_vm12, %v9161_v37  ;;  %v7261_v37 = vrot.slane %v16207_v60, 6  ;;  %vm16215_vm12 = vmmov %vm16168_vm0  ;;  %v9380_v8 = vor.u32 %v9379_v62, %v9378_v58  ;;  %v9387_v61 = vrot.slane %v9184_v11, 7 }
 0x3ae   : > { %11457 = vmatprep.mubr.msk.bf16.mxu1 %vm16199_vm11, %v9170_v32  ;;  %v9358_v32 = vrot.slane %v9118_v55, 6  ;;  %v9369_v10 = vsel %vm7220_vm10, %v9364_v5, %v9368_v42  ;;  %v9373_v28 = vsel %vm7220_vm10, %v9368_v42, %v9372_v43  ;;  %vm16216_vm11 = vmmov %vm16168_vm0  ;;  %v9384_v9 = vor.u32 %v9383_v49, %v9382_v47 }
 0x3af   : > { %v7263_v30 = vor.u32 %v7262_v36, %v7261_v37  ;;  %v9388_v26 = vor.u32 %v9387_v61, %v9386_v1 }
 0x3b0   : > { %11274 = vmatmul.mubr.msk.bf16.gmra.mrb[24].mxu0 %vm16200_vm3, %v7244_v57  ;;  %v9359_v57 = vrot.slane %v9121_v27, 7  ;;  %v7268_v27 = vrot.slane %v7266_v35, 6  ;;  %vm16217_vm3 = vmmov %vm16168_vm0  ;;  %v9385_v22 = vsel %vm7220_vm10, %v9380_v8, %v9384_v9 }
 0x3b1   : > { %11277 = vmatprep.mubr.msk.bf16.mxu0 %vm16201_vm9, %v7248_v6  ;;  %v9357_v6 = vsel %vm7220_vm10, %v9353_v53, %v9356_v17  ;;  %v7264_v0 = vsel %vm7220_vm10, %v7259_v63, %v7263_v30  ;;  %vm16218_vm9 = vmmov %vm16168_vm0 }
 0x3b2   : > { %v9360_v55 = vor.u32 %v9359_v57, %v9358_v32  ;;  %v7272_v41 = vor.u32 %v7271_v20, %v7268_v27 }
 0x3b4   : > { %v9361_v38 = vsel %vm7220_vm10, %v9356_v17, %v9360_v55  ;;  %v9365_v51 = vsel %vm7220_vm10, %v9360_v55, %v9364_v5  ;;  %v7273_v40 = vsel %vm7220_vm10, %v7263_v30, %v7272_v41 }
 0x3b5   : > { %11458 = vmatmul.mubr.msk.bf16.gmra.mrb[32].mxu1 %vm16202_vm7, %v9179_v23  ;;  %v9375_v23 = vrot.slane %v9157_v16, 7  ;;  %vm16219_vm7 = vmmov %vm16168_vm0 }
 0x3b6   : > { %11461 = vmatprep.mubr.msk.bf16.mxu1 %vm16204_vm4, %v9188_v34  ;;  %v9344_v34 = vld [vmem:[#allocation2 + $0xb8] sm:$0x7f]  ;;  %vm16220_vm4 = vmmov %vm16168_vm0 }
 0x3b7   : > { %v9376_v44 = vor.u32 %v9375_v23, %v9374_v2  ;;  %v9391_v15 = vshrl.u32 %v9344_v34, 16  ;;  %v9394_v25 = vshll.u32 %v9344_v34, 16 }
 0x3b8   : > { %11278 = vmatmul.mubr.msk.bf16.gmra.mrb[28].mxu0 %vm16205_vm6, %v7252_v56  ;;  %v9389_v56 = vsel %vm7220_vm10, %v9384_v9, %v9388_v26  ;;  %vm16221_vm6 = vmmov %vm16168_vm0 }
 0x3b9   : > { %11281 = vmatprep.mubr.msk.bf16.mxu0 %vm16206_vm13, %v7256_v31  ;;  %v9377_v29 = vsel %vm7220_vm10, %v9372_v43, %v9376_v44  ;;  %v9381_v16 = vsel %vm7220_vm10, %v9376_v44, %v9380_v8  ;;  %v9393_v46 = vrot.slane %v9391_v15, 6  ;;  %v9396_v33 = vrot.slane %v9394_v25, 7  ;;  %vm16223_vm13 = vmmov %vm16168_vm0 }
 0x3bb   : > { %v9397_v21 = vor.u32 %v9396_v33, %v9393_v46 }
 0x3bd   : > { %11462 = vmatmul.mubr.msk.bf16.gmra.mrb[36].mxu1 %vm16208_vm5, %v9197_v50  ;;  %v9398_v54 = vsel %vm7220_vm10, %v9388_v26, %v9397_v21  ;;  %vm16222_vm10 = vmmov %vm16168_vm0 }
 0x3be   : > { %11467 = vmatprep.mubr.msk.bf16.mxu1 %vm16210_vm14, %v9357_v6  ;;  %vm16224_vm5 = vmmov %vm16168_vm0 }
 0x3bf   : > { %vm16225_vm14 = vmmov %vm16168_vm0 }
 0x3c0   : > { %11282 = vmatmul.mubr.msk.bf16.gmra.mrb[32].mxu0 %vm16168_vm0, %v7260_v48 }
 0x3c1   : > { %11285 = vmatprep.mubr.msk.bf16.mxu0 %vm16211_vm8, %v7264_v0  ;;  %vm16226_vm8 = vmmov %vm16168_vm0 }
 0x3c5   : > { %11468 = vmatmul.mubr.msk.bf16.vlgmr.msra.gmra.mrb[20].mxu1 %vm16212_vm2, %v9361_v38  ;;  %vm16227_vm2 = vmmov %vm16168_vm0 }
 0x3c6   : > { %11471 = vmatprep.mubr.msk.bf16.mxu1 %vm16213_vm15, %v9365_v51  ;;  %vm16228_vm15 = vmmov %vm16168_vm0 }
 0x3c8   : > { %11286 = vmatmul.mubr.msk.bf16.gmra.mrb[36].mxu0 %vm16214_vm1, %v7273_v40  ;;  %vm16229_vm1 = vmmov %vm16168_vm0 }
 0x3cd   : > { %11472 = vmatmul.mubr.msk.bf16.gmra.mrb[24].mxu1 %vm16215_vm12, %v9369_v10  ;;  %vm16230_vm12 = vmmov %vm16168_vm0 }
 0x3ce   : > { %11475 = vmatprep.mubr.msk.bf16.mxu1 %vm16216_vm11, %v9373_v28  ;;  %vm16231_vm11 = vmmov %vm16168_vm0 }
 0x3d5   : > { %11476 = vmatmul.mubr.msk.bf16.gmra.mrb[28].mxu1 %vm16217_vm3, %v9377_v29  ;;  %vm16232_vm3 = vmmov %vm16168_vm0 }
 0x3d6   : > { %11479 = vmatprep.mubr.msk.bf16.mxu1 %vm16218_vm9, %v9381_v16  ;;  %vm16233_vm9 = vmmov %vm16168_vm0 }
 0x3dd   : > { %11480 = vmatmul.mubr.msk.bf16.gmra.mrb[32].mxu1 %vm16219_vm7, %v9385_v22  ;;  %vm16234_vm7 = vmmov %vm16168_vm0 }
 0x3de   : > { %11483 = vmatprep.mubr.msk.bf16.mxu1 %vm16220_vm4, %v9389_v56  ;;  %vm16235_vm4 = vmmov %vm16168_vm0 }
 0x3e5   : > { %11484 = vmatmul.mubr.msk.bf16.gmra.mrb[36].mxu1 %vm16221_vm6, %v9398_v54  ;;  %vm16236_vm6 = vmmov %vm16168_vm0 }
 0x47b   : > { %v11271_v11 = vpop.f32.mrb[20].mxu0 }
 0x47c   : > { %v7469_v14 = vmul.f32 %v11271_v11, %v15500_v52  ;;  %v7341_v31 = vpop.f32.mrb[21].mxu0 }
 0x47d   : > { %v7467_v59 = vmul.f32 %v15500_v52, %v7341_v31  ;;  %v11272_v17 = vpop.f32.mrb[22].mxu0 }
 0x47e   : > { %v7496_v18 = vadd.f32 %v15505_v3, %v7469_v14  ;;  %v7470_v60 = vmul.f32 %v11272_v17, %v15500_v52  ;;  %v7344_v37 = vpop.f32.mrb[23].mxu0 }
 0x47f   : > { %v7494_v36 = vadd.f32 %v15505_v3, %v7467_v59  ;;  %v7468_v63 = vmul.f32 %v15500_v52, %v7344_v37 }
 0x480   : > { %v7516_v53 = vmul.f32 0.01, %v7496_v18  ;;  %v7497_v50 = vadd.f32 %v15505_v3, %v7470_v60 }
 0x481   : > { %v7514_v35 = vmul.f32 0.01, %v7494_v36  ;;  %v7495_v32 = vadd.f32 %v15505_v3, %v7468_v63 }
 0x482   : > { %v7536_v57 = vmax.f32 %v7496_v18, %v7516_v53  ;;  %v7517_v6 = vmul.f32 0.01, %v7497_v50 }
 0x483   : > { %v7534_v7 = vmax.f32 %v7494_v36, %v7514_v35  ;;  %v7515_v4 = vmul.f32 0.01, %v7495_v32  ;;  %v11275_v19 = vpop.f32.mrb[24].mxu0 }
 0x484   : > { %7556 = vst.msk [vmem:[%s15518_s8 + $0x10] sm:$0xff] %vm16222_vm10, %v7536_v57  ;;  %v7537_v24 = vmax.f32 %v7497_v50, %v7517_v6  ;;  %v7473_v30 = vmul.f32 %v11275_v19, %v15500_v52  ;;  %v7357_v48 = vpop.f32.mrb[25].mxu0  ;;  %vm16237_vm10 = vmmov %vm16168_vm0 }
 0x485   : > { %7554 = vst.msk [vmem:[%s15518_s8] sm:$0xff] %vm16223_vm13, %v7534_v7  ;;  %v7535_v0 = vmax.f32 %v7495_v32, %v7515_v4  ;;  %v7471_v55 = vmul.f32 %v15500_v52, %v7357_v48  ;;  %v11276_v27 = vpop.f32.mrb[26].mxu0  ;;  %vm16238_vm13 = vmmov %vm16168_vm0 }
 0x486   : > { %7557 = vst.msk [vmem:[%s15518_s8 + $0x18] sm:$0xff] %vm16224_vm5, %v7537_v24  ;;  %v7500_v20 = vadd.f32 %v15505_v3, %v7473_v30  ;;  %v7474_v5 = vmul.f32 %v11276_v27, %v15500_v52  ;;  %v7360_v38 = vpop.f32.mrb[27].mxu0  ;;  %vm16239_vm5 = vmmov %vm16168_vm0 }
 0x487   : > { %7555 = vst.msk [vmem:[%s15518_s8 + $0x8] sm:$0xff] %vm16225_vm14, %v7535_v0  ;;  %v7498_v12 = vadd.f32 %v15505_v3, %v7471_v55  ;;  %v7472_v39 = vmul.f32 %v15500_v52, %v7360_v38  ;;  %vm16240_vm14 = vmmov %vm16168_vm0 }
 0x488   : > { %v7520_v41 = vmul.f32 0.01, %v7500_v20  ;;  %v7501_v51 = vadd.f32 %v15505_v3, %v7474_v5 }
 0x489   : > { %v7518_v45 = vmul.f32 0.01, %v7498_v12  ;;  %v7499_v13 = vadd.f32 %v15505_v3, %v7472_v39 }
 0x48a   : > { %v7540_v40 = vmax.f32 %v7500_v20, %v7520_v41  ;;  %v7521_v42 = vmul.f32 0.01, %v7501_v51 }
 0x48b   : > { %v7538_v43 = vmax.f32 %v7498_v12, %v7518_v45  ;;  %v7519_v10 = vmul.f32 0.01, %v7499_v13  ;;  %v11279_v2 = vpop.f32.mrb[28].mxu0 }
 0x48c   : > { %7560 = vst.msk [vmem:[%s15518_s8 + $0x30] sm:$0xff] %vm16168_vm0, %v7540_v40  ;;  %v7541_v23 = vmax.f32 %v7501_v51, %v7521_v42  ;;  %v7477_v28 = vmul.f32 %v11279_v2, %v15500_v52  ;;  %v7373_v58 = vpop.f32.mrb[29].mxu0 }
 0x48d   : > { %7558 = vst.msk [vmem:[%s15518_s8 + $0x20] sm:$0xff] %vm16226_vm8, %v7538_v43  ;;  %v7539_v62 = vmax.f32 %v7499_v13, %v7519_v10  ;;  %v7475_v44 = vmul.f32 %v15500_v52, %v7373_v58  ;;  %v11280_v8 = vpop.f32.mrb[30].mxu0  ;;  %vm16241_vm8 = vmmov %vm16168_vm0 }
 0x48e   : > { %7561 = vst.msk [vmem:[%s15518_s8 + $0x38] sm:$0xff] %vm16227_vm2, %v7541_v23  ;;  %v7504_v29 = vadd.f32 %v15505_v3, %v7477_v28  ;;  %v7478_v47 = vmul.f32 %v11280_v8, %v15500_v52  ;;  %v7376_v49 = vpop.f32.mrb[31].mxu0  ;;  %vm16242_vm2 = vmmov %vm16168_vm0 }
 0x48f   : > { %7559 = vst.msk [vmem:[%s15518_s8 + $0x28] sm:$0xff] %vm16228_vm15, %v7539_v62  ;;  %v7502_v16 = vadd.f32 %v15505_v3, %v7475_v44  ;;  %v7476_v34 = vmul.f32 %v15500_v52, %v7376_v49  ;;  %vm16243_vm15 = vmmov %vm16168_vm0 }
 0x490   : > { %v7524_v1 = vmul.f32 0.01, %v7504_v29  ;;  %v7505_v61 = vadd.f32 %v15505_v3, %v7478_v47 }
 0x491   : > { %v7522_v9 = vmul.f32 0.01, %v7502_v16  ;;  %v7503_v15 = vadd.f32 %v15505_v3, %v7476_v34 }
 0x492   : > { %v7544_v25 = vmax.f32 %v7504_v29, %v7524_v1  ;;  %v7525_v26 = vmul.f32 0.01, %v7505_v61 }
 0x493   : > { %v7542_v22 = vmax.f32 %v7502_v16, %v7522_v9  ;;  %v7523_v46 = vmul.f32 0.01, %v7503_v15  ;;  %v11283_v33 = vpop.f32.mrb[32].mxu0 }
 0x494   : > { %7564 = vst.msk [vmem:[%s15518_s8 + $0x50] sm:$0xff] %vm16229_vm1, %v7544_v25  ;;  %v7545_v56 = vmax.f32 %v7505_v61, %v7525_v26  ;;  %v7481_v21 = vmul.f32 %v11283_v33, %v15500_v52  ;;  %v7389_v54 = vpop.f32.mrb[33].mxu0  ;;  %vm16244_vm1 = vmmov %vm16168_vm0 }
 0x495   : > { %7562 = vst.msk [vmem:[%s15518_s8 + $0x40] sm:$0xff] %vm16230_vm12, %v7542_v22  ;;  %v7543_v11 = vmax.f32 %v7503_v15, %v7523_v46  ;;  %v7479_v14 = vmul.f32 %v15500_v52, %v7389_v54  ;;  %v11284_v31 = vpop.f32.mrb[34].mxu0  ;;  %vm16245_vm12 = vmmov %vm16168_vm0 }
 0x496   : > { %7565 = vst.msk [vmem:[%s15518_s8 + $0x58] sm:$0xff] %vm16231_vm11, %v7545_v56  ;;  %v7508_v59 = vadd.f32 %v15505_v3, %v7481_v21  ;;  %v7482_v17 = vmul.f32 %v11284_v31, %v15500_v52  ;;  %v7392_v18 = vpop.f32.mrb[35].mxu0  ;;  %vm16246_vm11 = vmmov %vm16168_vm0 }
 0x497   : > { %7563 = vst.msk [vmem:[%s15518_s8 + $0x48] sm:$0xff] %vm16232_vm3, %v7543_v11  ;;  %v7506_v60 = vadd.f32 %v15505_v3, %v7479_v14  ;;  %v7480_v37 = vmul.f32 %v15500_v52, %v7392_v18  ;;  %vm16247_vm3 = vmmov %vm16168_vm0 }
 0x498   : > { %v7528_v36 = vmul.f32 0.01, %v7508_v59  ;;  %v7509_v63 = vadd.f32 %v15505_v3, %v7482_v17  ;;  %v11469_v53 = vpop.f32.mrb[20].mxu1 }
 0x499   : > { %v7526_v50 = vmul.f32 0.01, %v7506_v60  ;;  %v7507_v35 = vadd.f32 %v15505_v3, %v7480_v37  ;;  %v9594_v32 = vmul.f32 %v11469_v53, %v15500_v52  ;;  %v9466_v57 = vpop.f32.mrb[21].mxu1 }
 0x49a   : > { %v7548_v6 = vmax.f32 %v7508_v59, %v7528_v36  ;;  %v7529_v7 = vmul.f32 0.01, %v7509_v63  ;;  %v9592_v4 = vmul.f32 %v15500_v52, %v9466_v57  ;;  %v11470_v19 = vpop.f32.mrb[22].mxu1 }
 0x49b   : > { %v7546_v24 = vmax.f32 %v7506_v60, %v7526_v50  ;;  %v7527_v30 = vmul.f32 0.01, %v7507_v35  ;;  %v11287_v48 = vpop.f32.mrb[36].mxu0  ;;  %v9621_v0 = vadd.f32 %v15505_v3, %v9594_v32  ;;  %v9595_v55 = vmul.f32 %v11470_v19, %v15500_v52  ;;  %v9469_v27 = vpop.f32.mrb[23].mxu1 }
 0x49c   : > { %7568 = vst.msk [vmem:[%s15518_s8 + $0x70] sm:$0xff] %vm16233_vm9, %v7548_v6  ;;  %v7549_v20 = vmax.f32 %v7509_v63, %v7529_v7  ;;  %v7485_v5 = vmul.f32 %v11287_v48, %v15500_v52  ;;  %v7405_v38 = vpop.f32.mrb[37].mxu0  ;;  %v9619_v12 = vadd.f32 %v15505_v3, %v9592_v4  ;;  %v9593_v39 = vmul.f32 %v15500_v52, %v9469_v27  ;;  %vm16248_vm9 = vmmov %vm16168_vm0 }
 0x49d   : > { %7566 = vst.msk [vmem:[%s15518_s8 + $0x60] sm:$0xff] %vm16234_vm7, %v7546_v24  ;;  %v7547_v41 = vmax.f32 %v7507_v35, %v7527_v30  ;;  %v9641_v51 = vmul.f32 0.01, %v9621_v0  ;;  %v7483_v45 = vmul.f32 %v15500_v52, %v7405_v38  ;;  %v11288_v13 = vpop.f32.mrb[38].mxu0  ;;  %v9622_v40 = vadd.f32 %v15505_v3, %v9595_v55  ;;  %vm16249_vm7 = vmmov %vm16168_vm0 }
 0x49e   : > { %7569 = vst.msk [vmem:[%s15518_s8 + $0x78] sm:$0xff] %vm16235_vm4, %v7549_v20  ;;  %v7512_v42 = vadd.f32 %v15505_v3, %v7485_v5  ;;  %v9639_v43 = vmul.f32 0.01, %v9619_v12  ;;  %v7486_v10 = vmul.f32 %v11288_v13, %v15500_v52  ;;  %v7408_v2 = vpop.f32.mrb[39].mxu0  ;;  %v9620_v23 = vadd.f32 %v15505_v3, %v9593_v39  ;;  %vm16250_vm4 = vmmov %vm16168_vm0 }
 0x49f   : > { %7567 = vst.msk [vmem:[%s15518_s8 + $0x68] sm:$0xff] %vm16236_vm6, %v7547_v41  ;;  %v9661_v28 = vmax.f32 %v9621_v0, %v9641_v51  ;;  %v7510_v58 = vadd.f32 %v15505_v3, %v7483_v45  ;;  %v9642_v62 = vmul.f32 0.01, %v9622_v40  ;;  %v7484_v44 = vmul.f32 %v15500_v52, %v7408_v2  ;;  %vm16251_vm6 = vmmov %vm16168_vm0 }
 0x4a0   : > { %v7532_v8 = vmul.f32 0.01, %v7512_v42  ;;  %v9659_v29 = vmax.f32 %v9619_v12, %v9639_v43  ;;  %v7513_v47 = vadd.f32 %v15505_v3, %v7486_v10  ;;  %v9640_v49 = vmul.f32 0.01, %v9620_v23  ;;  %v11473_v16 = vpop.f32.mrb[24].mxu1 }
 0x4a1   : > { %9681 = vst.msk [vmem:[%s15518_s8 + $0xb0] sm:$0xff] %vm16237_vm10, %v9661_v28  ;;  %v7530_v34 = vmul.f32 0.01, %v7510_v58  ;;  %v9662_v1 = vmax.f32 %v9622_v40, %v9642_v62  ;;  %v7511_v61 = vadd.f32 %v15505_v3, %v7484_v44  ;;  %v9598_v9 = vmul.f32 %v11473_v16, %v15500_v52  ;;  %v9482_v15 = vpop.f32.mrb[25].mxu1  ;;  %vm16252_vm10 = vmmov %vm16168_vm0 }
 0x4a2   : > { %v7552_v25 = vmax.f32 %v7512_v42, %v7532_v8  ;;  %9679 = vst.msk [vmem:[%s15518_s8 + $0xa0] sm:$0xff] %vm16238_vm13, %v9659_v29  ;;  %v7533_v26 = vmul.f32 0.01, %v7513_v47  ;;  %v9660_v22 = vmax.f32 %v9620_v23, %v9640_v49  ;;  %v9596_v46 = vmul.f32 %v15500_v52, %v9482_v15  ;;  %v11474_v33 = vpop.f32.mrb[26].mxu1  ;;  %vm16253_vm13 = vmmov %vm16168_vm0 }
 0x4a3   : > { %v7550_v56 = vmax.f32 %v7510_v58, %v7530_v34  ;;  %9682 = vst.msk [vmem:[%s15518_s8 + $0xb8] sm:$0xff] %vm16239_vm5, %v9662_v1  ;;  %v7531_v21 = vmul.f32 0.01, %v7511_v61  ;;  %v9625_v54 = vadd.f32 %v15505_v3, %v9598_v9  ;;  %v9599_v11 = vmul.f32 %v11474_v33, %v15500_v52  ;;  %v9485_v14 = vpop.f32.mrb[27].mxu1  ;;  %vm16254_vm5 = vmmov %vm16168_vm0 }
 0x4a4   : > { %7572 = vst.msk [vmem:[%s15518_s8 + $0x90] sm:$0xff] %vm16240_vm14, %v7552_v25  ;;  %v7553_v31 = vmax.f32 %v7513_v47, %v7533_v26  ;;  %v9623_v59 = vadd.f32 %v15505_v3, %v9596_v46  ;;  %v9597_v17 = vmul.f32 %v15500_v52, %v9485_v14  ;;  %vm16255_vm14 = vmmov %vm16168_vm0 }
 0x4a5   : > { %9680 = vst.msk [vmem:[%s15518_s8 + $0xa8] sm:$0xff] %vm16168_vm0, %v9660_v22  ;;  %v7551_v18 = vmax.f32 %v7511_v61, %v7531_v21  ;;  %v9645_v60 = vmul.f32 0.01, %v9625_v54  ;;  %v9626_v37 = vadd.f32 %v15505_v3, %v9599_v11 }
 0x4a6   : > { %7570 = vst.msk [vmem:[%s15518_s8 + $0x80] sm:$0xff] %vm16241_vm8, %v7550_v56  ;;  %v9643_v36 = vmul.f32 0.01, %v9623_v59  ;;  %v9624_v63 = vadd.f32 %v15505_v3, %v9597_v17  ;;  %vm16256_vm8 = vmmov %vm16168_vm0 }
 0x4a7   : > { %7573 = vst.msk [vmem:[%s15518_s8 + $0x98] sm:$0xff] %vm16242_vm2, %v7553_v31  ;;  %v9665_v53 = vmax.f32 %v9625_v54, %v9645_v60  ;;  %v9646_v50 = vmul.f32 0.01, %v9626_v37  ;;  %vm16257_vm2 = vmmov %vm16168_vm0 }
 0x4a8   : > { %7571 = vst.msk [vmem:[%s15518_s8 + $0x88] sm:$0xff] %vm16243_vm15, %v7551_v18  ;;  %v9663_v35 = vmax.f32 %v9623_v59, %v9643_v36  ;;  %v9644_v32 = vmul.f32 0.01, %v9624_v63  ;;  %v11477_v57 = vpop.f32.mrb[28].mxu1  ;;  %vm16258_vm15 = vmmov %vm16168_vm0 }
 0x4a9   : > { %9685 = vst.msk [vmem:[%s15518_s8 + $0xd0] sm:$0xff] %vm16244_vm1, %v9665_v53  ;;  %v9666_v6 = vmax.f32 %v9626_v37, %v9646_v50  ;;  %v9602_v7 = vmul.f32 %v11477_v57, %v15500_v52  ;;  %v9498_v4 = vpop.f32.mrb[29].mxu1 }
 0x4aa   : > { %9683 = vst.msk [vmem:[%s15518_s8 + $0xc0] sm:$0xff] %vm16245_vm12, %v9663_v35  ;;  %v9664_v19 = vmax.f32 %v9624_v63, %v9644_v32  ;;  %v9600_v24 = vmul.f32 %v15500_v52, %v9498_v4  ;;  %v11478_v30 = vpop.f32.mrb[30].mxu1 }
 0x4ab   : > { %9686 = vst.msk [vmem:[%s15518_s8 + $0xd8] sm:$0xff] %vm16246_vm11, %v9666_v6  ;;  %v9629_v48 = vadd.f32 %v15505_v3, %v9602_v7  ;;  %v9603_v0 = vmul.f32 %v11478_v30, %v15500_v52  ;;  %v9501_v55 = vpop.f32.mrb[31].mxu1 }
 0x4ac   : > { %9684 = vst.msk [vmem:[%s15518_s8 + $0xc8] sm:$0xff] %vm16247_vm3, %v9664_v19  ;;  %v9627_v27 = vadd.f32 %v15505_v3, %v9600_v24  ;;  %v9601_v20 = vmul.f32 %v15500_v52, %v9501_v55 }
 0x4ad   : > { %v9649_v5 = vmul.f32 0.01, %v9629_v48  ;;  %v9630_v38 = vadd.f32 %v15505_v3, %v9603_v0 }
 0x4ae   : > { %v9647_v12 = vmul.f32 0.01, %v9627_v27  ;;  %v9628_v39 = vadd.f32 %v15505_v3, %v9601_v20 }
 0x4af   : > { %v9669_v41 = vmax.f32 %v9629_v48, %v9649_v5  ;;  %v9650_v51 = vmul.f32 0.01, %v9630_v38 }
 0x4b0   : > { %v9667_v45 = vmax.f32 %v9627_v27, %v9647_v12  ;;  %v9648_v13 = vmul.f32 0.01, %v9628_v39  ;;  %v11481_v40 = vpop.f32.mrb[32].mxu1 }
 0x4b1   : > { %9689 = vst.msk [vmem:[%s15518_s8 + $0xf0] sm:$0xff] %vm16248_vm9, %v9669_v41  ;;  %v9670_v42 = vmax.f32 %v9630_v38, %v9650_v51  ;;  %v9606_v43 = vmul.f32 %v11481_v40, %v15500_v52  ;;  %v9514_v10 = vpop.f32.mrb[33].mxu1 }
 0x4b2   : > { %9687 = vst.msk [vmem:[%s15518_s8 + $0xe0] sm:$0xff] %vm16249_vm7, %v9667_v45  ;;  %v9668_v2 = vmax.f32 %v9628_v39, %v9648_v13  ;;  %v9604_v23 = vmul.f32 %v15500_v52, %v9514_v10  ;;  %v11482_v28 = vpop.f32.mrb[34].mxu1 }
 0x4b3   : > { %9690 = vst.msk [vmem:[%s15518_s8 + $0xf8] sm:$0xff] %vm16250_vm4, %v9670_v42  ;;  %v9633_v58 = vadd.f32 %v15505_v3, %v9606_v43  ;;  %v9607_v62 = vmul.f32 %v11482_v28, %v15500_v52  ;;  %v9517_v44 = vpop.f32.mrb[35].mxu1 }
 0x4b4   : > { %9688 = vst.msk [vmem:[%s15518_s8 + $0xe8] sm:$0xff] %vm16251_vm6, %v9668_v2  ;;  %v9631_v8 = vadd.f32 %v15505_v3, %v9604_v23  ;;  %v9605_v29 = vmul.f32 %v15500_v52, %v9517_v44 }
 0x4b5   : > { %v9653_v47 = vmul.f32 0.01, %v9633_v58  ;;  %v9634_v49 = vadd.f32 %v15505_v3, %v9607_v62 }
 0x4b6   : > { %v9651_v16 = vmul.f32 0.01, %v9631_v8  ;;  %v9632_v34 = vadd.f32 %v15505_v3, %v9605_v29 }
 0x4b7   : > { %v9673_v1 = vmax.f32 %v9633_v58, %v9653_v47  ;;  %v9654_v61 = vmul.f32 0.01, %v9634_v49 }
 0x4b8   : > { %v9671_v9 = vmax.f32 %v9631_v8, %v9651_v16  ;;  %v9652_v15 = vmul.f32 0.01, %v9632_v34  ;;  %v11485_v25 = vpop.f32.mrb[36].mxu1 }
 0x4b9   : > { %9693 = vst.msk [vmem:[%s15518_s8 + $0x110] sm:$0xff] %vm16252_vm10, %v9673_v1  ;;  %v9674_v26 = vmax.f32 %v9634_v49, %v9654_v61  ;;  %v9610_v22 = vmul.f32 %v11485_v25, %v15500_v52  ;;  %v9530_v46 = vpop.f32.mrb[37].mxu1 }
 0x4ba   : > { %9691 = vst.msk [vmem:[%s15518_s8 + $0x100] sm:$0xff] %vm16253_vm13, %v9671_v9  ;;  %v9672_v33 = vmax.f32 %v9632_v34, %v9652_v15  ;;  %v9608_v56 = vmul.f32 %v15500_v52, %v9530_v46  ;;  %v11486_v21 = vpop.f32.mrb[38].mxu1 }
 0x4bb   : > { %9694 = vst.msk [vmem:[%s15518_s8 + $0x118] sm:$0xff] %vm16254_vm5, %v9674_v26  ;;  %v9637_v54 = vadd.f32 %v15505_v3, %v9610_v22  ;;  %v9611_v11 = vmul.f32 %v11486_v21, %v15500_v52  ;;  %v9533_v14 = vpop.f32.mrb[39].mxu1 }
 0x4bc   : > { %9692 = vst.msk [vmem:[%s15518_s8 + $0x108] sm:$0xff] %vm16255_vm14, %v9672_v33  ;;  %v9635_v31 = vadd.f32 %v15505_v3, %v9608_v56  ;;  %v9609_v59 = vmul.f32 %v15500_v52, %v9533_v14 }
 0x4bd   : > { %v9657_v17 = vmul.f32 0.01, %v9637_v54  ;;  %v9638_v18 = vadd.f32 %v15505_v3, %v9611_v11 }
 0x4be   : > { %v9655_v60 = vmul.f32 0.01, %v9635_v31  ;;  %v9636_v37 = vadd.f32 %v15505_v3, %v9609_v59 }
 0x4bf   : > { %v9677_v36 = vmax.f32 %v9637_v54, %v9657_v17  ;;  %v9658_v63 = vmul.f32 0.01, %v9638_v18 }
 0x4c0   : > { %v9675_v53 = vmax.f32 %v9635_v31, %v9655_v60  ;;  %v9656_v50 = vmul.f32 0.01, %v9636_v37 }
 0x4c1   : > { %9697 = vst.msk [vmem:[%s15518_s8 + $0x130] sm:$0xff] %vm16168_vm0, %v9677_v36  ;;  %v9678_v35 = vmax.f32 %v9638_v18, %v9658_v63 }
 0x4c2   : > { %9695 = vst.msk [vmem:[%s15518_s8 + $0x120] sm:$0xff] %vm16256_vm8, %v9675_v53  ;;  %v9676_v32 = vmax.f32 %v9636_v37, %v9656_v50 }
 0x4c3   : > { %9698 = vst.msk [vmem:[%s15518_s8 + $0x138] sm:$0xff] %vm16257_vm2, %v9678_v35 }
 0x4c4   : > { %9696 = vst.msk [vmem:[%s15518_s8 + $0x128] sm:$0xff] %vm16258_vm15, %v9676_v32 }
 0x4c5 PF: > { %s17_s24 = sadd.s32 1, %s12299_s24  }
 0x4c6   : > { %p14_p4 = scmp.ge.s32.totalorder %s17_s24, 4  }
 0x4c8   :  { %16 = sbr.rel (!%p14_p4) target bundleno = 1 (0x1), region = 94 }

</bundles_post_ra>
